<compile_context>
chip_gen: v6e
topology: v6e:2x2x1
jax: 0.10.0
libtpu: 0.0.40
codegen_flags: <defaults>
</compile_context>

<pallas_src>
import functools

import jax
import jax.numpy as jnp
from jax.experimental import pallas as pl
from jax.experimental.pallas import tpu as pltpu  # noqa: F401  (TPU backend)


# ----------------------------------------------------------------------------
# Fused kernel: encoder (T steps x num_layers) + batched heads + decoder (MT)
# ----------------------------------------------------------------------------
def make_fused_kernel(num_layers, T, MT, D_in, H, P, B):
    G = 4 * H

    def kernel(*refs):
        # ---- parse flat ref list -------------------------------------------
        idx = 0
        x_ref = refs[idx]; idx += 1                       # (B, T, D_in)
        wcat, bias = [], []
        for _ in range(num_layers):
            wcat.append(refs[idx][...])                   # (D_l + H, 4H)  [Wih; Whh]
            bias.append(refs[idx + 1][...])               # (1, 4H)        b_ih + b_hh
            idx += 2
        ws = refs[idx][...]; bs = refs[idx + 1][...]      # (H, D_in), (1, D_in)
        w1 = refs[idx + 2][...]; b1 = refs[idx + 3][...]  # (H, H//2), (1, H//2)
        w2 = refs[idx + 4][...]; b2 = refs[idx + 5][...]  # (H//2, P), (1, P)
        idx += 6
        sens_back_ref, sens_fwd_ref, yields_ref = refs[idx:idx + 3]

        # ---- preamble: hoist loads / broadcasts out of the unrolled loops ---
        bias_b = [jnp.broadcast_to(b, (B, G)) for b in bias]
        bs_b = jnp.broadcast_to(bs, (B, D_in))
        x_all = x_ref[...]                                 # single full load (B,T,D)

        # ---- helpers ---------------------------------------------------------
        def cell(gates, c_prev):
            # PyTorch gate order i, f, g, o; one full-width sigmoid pass,
            # unused g-lanes of the sigmoid are simply discarded.
            sig = jax.nn.sigmoid(gates)
            i = sig[:, 0 * H:1 * H]
            f = sig[:, 1 * H:2 * H]
            o = sig[:, 3 * H:4 * H]
            g = jnp.tanh(gates[:, 2 * H:3 * H])
            c_new = f * c_prev + i * g
            h_new = o * jnp.tanh(c_new)
            return h_new, c_new

        def lstm_stack(x_in, h, c):
            # One time step through all layers; fused [x_l, h_l] @ [Wih; Whh].
            for l in range(num_layers):
                xh = jnp.concatenate([x_in, h[l]], axis=-1)
                gates = jnp.dot(xh, wcat[l],
                                preferred_element_type=jnp.float32) + bias_b[l]
                h[l], c[l] = cell(gates, c[l])
                x_in = h[l]
            return x_in

        def batch_major(rows, n):
            # rows: list of n arrays (B, W) -> (B*n, W), ordered (b, step)
            return jnp.concatenate(
                [rows[s][b:b + 1, :] for b in range(B) for s in range(n)], axis=0)

        # ---- state carried as live values (fully unrolled, no scratch) ------
        h = [jnp.zeros((B, H), jnp.float32) for _ in range(num_layers)]
        c = [jnp.zeros((B, H), jnp.float32) for _ in range(num_layers)]

        # ---- encoder ---------------------------------------------------------
        h_top_enc = []
        for t in range(T):
            h_top_enc.append(lstm_stack(x_all[:, t, :], h, c))

        # batched output heads over all T encoder steps (off the recurrence path)
        henc = batch_major(h_top_enc, T)                   # (B*T, H)
        xr = jnp.maximum(henc, 0.0)
        sens_enc = jnp.dot(xr, ws, preferred_element_type=jnp.float32) + bs
        hmid = jnp.maximum(
            jnp.dot(xr, w1, preferred_element_type=jnp.float32) + b1, 0.0)
        yld_enc = jnp.dot(hmid, w2, preferred_element_type=jnp.float32) + b2

        sens_enc = sens_enc.reshape(B, T, D_in)
        sens_back_ref[...] = sens_enc
        yields_ref[:, 0:T, :] = yld_enc.reshape(B, T, P)

        # ---- autoregressive decoder -----------------------------------------
        dec_in = sens_enc[:, T - 1, :]          # sensors_back[:, -1, :] (detach == id)
        h_top_dec, sens_dec = [], []
        for s in range(MT):
            h_top = lstm_stack(dec_in, h, c)
            h_top_dec.append(h_top)
            # sensors head must stay in the loop (autoregressive feedback)
            sens = jnp.dot(jnp.maximum(h_top, 0.0), ws,
                           preferred_element_type=jnp.float32) + bs_b
            sens_dec.append(sens)
            dec_in = sens

        # yields head deferred out of the serial decoder chain (batched)
        hdec = batch_major(h_top_dec, MT)                  # (B*MT, H)
        xr_d = jnp.maximum(hdec, 0.0)
        hmid_d = jnp.maximum(
            jnp.dot(xr_d, w1, preferred_element_type=jnp.float32) + b1, 0.0)
        yld_dec = jnp.dot(hmid_d, w2, preferred_element_type=jnp.float32) + b2

        sens_fwd_ref[...] = batch_major(sens_dec, MT).reshape(B, MT, D_in)
        yields_ref[:, T:T + MT, :] = yld_dec.reshape(B, MT, P)

    return kernel


# ----------------------------------------------------------------------------
# Forward wrapper (no pre/post-processing HLOs: single pallas_call)
# ----------------------------------------------------------------------------
@functools.partial(jax.jit, static_argnames=("max_timesteps",))
def quantile_combined_forward(x, params, max_timesteps=4):
    """JAX/Pallas port of QuantileCombinedModel.forward (hidden_states=False).

    x: (B, T, D_in) -> (sensors_forward (B, MT, D_in),
                        sensors_back    (B, T,  D_in),
                        yields          (B, T+MT, P))
    """
    lstm_params = params["lstm"]          # list of per-layer (wcat (D_l+H,4H), b (1,4H))
    ws, bs, w1, b1, w2, b2 = params["heads"]
    B, T, D_in = x.shape
    num_layers = len(lstm_params)
    H = lstm_params[0][1].shape[1] // 4
    P = w2.shape[1]
    MT = max_timesteps

    flat_inputs = [x]
    for (wc, b) in lstm_params:
        flat_inputs += [wc, b]
    flat_inputs += [ws, bs, w1, b1, w2, b2]

    kernel = make_fused_kernel(num_layers, T, MT, D_in, H, P, B)
    sens_back, sens_fwd, yields = pl.pallas_call(
        kernel,
        out_shape=(
            jax.ShapeDtypeStruct((B, T, D_in), jnp.float32),
            jax.ShapeDtypeStruct((B, MT, D_in), jnp.float32),
            jax.ShapeDtypeStruct((B, T + MT, P), jnp.float32),
        ),
    )(*flat_inputs)
    return sens_fwd, sens_back, yields


# ----------------------------------------------------------------------------
# Pure-JAX reference (same math, HIGHEST precision) for correctness check
# ----------------------------------------------------------------------------
def reference_forward(x, params, max_timesteps):
    prec = jax.lax.Precision.HIGHEST
    lstm_params = params["lstm"]
    ws, bs, w1, b1, w2, b2 = params["heads"]
    B, T, D_in = x.shape
    num_layers = len(lstm_params)
    H = lstm_params[0][1].shape[1] // 4

    h = [jnp.zeros((B, H), jnp.float32) for _ in range(num_layers)]
    c = [jnp.zeros((B, H), jnp.float32) for _ in range(num_layers)]

    def lstm_step(x_in):
        for l, (wc, b) in enumerate(lstm_params):
            gates = jnp.dot(jnp.concatenate([x_in, h[l]], axis=-1), wc,
                            precision=prec) + b
            i = jax.nn.sigmoid(gates[:, 0:H])
            f = jax.nn.sigmoid(gates[:, H:2 * H])
            g = jnp.tanh(gates[:, 2 * H:3 * H])
            o = jax.nn.sigmoid(gates[:, 3 * H:4 * H])
            c[l] = f * c[l] + i * g
            h[l] = o * jnp.tanh(c[l])
            x_in = h[l]
        return x_in

    def heads(ht):
        xr = jnp.maximum(ht, 0.0)
        sens = jnp.dot(xr, ws, precision=prec) + bs
        hmid = jnp.maximum(jnp.dot(xr, w1, precision=prec) + b1, 0.0)
        yld = jnp.dot(hmid, w2, precision=prec) + b2
        return sens, yld

    sens_back, ylds = [], []
    for t in range(T):
        s, y = heads(lstm_step(x[:, t, :]))
        sens_back.append(s); ylds.append(y)
    sens_back = jnp.stack(sens_back, axis=1)
    yields = [jnp.stack(ylds, axis=1)]

    dec_in = sens_back[:, -1, :]
    sens_fwd = []
    for _ in range(max_timesteps):
        s, y = heads(lstm_step(dec_in))
        sens_fwd.append(s); yields.append(y[:, None, :])
        dec_in = s
    return jnp.stack(sens_fwd, axis=1), sens_back, jnp.concatenate(yields, axis=1)


# ----------------------------------------------------------------------------
# Deterministic parameter construction (mirrors nn.LSTM / nn.Linear shapes,
# with the per-layer [Wih; Whh] fusion done once, at parameter-build time).
# ----------------------------------------------------------------------------
def make_params(key, input_size, hidden_size, num_layers, num_outputs):
    H = hidden_size
    keys = jax.random.split(key, 4 * num_layers + 6)
    k = iter(keys)
    scale = 1.0 / jnp.sqrt(H)

    lstm_params = []
    for layer in range(num_layers):
        d_in = input_size if layer == 0 else H
        wih = jax.random.uniform(next(k), (4 * H, d_in), jnp.float32, -scale, scale)
        whh = jax.random.uniform(next(k), (4 * H, H), jnp.float32, -scale, scale)
        bih = jax.random.uniform(next(k), (4 * H,), jnp.float32, -scale, scale)
        bhh = jax.random.uniform(next(k), (4 * H,), jnp.float32, -scale, scale)
        wcat = jnp.concatenate([wih.T, whh.T], axis=0)      # (d_in + H, 4H)
        lstm_params.append((wcat, (bih + bhh)[None, :]))

    # linear head: Linear(H, input_size)
    ws = jax.random.uniform(next(k), (input_size, H), jnp.float32, -scale, scale).T
    bs = jax.random.uniform(next(k), (input_size,), jnp.float32, -scale, scale)[None, :]
    # linear_predictions: Linear(H, H//2) -> Linear(H//2, num_outputs)
    w1 = jax.random.uniform(next(k), (H // 2, H), jnp.float32, -scale, scale).T
    b1 = jax.random.uniform(next(k), (H // 2,), jnp.float32, -scale, scale)[None, :]
    w2 = jax.random.uniform(next(k), (num_outputs, H // 2), jnp.float32, -scale, scale).T
    b2 = jax.random.uniform(next(k), (num_outputs,), jnp.float32, -scale, scale)[None, :]

    return {"lstm": lstm_params, "heads": (ws, bs, w1, b1, w2, b2)}


# ----------------------------------------------------------------------------
if __name__ == "__main__":
    # small shapes consistent with the module
    B, T = 2, 8
    INPUT_SIZE = 16
    HIDDEN = 32
    NUM_LAYERS = 2
    NUM_PREDICTIONS = 3
    QUANTILES = [0.95, 0.5, 0.05]
    NUM_OUT = NUM_PREDICTIONS * len(QUANTILES)     # 9
    MAX_TIMESTEPS = 4

    key = jax.random.PRNGKey(0)
    kx, kp = jax.random.split(key)
    x = jax.random.normal(kx, (B, T, INPUT_SIZE), jnp.float32)
    params = make_params(kp, INPUT_SIZE, HIDDEN, NUM_LAYERS, NUM_OUT)

    sensors_forward, sensors_back, yields = quantile_combined_forward(
        x, params, max_timesteps=MAX_TIMESTEPS)
    jax.block_until_ready((sensors_forward, sensors_back, yields))

    assert sensors_forward.shape == (B, MAX_TIMESTEPS, INPUT_SIZE)
    assert sensors_back.shape == (B, T, INPUT_SIZE)
    assert yields.shape == (B, T + MAX_TIMESTEPS, NUM_OUT)
    assert jnp.all(jnp.isfinite(sensors_forward))
    assert jnp.all(jnp.isfinite(sensors_back))
    assert jnp.all(jnp.isfinite(yields))

    # correctness vs. pure-JAX reference (generous tolerances: MXU f32 path)
    ref_sf, ref_sb, ref_y = reference_forward(x, params, MAX_TIMESTEPS)
    assert jnp.allclose(sensors_forward, ref_sf, atol=1e-3, rtol=1e-2)
    assert jnp.allclose(sensors_back, ref_sb, atol=1e-3, rtol=1e-2)
    assert jnp.allclose(yields, ref_y, atol=1e-3, rtol=1e-2)

    print("KERNEL_OK")
</pallas_src>

<mosaic_0001>
module attributes {stable_mosaic.version = 11 : i64} {
  func.func @kernel(%arg0: memref<2x8x16xf32, #tpu.memory_space<vmem>>, %arg1: memref<48x128xf32, #tpu.memory_space<vmem>>, %arg2: memref<1x128xf32, #tpu.memory_space<vmem>>, %arg3: memref<64x128xf32, #tpu.memory_space<vmem>>, %arg4: memref<1x128xf32, #tpu.memory_space<vmem>>, %arg5: memref<32x16xf32, #tpu.memory_space<vmem>>, %arg6: memref<1x16xf32, #tpu.memory_space<vmem>>, %arg7: memref<32x16xf32, #tpu.memory_space<vmem>>, %arg8: memref<1x16xf32, #tpu.memory_space<vmem>>, %arg9: memref<16x9xf32, #tpu.memory_space<vmem>>, %arg10: memref<1x9xf32, #tpu.memory_space<vmem>>, %arg11: memref<2x8x16xf32, #tpu.memory_space<vmem>>, %arg12: memref<2x4x16xf32, #tpu.memory_space<vmem>>, %arg13: memref<2x12x9xf32, #tpu.memory_space<vmem>>) attributes {dimension_semantics = [], scalar_prefetch = 0 : i64, scratch_operands = 0 : i64, tpu.core_type = #tpu.core_type<tc>} {
    %c0 = arith.constant 0 : index
    %c0_0 = arith.constant 0 : index
    %0 = vector.load %arg1[%c0, %c0_0] : memref<48x128xf32, #tpu.memory_space<vmem>>, vector<48x128xf32>
    %c0_1 = arith.constant 0 : index
    %c0_2 = arith.constant 0 : index
    %1 = vector.load %arg2[%c0_1, %c0_2] : memref<1x128xf32, #tpu.memory_space<vmem>>, vector<1x128xf32>
    %c0_3 = arith.constant 0 : index
    %c0_4 = arith.constant 0 : index
    %2 = vector.load %arg3[%c0_3, %c0_4] : memref<64x128xf32, #tpu.memory_space<vmem>>, vector<64x128xf32>
    %c0_5 = arith.constant 0 : index
    %c0_6 = arith.constant 0 : index
    %3 = vector.load %arg4[%c0_5, %c0_6] : memref<1x128xf32, #tpu.memory_space<vmem>>, vector<1x128xf32>
    %c0_7 = arith.constant 0 : index
    %c0_8 = arith.constant 0 : index
    %4 = vector.load %arg5[%c0_7, %c0_8] : memref<32x16xf32, #tpu.memory_space<vmem>>, vector<32x16xf32>
    %c0_9 = arith.constant 0 : index
    %c0_10 = arith.constant 0 : index
    %5 = vector.load %arg6[%c0_9, %c0_10] : memref<1x16xf32, #tpu.memory_space<vmem>>, vector<1x16xf32>
    %c0_11 = arith.constant 0 : index
    %c0_12 = arith.constant 0 : index
    %6 = vector.load %arg7[%c0_11, %c0_12] : memref<32x16xf32, #tpu.memory_space<vmem>>, vector<32x16xf32>
    %c0_13 = arith.constant 0 : index
    %c0_14 = arith.constant 0 : index
    %7 = vector.load %arg8[%c0_13, %c0_14] : memref<1x16xf32, #tpu.memory_space<vmem>>, vector<1x16xf32>
    %c0_15 = arith.constant 0 : index
    %c0_16 = arith.constant 0 : index
    %8 = vector.load %arg9[%c0_15, %c0_16] : memref<16x9xf32, #tpu.memory_space<vmem>>, vector<16x9xf32>
    %c0_17 = arith.constant 0 : index
    %c0_18 = arith.constant 0 : index
    %9 = vector.load %arg10[%c0_17, %c0_18] : memref<1x9xf32, #tpu.memory_space<vmem>>, vector<1x9xf32>
    %10 = vector.shape_cast %1 : vector<1x128xf32> to vector<1x128xf32>
    %11 = vector.broadcast %10 : vector<1x128xf32> to vector<2x128xf32>
    %12 = vector.shape_cast %3 : vector<1x128xf32> to vector<1x128xf32>
    %13 = vector.broadcast %12 : vector<1x128xf32> to vector<2x128xf32>
    %14 = vector.shape_cast %5 : vector<1x16xf32> to vector<1x16xf32>
    %15 = vector.broadcast %14 : vector<1x16xf32> to vector<2x16xf32>
    %c0_19 = arith.constant 0 : index
    %c0_20 = arith.constant 0 : index
    %c0_21 = arith.constant 0 : index
    %16 = vector.load %arg0[%c0_19, %c0_20, %c0_21] : memref<2x8x16xf32, #tpu.memory_space<vmem>>, vector<2x8x16xf32>
    %cst = arith.constant 0.000000e+00 : f32
    %17 = vector.broadcast %cst : f32 to vector<2x32xf32>
    %cst_22 = arith.constant 0.000000e+00 : f32
    %18 = vector.broadcast %cst_22 : f32 to vector<2x32xf32>
    %cst_23 = arith.constant 0.000000e+00 : f32
    %19 = vector.broadcast %cst_23 : f32 to vector<2x32xf32>
    %cst_24 = arith.constant 0.000000e+00 : f32
    %20 = vector.broadcast %cst_24 : f32 to vector<2x32xf32>
    %21 = vector.extract_strided_slice %16 {offsets = [0, 0, 0], sizes = [2, 1, 16], strides = [1, 1, 1]} : vector<2x8x16xf32> to vector<2x1x16xf32>
    %22 = vector.shape_cast %21 : vector<2x1x16xf32> to vector<2x16xf32>
    %23 = tpu.concatenate %22, %17 in 1 : vector<2x16xf32>, vector<2x32xf32> -> vector<2x48xf32>
    %cst_25 = arith.constant dense<0.000000e+00> : vector<2x128xf32>
    %24 = tpu.matmul %23, %0, %cst_25 {dimension_numbers = #tpu.dot_dimension_numbers<[1], [0], [0], [1], [0, 0, 1, 1], [], []>} : vector<2x48xf32>, vector<48x128xf32>, vector<2x128xf32> -> vector<2x128xf32>
    %25 = arith.addf %24, %11 : vector<2x128xf32>
    %26 = arith.negf %25 : vector<2x128xf32>
    %27 = math.exp %26 : vector<2x128xf32>
    %cst_26 = arith.constant 1.000000e+00 : f32
    %28 = vector.broadcast %cst_26 : f32 to vector<2x128xf32>
    %29 = arith.addf %28, %27 : vector<2x128xf32>
    %30 = arith.divf %28, %29 : vector<2x128xf32>
    %31 = vector.extract_strided_slice %30 {offsets = [0, 0], sizes = [2, 32], strides = [1, 1]} : vector<2x128xf32> to vector<2x32xf32>
    %32 = vector.extract_strided_slice %30 {offsets = [0, 32], sizes = [2, 32], strides = [1, 1]} : vector<2x128xf32> to vector<2x32xf32>
    %33 = vector.extract_strided_slice %30 {offsets = [0, 96], sizes = [2, 32], strides = [1, 1]} : vector<2x128xf32> to vector<2x32xf32>
    %34 = vector.extract_strided_slice %25 {offsets = [0, 64], sizes = [2, 32], strides = [1, 1]} : vector<2x128xf32> to vector<2x32xf32>
    %35 = math.tanh %34 : vector<2x32xf32>
    %36 = arith.mulf %32, %19 : vector<2x32xf32>
    %37 = arith.mulf %31, %35 : vector<2x32xf32>
    %38 = arith.addf %36, %37 : vector<2x32xf32>
    %39 = math.tanh %38 : vector<2x32xf32>
    %40 = arith.mulf %33, %39 : vector<2x32xf32>
    %41 = tpu.concatenate %40, %18 in 1 : vector<2x32xf32>, vector<2x32xf32> -> vector<2x64xf32>
    %cst_27 = arith.constant dense<0.000000e+00> : vector<2x128xf32>
    %42 = tpu.matmul %41, %2, %cst_27 {dimension_numbers = #tpu.dot_dimension_numbers<[1], [0], [0], [1], [0, 0, 1, 1], [], []>} : vector<2x64xf32>, vector<64x128xf32>, vector<2x128xf32> -> vector<2x128xf32>
    %43 = arith.addf %42, %13 : vector<2x128xf32>
    %44 = arith.negf %43 : vector<2x128xf32>
    %45 = math.exp %44 : vector<2x128xf32>
    %cst_28 = arith.constant 1.000000e+00 : f32
    %46 = vector.broadcast %cst_28 : f32 to vector<2x128xf32>
    %47 = arith.addf %46, %45 : vector<2x128xf32>
    %48 = arith.divf %46, %47 : vector<2x128xf32>
    %49 = vector.extract_strided_slice %48 {offsets = [0, 0], sizes = [2, 32], strides = [1, 1]} : vector<2x128xf32> to vector<2x32xf32>
    %50 = vector.extract_strided_slice %48 {offsets = [0, 32], sizes = [2, 32], strides = [1, 1]} : vector<2x128xf32> to vector<2x32xf32>
    %51 = vector.extract_strided_slice %48 {offsets = [0, 96], sizes = [2, 32], strides = [1, 1]} : vector<2x128xf32> to vector<2x32xf32>
    %52 = vector.extract_strided_slice %43 {offsets = [0, 64], sizes = [2, 32], strides = [1, 1]} : vector<2x128xf32> to vector<2x32xf32>
    %53 = math.tanh %52 : vector<2x32xf32>
    %54 = arith.mulf %50, %20 : vector<2x32xf32>
    %55 = arith.mulf %49, %53 : vector<2x32xf32>
    %56 = arith.addf %54, %55 : vector<2x32xf32>
    %57 = math.tanh %56 : vector<2x32xf32>
    %58 = arith.mulf %51, %57 : vector<2x32xf32>
    %59 = vector.extract_strided_slice %16 {offsets = [0, 1, 0], sizes = [2, 1, 16], strides = [1, 1, 1]} : vector<2x8x16xf32> to vector<2x1x16xf32>
    %60 = vector.shape_cast %59 : vector<2x1x16xf32> to vector<2x16xf32>
    %61 = tpu.concatenate %60, %40 in 1 : vector<2x16xf32>, vector<2x32xf32> -> vector<2x48xf32>
    %cst_29 = arith.constant dense<0.000000e+00> : vector<2x128xf32>
    %62 = tpu.matmul %61, %0, %cst_29 {dimension_numbers = #tpu.dot_dimension_numbers<[1], [0], [0], [1], [0, 0, 1, 1], [], []>} : vector<2x48xf32>, vector<48x128xf32>, vector<2x128xf32> -> vector<2x128xf32>
    %63 = arith.addf %62, %11 : vector<2x128xf32>
    %64 = arith.negf %63 : vector<2x128xf32>
    %65 = math.exp %64 : vector<2x128xf32>
    %cst_30 = arith.constant 1.000000e+00 : f32
    %66 = vector.broadcast %cst_30 : f32 to vector<2x128xf32>
    %67 = arith.addf %66, %65 : vector<2x128xf32>
    %68 = arith.divf %66, %67 : vector<2x128xf32>
    %69 = vector.extract_strided_slice %68 {offsets = [0, 0], sizes = [2, 32], strides = [1, 1]} : vector<2x128xf32> to vector<2x32xf32>
    %70 = vector.extract_strided_slice %68 {offsets = [0, 32], sizes = [2, 32], strides = [1, 1]} : vector<2x128xf32> to vector<2x32xf32>
    %71 = vector.extract_strided_slice %68 {offsets = [0, 96], sizes = [2, 32], strides = [1, 1]} : vector<2x128xf32> to vector<2x32xf32>
    %72 = vector.extract_strided_slice %63 {offsets = [0, 64], sizes = [2, 32], strides = [1, 1]} : vector<2x128xf32> to vector<2x32xf32>
    %73 = math.tanh %72 : vector<2x32xf32>
    %74 = arith.mulf %70, %38 : vector<2x32xf32>
    %75 = arith.mulf %69, %73 : vector<2x32xf32>
    %76 = arith.addf %74, %75 : vector<2x32xf32>
    %77 = math.tanh %76 : vector<2x32xf32>
    %78 = arith.mulf %71, %77 : vector<2x32xf32>
    %79 = tpu.concatenate %78, %58 in 1 : vector<2x32xf32>, vector<2x32xf32> -> vector<2x64xf32>
    %cst_31 = arith.constant dense<0.000000e+00> : vector<2x128xf32>
    %80 = tpu.matmul %79, %2, %cst_31 {dimension_numbers = #tpu.dot_dimension_numbers<[1], [0], [0], [1], [0, 0, 1, 1], [], []>} : vector<2x64xf32>, vector<64x128xf32>, vector<2x128xf32> -> vector<2x128xf32>
    %81 = arith.addf %80, %13 : vector<2x128xf32>
    %82 = arith.negf %81 : vector<2x128xf32>
    %83 = math.exp %82 : vector<2x128xf32>
    %cst_32 = arith.constant 1.000000e+00 : f32
    %84 = vector.broadcast %cst_32 : f32 to vector<2x128xf32>
    %85 = arith.addf %84, %83 : vector<2x128xf32>
    %86 = arith.divf %84, %85 : vector<2x128xf32>
    %87 = vector.extract_strided_slice %86 {offsets = [0, 0], sizes = [2, 32], strides = [1, 1]} : vector<2x128xf32> to vector<2x32xf32>
    %88 = vector.extract_strided_slice %86 {offsets = [0, 32], sizes = [2, 32], strides = [1, 1]} : vector<2x128xf32> to vector<2x32xf32>
    %89 = vector.extract_strided_slice %86 {offsets = [0, 96], sizes = [2, 32], strides = [1, 1]} : vector<2x128xf32> to vector<2x32xf32>
    %90 = vector.extract_strided_slice %81 {offsets = [0, 64], sizes = [2, 32], strides = [1, 1]} : vector<2x128xf32> to vector<2x32xf32>
    %91 = math.tanh %90 : vector<2x32xf32>
    %92 = arith.mulf %88, %56 : vector<2x32xf32>
    %93 = arith.mulf %87, %91 : vector<2x32xf32>
    %94 = arith.addf %92, %93 : vector<2x32xf32>
    %95 = math.tanh %94 : vector<2x32xf32>
    %96 = arith.mulf %89, %95 : vector<2x32xf32>
    %97 = vector.extract_strided_slice %16 {offsets = [0, 2, 0], sizes = [2, 1, 16], strides = [1, 1, 1]} : vector<2x8x16xf32> to vector<2x1x16xf32>
    %98 = vector.shape_cast %97 : vector<2x1x16xf32> to vector<2x16xf32>
    %99 = tpu.concatenate %98, %78 in 1 : vector<2x16xf32>, vector<2x32xf32> -> vector<2x48xf32>
    %cst_33 = arith.constant dense<0.000000e+00> : vector<2x128xf32>
    %100 = tpu.matmul %99, %0, %cst_33 {dimension_numbers = #tpu.dot_dimension_numbers<[1], [0], [0], [1], [0, 0, 1, 1], [], []>} : vector<2x48xf32>, vector<48x128xf32>, vector<2x128xf32> -> vector<2x128xf32>
    %101 = arith.addf %100, %11 : vector<2x128xf32>
    %102 = arith.negf %101 : vector<2x128xf32>
    %103 = math.exp %102 : vector<2x128xf32>
    %cst_34 = arith.constant 1.000000e+00 : f32
    %104 = vector.broadcast %cst_34 : f32 to vector<2x128xf32>
    %105 = arith.addf %104, %103 : vector<2x128xf32>
    %106 = arith.divf %104, %105 : vector<2x128xf32>
    %107 = vector.extract_strided_slice %106 {offsets = [0, 0], sizes = [2, 32], strides = [1, 1]} : vector<2x128xf32> to vector<2x32xf32>
    %108 = vector.extract_strided_slice %106 {offsets = [0, 32], sizes = [2, 32], strides = [1, 1]} : vector<2x128xf32> to vector<2x32xf32>
    %109 = vector.extract_strided_slice %106 {offsets = [0, 96], sizes = [2, 32], strides = [1, 1]} : vector<2x128xf32> to vector<2x32xf32>
    %110 = vector.extract_strided_slice %101 {offsets = [0, 64], sizes = [2, 32], strides = [1, 1]} : vector<2x128xf32> to vector<2x32xf32>
    %111 = math.tanh %110 : vector<2x32xf32>
    %112 = arith.mulf %108, %76 : vector<2x32xf32>
    %113 = arith.mulf %107, %111 : vector<2x32xf32>
    %114 = arith.addf %112, %113 : vector<2x32xf32>
    %115 = math.tanh %114 : vector<2x32xf32>
    %116 = arith.mulf %109, %115 : vector<2x32xf32>
    %117 = tpu.concatenate %116, %96 in 1 : vector<2x32xf32>, vector<2x32xf32> -> vector<2x64xf32>
    %cst_35 = arith.constant dense<0.000000e+00> : vector<2x128xf32>
    %118 = tpu.matmul %117, %2, %cst_35 {dimension_numbers = #tpu.dot_dimension_numbers<[1], [0], [0], [1], [0, 0, 1, 1], [], []>} : vector<2x64xf32>, vector<64x128xf32>, vector<2x128xf32> -> vector<2x128xf32>
    %119 = arith.addf %118, %13 : vector<2x128xf32>
    %120 = arith.negf %119 : vector<2x128xf32>
    %121 = math.exp %120 : vector<2x128xf32>
    %cst_36 = arith.constant 1.000000e+00 : f32
    %122 = vector.broadcast %cst_36 : f32 to vector<2x128xf32>
    %123 = arith.addf %122, %121 : vector<2x128xf32>
    %124 = arith.divf %122, %123 : vector<2x128xf32>
    %125 = vector.extract_strided_slice %124 {offsets = [0, 0], sizes = [2, 32], strides = [1, 1]} : vector<2x128xf32> to vector<2x32xf32>
    %126 = vector.extract_strided_slice %124 {offsets = [0, 32], sizes = [2, 32], strides = [1, 1]} : vector<2x128xf32> to vector<2x32xf32>
    %127 = vector.extract_strided_slice %124 {offsets = [0, 96], sizes = [2, 32], strides = [1, 1]} : vector<2x128xf32> to vector<2x32xf32>
    %128 = vector.extract_strided_slice %119 {offsets = [0, 64], sizes = [2, 32], strides = [1, 1]} : vector<2x128xf32> to vector<2x32xf32>
    %129 = math.tanh %128 : vector<2x32xf32>
    %130 = arith.mulf %126, %94 : vector<2x32xf32>
    %131 = arith.mulf %125, %129 : vector<2x32xf32>
    %132 = arith.addf %130, %131 : vector<2x32xf32>
    %133 = math.tanh %132 : vector<2x32xf32>
    %134 = arith.mulf %127, %133 : vector<2x32xf32>
    %135 = vector.extract_strided_slice %16 {offsets = [0, 3, 0], sizes = [2, 1, 16], strides = [1, 1, 1]} : vector<2x8x16xf32> to vector<2x1x16xf32>
    %136 = vector.shape_cast %135 : vector<2x1x16xf32> to vector<2x16xf32>
    %137 = tpu.concatenate %136, %116 in 1 : vector<2x16xf32>, vector<2x32xf32> -> vector<2x48xf32>
    %cst_37 = arith.constant dense<0.000000e+00> : vector<2x128xf32>
    %138 = tpu.matmul %137, %0, %cst_37 {dimension_numbers = #tpu.dot_dimension_numbers<[1], [0], [0], [1], [0, 0, 1, 1], [], []>} : vector<2x48xf32>, vector<48x128xf32>, vector<2x128xf32> -> vector<2x128xf32>
    %139 = arith.addf %138, %11 : vector<2x128xf32>
    %140 = arith.negf %139 : vector<2x128xf32>
    %141 = math.exp %140 : vector<2x128xf32>
    %cst_38 = arith.constant 1.000000e+00 : f32
    %142 = vector.broadcast %cst_38 : f32 to vector<2x128xf32>
    %143 = arith.addf %142, %141 : vector<2x128xf32>
    %144 = arith.divf %142, %143 : vector<2x128xf32>
    %145 = vector.extract_strided_slice %144 {offsets = [0, 0], sizes = [2, 32], strides = [1, 1]} : vector<2x128xf32> to vector<2x32xf32>
    %146 = vector.extract_strided_slice %144 {offsets = [0, 32], sizes = [2, 32], strides = [1, 1]} : vector<2x128xf32> to vector<2x32xf32>
    %147 = vector.extract_strided_slice %144 {offsets = [0, 96], sizes = [2, 32], strides = [1, 1]} : vector<2x128xf32> to vector<2x32xf32>
    %148 = vector.extract_strided_slice %139 {offsets = [0, 64], sizes = [2, 32], strides = [1, 1]} : vector<2x128xf32> to vector<2x32xf32>
    %149 = math.tanh %148 : vector<2x32xf32>
    %150 = arith.mulf %146, %114 : vector<2x32xf32>
    %151 = arith.mulf %145, %149 : vector<2x32xf32>
    %152 = arith.addf %150, %151 : vector<2x32xf32>
    %153 = math.tanh %152 : vector<2x32xf32>
    %154 = arith.mulf %147, %153 : vector<2x32xf32>
    %155 = tpu.concatenate %154, %134 in 1 : vector<2x32xf32>, vector<2x32xf32> -> vector<2x64xf32>
    %cst_39 = arith.constant dense<0.000000e+00> : vector<2x128xf32>
    %156 = tpu.matmul %155, %2, %cst_39 {dimension_numbers = #tpu.dot_dimension_numbers<[1], [0], [0], [1], [0, 0, 1, 1], [], []>} : vector<2x64xf32>, vector<64x128xf32>, vector<2x128xf32> -> vector<2x128xf32>
    %157 = arith.addf %156, %13 : vector<2x128xf32>
    %158 = arith.negf %157 : vector<2x128xf32>
    %159 = math.exp %158 : vector<2x128xf32>
    %cst_40 = arith.constant 1.000000e+00 : f32
    %160 = vector.broadcast %cst_40 : f32 to vector<2x128xf32>
    %161 = arith.addf %160, %159 : vector<2x128xf32>
    %162 = arith.divf %160, %161 : vector<2x128xf32>
    %163 = vector.extract_strided_slice %162 {offsets = [0, 0], sizes = [2, 32], strides = [1, 1]} : vector<2x128xf32> to vector<2x32xf32>
    %164 = vector.extract_strided_slice %162 {offsets = [0, 32], sizes = [2, 32], strides = [1, 1]} : vector<2x128xf32> to vector<2x32xf32>
    %165 = vector.extract_strided_slice %162 {offsets = [0, 96], sizes = [2, 32], strides = [1, 1]} : vector<2x128xf32> to vector<2x32xf32>
    %166 = vector.extract_strided_slice %157 {offsets = [0, 64], sizes = [2, 32], strides = [1, 1]} : vector<2x128xf32> to vector<2x32xf32>
    %167 = math.tanh %166 : vector<2x32xf32>
    %168 = arith.mulf %164, %132 : vector<2x32xf32>
    %169 = arith.mulf %163, %167 : vector<2x32xf32>
    %170 = arith.addf %168, %169 : vector<2x32xf32>
    %171 = math.tanh %170 : vector<2x32xf32>
    %172 = arith.mulf %165, %171 : vector<2x32xf32>
    %173 = vector.extract_strided_slice %16 {offsets = [0, 4, 0], sizes = [2, 1, 16], strides = [1, 1, 1]} : vector<2x8x16xf32> to vector<2x1x16xf32>
    %174 = vector.shape_cast %173 : vector<2x1x16xf32> to vector<2x16xf32>
    %175 = tpu.concatenate %174, %154 in 1 : vector<2x16xf32>, vector<2x32xf32> -> vector<2x48xf32>
    %cst_41 = arith.constant dense<0.000000e+00> : vector<2x128xf32>
    %176 = tpu.matmul %175, %0, %cst_41 {dimension_numbers = #tpu.dot_dimension_numbers<[1], [0], [0], [1], [0, 0, 1, 1], [], []>} : vector<2x48xf32>, vector<48x128xf32>, vector<2x128xf32> -> vector<2x128xf32>
    %177 = arith.addf %176, %11 : vector<2x128xf32>
    %178 = arith.negf %177 : vector<2x128xf32>
    %179 = math.exp %178 : vector<2x128xf32>
    %cst_42 = arith.constant 1.000000e+00 : f32
    %180 = vector.broadcast %cst_42 : f32 to vector<2x128xf32>
    %181 = arith.addf %180, %179 : vector<2x128xf32>
    %182 = arith.divf %180, %181 : vector<2x128xf32>
    %183 = vector.extract_strided_slice %182 {offsets = [0, 0], sizes = [2, 32], strides = [1, 1]} : vector<2x128xf32> to vector<2x32xf32>
    %184 = vector.extract_strided_slice %182 {offsets = [0, 32], sizes = [2, 32], strides = [1, 1]} : vector<2x128xf32> to vector<2x32xf32>
    %185 = vector.extract_strided_slice %182 {offsets = [0, 96], sizes = [2, 32], strides = [1, 1]} : vector<2x128xf32> to vector<2x32xf32>
    %186 = vector.extract_strided_slice %177 {offsets = [0, 64], sizes = [2, 32], strides = [1, 1]} : vector<2x128xf32> to vector<2x32xf32>
    %187 = math.tanh %186 : vector<2x32xf32>
    %188 = arith.mulf %184, %152 : vector<2x32xf32>
    %189 = arith.mulf %183, %187 : vector<2x32xf32>
    %190 = arith.addf %188, %189 : vector<2x32xf32>
    %191 = math.tanh %190 : vector<2x32xf32>
    %192 = arith.mulf %185, %191 : vector<2x32xf32>
    %193 = tpu.concatenate %192, %172 in 1 : vector<2x32xf32>, vector<2x32xf32> -> vector<2x64xf32>
    %cst_43 = arith.constant dense<0.000000e+00> : vector<2x128xf32>
    %194 = tpu.matmul %193, %2, %cst_43 {dimension_numbers = #tpu.dot_dimension_numbers<[1], [0], [0], [1], [0, 0, 1, 1], [], []>} : vector<2x64xf32>, vector<64x128xf32>, vector<2x128xf32> -> vector<2x128xf32>
    %195 = arith.addf %194, %13 : vector<2x128xf32>
    %196 = arith.negf %195 : vector<2x128xf32>
    %197 = math.exp %196 : vector<2x128xf32>
    %cst_44 = arith.constant 1.000000e+00 : f32
    %198 = vector.broadcast %cst_44 : f32 to vector<2x128xf32>
    %199 = arith.addf %198, %197 : vector<2x128xf32>
    %200 = arith.divf %198, %199 : vector<2x128xf32>
    %201 = vector.extract_strided_slice %200 {offsets = [0, 0], sizes = [2, 32], strides = [1, 1]} : vector<2x128xf32> to vector<2x32xf32>
    %202 = vector.extract_strided_slice %200 {offsets = [0, 32], sizes = [2, 32], strides = [1, 1]} : vector<2x128xf32> to vector<2x32xf32>
    %203 = vector.extract_strided_slice %200 {offsets = [0, 96], sizes = [2, 32], strides = [1, 1]} : vector<2x128xf32> to vector<2x32xf32>
    %204 = vector.extract_strided_slice %195 {offsets = [0, 64], sizes = [2, 32], strides = [1, 1]} : vector<2x128xf32> to vector<2x32xf32>
    %205 = math.tanh %204 : vector<2x32xf32>
    %206 = arith.mulf %202, %170 : vector<2x32xf32>
    %207 = arith.mulf %201, %205 : vector<2x32xf32>
    %208 = arith.addf %206, %207 : vector<2x32xf32>
    %209 = math.tanh %208 : vector<2x32xf32>
    %210 = arith.mulf %203, %209 : vector<2x32xf32>
    %211 = vector.extract_strided_slice %16 {offsets = [0, 5, 0], sizes = [2, 1, 16], strides = [1, 1, 1]} : vector<2x8x16xf32> to vector<2x1x16xf32>
    %212 = vector.shape_cast %211 : vector<2x1x16xf32> to vector<2x16xf32>
    %213 = tpu.concatenate %212, %192 in 1 : vector<2x16xf32>, vector<2x32xf32> -> vector<2x48xf32>
    %cst_45 = arith.constant dense<0.000000e+00> : vector<2x128xf32>
    %214 = tpu.matmul %213, %0, %cst_45 {dimension_numbers = #tpu.dot_dimension_numbers<[1], [0], [0], [1], [0, 0, 1, 1], [], []>} : vector<2x48xf32>, vector<48x128xf32>, vector<2x128xf32> -> vector<2x128xf32>
    %215 = arith.addf %214, %11 : vector<2x128xf32>
    %216 = arith.negf %215 : vector<2x128xf32>
    %217 = math.exp %216 : vector<2x128xf32>
    %cst_46 = arith.constant 1.000000e+00 : f32
    %218 = vector.broadcast %cst_46 : f32 to vector<2x128xf32>
    %219 = arith.addf %218, %217 : vector<2x128xf32>
    %220 = arith.divf %218, %219 : vector<2x128xf32>
    %221 = vector.extract_strided_slice %220 {offsets = [0, 0], sizes = [2, 32], strides = [1, 1]} : vector<2x128xf32> to vector<2x32xf32>
    %222 = vector.extract_strided_slice %220 {offsets = [0, 32], sizes = [2, 32], strides = [1, 1]} : vector<2x128xf32> to vector<2x32xf32>
    %223 = vector.extract_strided_slice %220 {offsets = [0, 96], sizes = [2, 32], strides = [1, 1]} : vector<2x128xf32> to vector<2x32xf32>
    %224 = vector.extract_strided_slice %215 {offsets = [0, 64], sizes = [2, 32], strides = [1, 1]} : vector<2x128xf32> to vector<2x32xf32>
    %225 = math.tanh %224 : vector<2x32xf32>
    %226 = arith.mulf %222, %190 : vector<2x32xf32>
    %227 = arith.mulf %221, %225 : vector<2x32xf32>
    %228 = arith.addf %226, %227 : vector<2x32xf32>
    %229 = math.tanh %228 : vector<2x32xf32>
    %230 = arith.mulf %223, %229 : vector<2x32xf32>
    %231 = tpu.concatenate %230, %210 in 1 : vector<2x32xf32>, vector<2x32xf32> -> vector<2x64xf32>
    %cst_47 = arith.constant dense<0.000000e+00> : vector<2x128xf32>
    %232 = tpu.matmul %231, %2, %cst_47 {dimension_numbers = #tpu.dot_dimension_numbers<[1], [0], [0], [1], [0, 0, 1, 1], [], []>} : vector<2x64xf32>, vector<64x128xf32>, vector<2x128xf32> -> vector<2x128xf32>
    %233 = arith.addf %232, %13 : vector<2x128xf32>
    %234 = arith.negf %233 : vector<2x128xf32>
    %235 = math.exp %234 : vector<2x128xf32>
    %cst_48 = arith.constant 1.000000e+00 : f32
    %236 = vector.broadcast %cst_48 : f32 to vector<2x128xf32>
    %237 = arith.addf %236, %235 : vector<2x128xf32>
    %238 = arith.divf %236, %237 : vector<2x128xf32>
    %239 = vector.extract_strided_slice %238 {offsets = [0, 0], sizes = [2, 32], strides = [1, 1]} : vector<2x128xf32> to vector<2x32xf32>
    %240 = vector.extract_strided_slice %238 {offsets = [0, 32], sizes = [2, 32], strides = [1, 1]} : vector<2x128xf32> to vector<2x32xf32>
    %241 = vector.extract_strided_slice %238 {offsets = [0, 96], sizes = [2, 32], strides = [1, 1]} : vector<2x128xf32> to vector<2x32xf32>
    %242 = vector.extract_strided_slice %233 {offsets = [0, 64], sizes = [2, 32], strides = [1, 1]} : vector<2x128xf32> to vector<2x32xf32>
    %243 = math.tanh %242 : vector<2x32xf32>
    %244 = arith.mulf %240, %208 : vector<2x32xf32>
    %245 = arith.mulf %239, %243 : vector<2x32xf32>
    %246 = arith.addf %244, %245 : vector<2x32xf32>
    %247 = math.tanh %246 : vector<2x32xf32>
    %248 = arith.mulf %241, %247 : vector<2x32xf32>
    %249 = vector.extract_strided_slice %16 {offsets = [0, 6, 0], sizes = [2, 1, 16], strides = [1, 1, 1]} : vector<2x8x16xf32> to vector<2x1x16xf32>
    %250 = vector.shape_cast %249 : vector<2x1x16xf32> to vector<2x16xf32>
    %251 = tpu.concatenate %250, %230 in 1 : vector<2x16xf32>, vector<2x32xf32> -> vector<2x48xf32>
    %cst_49 = arith.constant dense<0.000000e+00> : vector<2x128xf32>
    %252 = tpu.matmul %251, %0, %cst_49 {dimension_numbers = #tpu.dot_dimension_numbers<[1], [0], [0], [1], [0, 0, 1, 1], [], []>} : vector<2x48xf32>, vector<48x128xf32>, vector<2x128xf32> -> vector<2x128xf32>
    %253 = arith.addf %252, %11 : vector<2x128xf32>
    %254 = arith.negf %253 : vector<2x128xf32>
    %255 = math.exp %254 : vector<2x128xf32>
    %cst_50 = arith.constant 1.000000e+00 : f32
    %256 = vector.broadcast %cst_50 : f32 to vector<2x128xf32>
    %257 = arith.addf %256, %255 : vector<2x128xf32>
    %258 = arith.divf %256, %257 : vector<2x128xf32>
    %259 = vector.extract_strided_slice %258 {offsets = [0, 0], sizes = [2, 32], strides = [1, 1]} : vector<2x128xf32> to vector<2x32xf32>
    %260 = vector.extract_strided_slice %258 {offsets = [0, 32], sizes = [2, 32], strides = [1, 1]} : vector<2x128xf32> to vector<2x32xf32>
    %261 = vector.extract_strided_slice %258 {offsets = [0, 96], sizes = [2, 32], strides = [1, 1]} : vector<2x128xf32> to vector<2x32xf32>
    %262 = vector.extract_strided_slice %253 {offsets = [0, 64], sizes = [2, 32], strides = [1, 1]} : vector<2x128xf32> to vector<2x32xf32>
    %263 = math.tanh %262 : vector<2x32xf32>
    %264 = arith.mulf %260, %228 : vector<2x32xf32>
    %265 = arith.mulf %259, %263 : vector<2x32xf32>
    %266 = arith.addf %264, %265 : vector<2x32xf32>
    %267 = math.tanh %266 : vector<2x32xf32>
    %268 = arith.mulf %261, %267 : vector<2x32xf32>
    %269 = tpu.concatenate %268, %248 in 1 : vector<2x32xf32>, vector<2x32xf32> -> vector<2x64xf32>
    %cst_51 = arith.constant dense<0.000000e+00> : vector<2x128xf32>
    %270 = tpu.matmul %269, %2, %cst_51 {dimension_numbers = #tpu.dot_dimension_numbers<[1], [0], [0], [1], [0, 0, 1, 1], [], []>} : vector<2x64xf32>, vector<64x128xf32>, vector<2x128xf32> -> vector<2x128xf32>
    %271 = arith.addf %270, %13 : vector<2x128xf32>
    %272 = arith.negf %271 : vector<2x128xf32>
    %273 = math.exp %272 : vector<2x128xf32>
    %cst_52 = arith.constant 1.000000e+00 : f32
    %274 = vector.broadcast %cst_52 : f32 to vector<2x128xf32>
    %275 = arith.addf %274, %273 : vector<2x128xf32>
    %276 = arith.divf %274, %275 : vector<2x128xf32>
    %277 = vector.extract_strided_slice %276 {offsets = [0, 0], sizes = [2, 32], strides = [1, 1]} : vector<2x128xf32> to vector<2x32xf32>
    %278 = vector.extract_strided_slice %276 {offsets = [0, 32], sizes = [2, 32], strides = [1, 1]} : vector<2x128xf32> to vector<2x32xf32>
    %279 = vector.extract_strided_slice %276 {offsets = [0, 96], sizes = [2, 32], strides = [1, 1]} : vector<2x128xf32> to vector<2x32xf32>
    %280 = vector.extract_strided_slice %271 {offsets = [0, 64], sizes = [2, 32], strides = [1, 1]} : vector<2x128xf32> to vector<2x32xf32>
    %281 = math.tanh %280 : vector<2x32xf32>
    %282 = arith.mulf %278, %246 : vector<2x32xf32>
    %283 = arith.mulf %277, %281 : vector<2x32xf32>
    %284 = arith.addf %282, %283 : vector<2x32xf32>
    %285 = math.tanh %284 : vector<2x32xf32>
    %286 = arith.mulf %279, %285 : vector<2x32xf32>
    %287 = vector.extract_strided_slice %16 {offsets = [0, 7, 0], sizes = [2, 1, 16], strides = [1, 1, 1]} : vector<2x8x16xf32> to vector<2x1x16xf32>
    %288 = vector.shape_cast %287 : vector<2x1x16xf32> to vector<2x16xf32>
    %289 = tpu.concatenate %288, %268 in 1 : vector<2x16xf32>, vector<2x32xf32> -> vector<2x48xf32>
    %cst_53 = arith.constant dense<0.000000e+00> : vector<2x128xf32>
    %290 = tpu.matmul %289, %0, %cst_53 {dimension_numbers = #tpu.dot_dimension_numbers<[1], [0], [0], [1], [0, 0, 1, 1], [], []>} : vector<2x48xf32>, vector<48x128xf32>, vector<2x128xf32> -> vector<2x128xf32>
    %291 = arith.addf %290, %11 : vector<2x128xf32>
    %292 = arith.negf %291 : vector<2x128xf32>
    %293 = math.exp %292 : vector<2x128xf32>
    %cst_54 = arith.constant 1.000000e+00 : f32
    %294 = vector.broadcast %cst_54 : f32 to vector<2x128xf32>
    %295 = arith.addf %294, %293 : vector<2x128xf32>
    %296 = arith.divf %294, %295 : vector<2x128xf32>
    %297 = vector.extract_strided_slice %296 {offsets = [0, 0], sizes = [2, 32], strides = [1, 1]} : vector<2x128xf32> to vector<2x32xf32>
    %298 = vector.extract_strided_slice %296 {offsets = [0, 32], sizes = [2, 32], strides = [1, 1]} : vector<2x128xf32> to vector<2x32xf32>
    %299 = vector.extract_strided_slice %296 {offsets = [0, 96], sizes = [2, 32], strides = [1, 1]} : vector<2x128xf32> to vector<2x32xf32>
    %300 = vector.extract_strided_slice %291 {offsets = [0, 64], sizes = [2, 32], strides = [1, 1]} : vector<2x128xf32> to vector<2x32xf32>
    %301 = math.tanh %300 : vector<2x32xf32>
    %302 = arith.mulf %298, %266 : vector<2x32xf32>
    %303 = arith.mulf %297, %301 : vector<2x32xf32>
    %304 = arith.addf %302, %303 : vector<2x32xf32>
    %305 = math.tanh %304 : vector<2x32xf32>
    %306 = arith.mulf %299, %305 : vector<2x32xf32>
    %307 = tpu.concatenate %306, %286 in 1 : vector<2x32xf32>, vector<2x32xf32> -> vector<2x64xf32>
    %cst_55 = arith.constant dense<0.000000e+00> : vector<2x128xf32>
    %308 = tpu.matmul %307, %2, %cst_55 {dimension_numbers = #tpu.dot_dimension_numbers<[1], [0], [0], [1], [0, 0, 1, 1], [], []>} : vector<2x64xf32>, vector<64x128xf32>, vector<2x128xf32> -> vector<2x128xf32>
    %309 = arith.addf %308, %13 : vector<2x128xf32>
    %310 = arith.negf %309 : vector<2x128xf32>
    %311 = math.exp %310 : vector<2x128xf32>
    %cst_56 = arith.constant 1.000000e+00 : f32
    %312 = vector.broadcast %cst_56 : f32 to vector<2x128xf32>
    %313 = arith.addf %312, %311 : vector<2x128xf32>
    %314 = arith.divf %312, %313 : vector<2x128xf32>
    %315 = vector.extract_strided_slice %314 {offsets = [0, 0], sizes = [2, 32], strides = [1, 1]} : vector<2x128xf32> to vector<2x32xf32>
    %316 = vector.extract_strided_slice %314 {offsets = [0, 32], sizes = [2, 32], strides = [1, 1]} : vector<2x128xf32> to vector<2x32xf32>
    %317 = vector.extract_strided_slice %314 {offsets = [0, 96], sizes = [2, 32], strides = [1, 1]} : vector<2x128xf32> to vector<2x32xf32>
    %318 = vector.extract_strided_slice %309 {offsets = [0, 64], sizes = [2, 32], strides = [1, 1]} : vector<2x128xf32> to vector<2x32xf32>
    %319 = math.tanh %318 : vector<2x32xf32>
    %320 = arith.mulf %316, %284 : vector<2x32xf32>
    %321 = arith.mulf %315, %319 : vector<2x32xf32>
    %322 = arith.addf %320, %321 : vector<2x32xf32>
    %323 = math.tanh %322 : vector<2x32xf32>
    %324 = arith.mulf %317, %323 : vector<2x32xf32>
    %325 = vector.extract_strided_slice %58 {offsets = [0, 0], sizes = [1, 32], strides = [1, 1]} : vector<2x32xf32> to vector<1x32xf32>
    %326 = vector.extract_strided_slice %96 {offsets = [0, 0], sizes = [1, 32], strides = [1, 1]} : vector<2x32xf32> to vector<1x32xf32>
    %327 = vector.extract_strided_slice %134 {offsets = [0, 0], sizes = [1, 32], strides = [1, 1]} : vector<2x32xf32> to vector<1x32xf32>
    %328 = vector.extract_strided_slice %172 {offsets = [0, 0], sizes = [1, 32], strides = [1, 1]} : vector<2x32xf32> to vector<1x32xf32>
    %329 = vector.extract_strided_slice %210 {offsets = [0, 0], sizes = [1, 32], strides = [1, 1]} : vector<2x32xf32> to vector<1x32xf32>
    %330 = vector.extract_strided_slice %248 {offsets = [0, 0], sizes = [1, 32], strides = [1, 1]} : vector<2x32xf32> to vector<1x32xf32>
    %331 = vector.extract_strided_slice %286 {offsets = [0, 0], sizes = [1, 32], strides = [1, 1]} : vector<2x32xf32> to vector<1x32xf32>
    %332 = vector.extract_strided_slice %324 {offsets = [0, 0], sizes = [1, 32], strides = [1, 1]} : vector<2x32xf32> to vector<1x32xf32>
    %333 = vector.extract_strided_slice %58 {offsets = [1, 0], sizes = [1, 32], strides = [1, 1]} : vector<2x32xf32> to vector<1x32xf32>
    %334 = vector.extract_strided_slice %96 {offsets = [1, 0], sizes = [1, 32], strides = [1, 1]} : vector<2x32xf32> to vector<1x32xf32>
    %335 = vector.extract_strided_slice %134 {offsets = [1, 0], sizes = [1, 32], strides = [1, 1]} : vector<2x32xf32> to vector<1x32xf32>
    %336 = vector.extract_strided_slice %172 {offsets = [1, 0], sizes = [1, 32], strides = [1, 1]} : vector<2x32xf32> to vector<1x32xf32>
    %337 = vector.extract_strided_slice %210 {offsets = [1, 0], sizes = [1, 32], strides = [1, 1]} : vector<2x32xf32> to vector<1x32xf32>
    %338 = vector.extract_strided_slice %248 {offsets = [1, 0], sizes = [1, 32], strides = [1, 1]} : vector<2x32xf32> to vector<1x32xf32>
    %339 = vector.extract_strided_slice %286 {offsets = [1, 0], sizes = [1, 32], strides = [1, 1]} : vector<2x32xf32> to vector<1x32xf32>
    %340 = vector.extract_strided_slice %324 {offsets = [1, 0], sizes = [1, 32], strides = [1, 1]} : vector<2x32xf32> to vector<1x32xf32>
    %341 = tpu.concatenate %325, %326, %327, %328, %329, %330, %331, %332, %333, %334, %335, %336, %337, %338, %339, %340 in 0 : vector<1x32xf32>, vector<1x32xf32>, vector<1x32xf32>, vector<1x32xf32>, vector<1x32xf32>, vector<1x32xf32>, vector<1x32xf32>, vector<1x32xf32>, vector<1x32xf32>, vector<1x32xf32>, vector<1x32xf32>, vector<1x32xf32>, vector<1x32xf32>, vector<1x32xf32>, vector<1x32xf32>, vector<1x32xf32> -> vector<16x32xf32>
    %cst_57 = arith.constant 0.000000e+00 : f32
    %342 = vector.broadcast %cst_57 : f32 to vector<16x32xf32>
    %343 = arith.maximumf %341, %342 : vector<16x32xf32>
    %cst_58 = arith.constant dense<0.000000e+00> : vector<16x16xf32>
    %344 = tpu.matmul %343, %4, %cst_58 {dimension_numbers = #tpu.dot_dimension_numbers<[1], [0], [0], [1], [0, 0, 1, 1], [], []>} : vector<16x32xf32>, vector<32x16xf32>, vector<16x16xf32> -> vector<16x16xf32>
    %345 = vector.broadcast %5 : vector<1x16xf32> to vector<16x16xf32>
    %346 = arith.addf %344, %345 : vector<16x16xf32>
    %cst_59 = arith.constant dense<0.000000e+00> : vector<16x16xf32>
    %347 = tpu.matmul %343, %6, %cst_59 {dimension_numbers = #tpu.dot_dimension_numbers<[1], [0], [0], [1], [0, 0, 1, 1], [], []>} : vector<16x32xf32>, vector<32x16xf32>, vector<16x16xf32> -> vector<16x16xf32>
    %348 = vector.broadcast %7 : vector<1x16xf32> to vector<16x16xf32>
    %349 = arith.addf %347, %348 : vector<16x16xf32>
    %cst_60 = arith.constant 0.000000e+00 : f32
    %350 = vector.broadcast %cst_60 : f32 to vector<16x16xf32>
    %351 = arith.maximumf %349, %350 : vector<16x16xf32>
    %cst_61 = arith.constant dense<0.000000e+00> : vector<16x9xf32>
    %352 = tpu.matmul %351, %8, %cst_61 {dimension_numbers = #tpu.dot_dimension_numbers<[1], [0], [0], [1], [0, 0, 1, 1], [], []>} : vector<16x16xf32>, vector<16x9xf32>, vector<16x9xf32> -> vector<16x9xf32>
    %353 = vector.broadcast %9 : vector<1x9xf32> to vector<16x9xf32>
    %354 = arith.addf %352, %353 : vector<16x9xf32>
    %355 = vector.shape_cast %346 : vector<16x16xf32> to vector<2x8x16xf32>
    %c0_62 = arith.constant 0 : index
    %c0_63 = arith.constant 0 : index
    %c0_64 = arith.constant 0 : index
    %356 = vector.load %arg11[%c0_62, %c0_63, %c0_64] : memref<2x8x16xf32, #tpu.memory_space<vmem>>, vector<2x8x16xf32>
    tpu.vector_store %arg11[%c0_62, %c0_63, %c0_64], %355 {strides = array<i32>} : memref<2x8x16xf32, #tpu.memory_space<vmem>>, vector<2x8x16xf32>,
    %357 = vector.shape_cast %354 : vector<16x9xf32> to vector<2x8x9xf32>
    %c0_65 = arith.constant 0 : index
    %c0_66 = arith.constant 0 : index
    %c0_67 = arith.constant 0 : index
    %358 = vector.load %arg13[%c0_65, %c0_66, %c0_67] : memref<2x12x9xf32, #tpu.memory_space<vmem>>, vector<2x8x9xf32>
    tpu.vector_store %arg13[%c0_65, %c0_66, %c0_67], %357 {strides = array<i32>} : memref<2x12x9xf32, #tpu.memory_space<vmem>>, vector<2x8x9xf32>,
    %359 = vector.extract_strided_slice %355 {offsets = [0, 7, 0], sizes = [2, 1, 16], strides = [1, 1, 1]} : vector<2x8x16xf32> to vector<2x1x16xf32>
    %360 = vector.shape_cast %359 : vector<2x1x16xf32> to vector<2x16xf32>
    %361 = tpu.concatenate %360, %306 in 1 : vector<2x16xf32>, vector<2x32xf32> -> vector<2x48xf32>
    %cst_68 = arith.constant dense<0.000000e+00> : vector<2x128xf32>
    %362 = tpu.matmul %361, %0, %cst_68 {dimension_numbers = #tpu.dot_dimension_numbers<[1], [0], [0], [1], [0, 0, 1, 1], [], []>} : vector<2x48xf32>, vector<48x128xf32>, vector<2x128xf32> -> vector<2x128xf32>
    %363 = arith.addf %362, %11 : vector<2x128xf32>
    %364 = arith.negf %363 : vector<2x128xf32>
    %365 = math.exp %364 : vector<2x128xf32>
    %cst_69 = arith.constant 1.000000e+00 : f32
    %366 = vector.broadcast %cst_69 : f32 to vector<2x128xf32>
    %367 = arith.addf %366, %365 : vector<2x128xf32>
    %368 = arith.divf %366, %367 : vector<2x128xf32>
    %369 = vector.extract_strided_slice %368 {offsets = [0, 0], sizes = [2, 32], strides = [1, 1]} : vector<2x128xf32> to vector<2x32xf32>
    %370 = vector.extract_strided_slice %368 {offsets = [0, 32], sizes = [2, 32], strides = [1, 1]} : vector<2x128xf32> to vector<2x32xf32>
    %371 = vector.extract_strided_slice %368 {offsets = [0, 96], sizes = [2, 32], strides = [1, 1]} : vector<2x128xf32> to vector<2x32xf32>
    %372 = vector.extract_strided_slice %363 {offsets = [0, 64], sizes = [2, 32], strides = [1, 1]} : vector<2x128xf32> to vector<2x32xf32>
    %373 = math.tanh %372 : vector<2x32xf32>
    %374 = arith.mulf %370, %304 : vector<2x32xf32>
    %375 = arith.mulf %369, %373 : vector<2x32xf32>
    %376 = arith.addf %374, %375 : vector<2x32xf32>
    %377 = math.tanh %376 : vector<2x32xf32>
    %378 = arith.mulf %371, %377 : vector<2x32xf32>
    %379 = tpu.concatenate %378, %324 in 1 : vector<2x32xf32>, vector<2x32xf32> -> vector<2x64xf32>
    %cst_70 = arith.constant dense<0.000000e+00> : vector<2x128xf32>
    %380 = tpu.matmul %379, %2, %cst_70 {dimension_numbers = #tpu.dot_dimension_numbers<[1], [0], [0], [1], [0, 0, 1, 1], [], []>} : vector<2x64xf32>, vector<64x128xf32>, vector<2x128xf32> -> vector<2x128xf32>
    %381 = arith.addf %380, %13 : vector<2x128xf32>
    %382 = arith.negf %381 : vector<2x128xf32>
    %383 = math.exp %382 : vector<2x128xf32>
    %cst_71 = arith.constant 1.000000e+00 : f32
    %384 = vector.broadcast %cst_71 : f32 to vector<2x128xf32>
    %385 = arith.addf %384, %383 : vector<2x128xf32>
    %386 = arith.divf %384, %385 : vector<2x128xf32>
    %387 = vector.extract_strided_slice %386 {offsets = [0, 0], sizes = [2, 32], strides = [1, 1]} : vector<2x128xf32> to vector<2x32xf32>
    %388 = vector.extract_strided_slice %386 {offsets = [0, 32], sizes = [2, 32], strides = [1, 1]} : vector<2x128xf32> to vector<2x32xf32>
    %389 = vector.extract_strided_slice %386 {offsets = [0, 96], sizes = [2, 32], strides = [1, 1]} : vector<2x128xf32> to vector<2x32xf32>
    %390 = vector.extract_strided_slice %381 {offsets = [0, 64], sizes = [2, 32], strides = [1, 1]} : vector<2x128xf32> to vector<2x32xf32>
    %391 = math.tanh %390 : vector<2x32xf32>
    %392 = arith.mulf %388, %322 : vector<2x32xf32>
    %393 = arith.mulf %387, %391 : vector<2x32xf32>
    %394 = arith.addf %392, %393 : vector<2x32xf32>
    %395 = math.tanh %394 : vector<2x32xf32>
    %396 = arith.mulf %389, %395 : vector<2x32xf32>
    %cst_72 = arith.constant 0.000000e+00 : f32
    %397 = vector.broadcast %cst_72 : f32 to vector<2x32xf32>
    %398 = arith.maximumf %396, %397 : vector<2x32xf32>
    %cst_73 = arith.constant dense<0.000000e+00> : vector<2x16xf32>
    %399 = tpu.matmul %398, %4, %cst_73 {dimension_numbers = #tpu.dot_dimension_numbers<[1], [0], [0], [1], [0, 0, 1, 1], [], []>} : vector<2x32xf32>, vector<32x16xf32>, vector<2x16xf32> -> vector<2x16xf32>
    %400 = arith.addf %399, %15 : vector<2x16xf32>
    %401 = tpu.concatenate %400, %378 in 1 : vector<2x16xf32>, vector<2x32xf32> -> vector<2x48xf32>
    %cst_74 = arith.constant dense<0.000000e+00> : vector<2x128xf32>
    %402 = tpu.matmul %401, %0, %cst_74 {dimension_numbers = #tpu.dot_dimension_numbers<[1], [0], [0], [1], [0, 0, 1, 1], [], []>} : vector<2x48xf32>, vector<48x128xf32>, vector<2x128xf32> -> vector<2x128xf32>
    %403 = arith.addf %402, %11 : vector<2x128xf32>
    %404 = arith.negf %403 : vector<2x128xf32>
    %405 = math.exp %404 : vector<2x128xf32>
    %cst_75 = arith.constant 1.000000e+00 : f32
    %406 = vector.broadcast %cst_75 : f32 to vector<2x128xf32>
    %407 = arith.addf %406, %405 : vector<2x128xf32>
    %408 = arith.divf %406, %407 : vector<2x128xf32>
    %409 = vector.extract_strided_slice %408 {offsets = [0, 0], sizes = [2, 32], strides = [1, 1]} : vector<2x128xf32> to vector<2x32xf32>
    %410 = vector.extract_strided_slice %408 {offsets = [0, 32], sizes = [2, 32], strides = [1, 1]} : vector<2x128xf32> to vector<2x32xf32>
    %411 = vector.extract_strided_slice %408 {offsets = [0, 96], sizes = [2, 32], strides = [1, 1]} : vector<2x128xf32> to vector<2x32xf32>
    %412 = vector.extract_strided_slice %403 {offsets = [0, 64], sizes = [2, 32], strides = [1, 1]} : vector<2x128xf32> to vector<2x32xf32>
    %413 = math.tanh %412 : vector<2x32xf32>
    %414 = arith.mulf %410, %376 : vector<2x32xf32>
    %415 = arith.mulf %409, %413 : vector<2x32xf32>
    %416 = arith.addf %414, %415 : vector<2x32xf32>
    %417 = math.tanh %416 : vector<2x32xf32>
    %418 = arith.mulf %411, %417 : vector<2x32xf32>
    %419 = tpu.concatenate %418, %396 in 1 : vector<2x32xf32>, vector<2x32xf32> -> vector<2x64xf32>
    %cst_76 = arith.constant dense<0.000000e+00> : vector<2x128xf32>
    %420 = tpu.matmul %419, %2, %cst_76 {dimension_numbers = #tpu.dot_dimension_numbers<[1], [0], [0], [1], [0, 0, 1, 1], [], []>} : vector<2x64xf32>, vector<64x128xf32>, vector<2x128xf32> -> vector<2x128xf32>
    %421 = arith.addf %420, %13 : vector<2x128xf32>
    %422 = arith.negf %421 : vector<2x128xf32>
    %423 = math.exp %422 : vector<2x128xf32>
    %cst_77 = arith.constant 1.000000e+00 : f32
    %424 = vector.broadcast %cst_77 : f32 to vector<2x128xf32>
    %425 = arith.addf %424, %423 : vector<2x128xf32>
    %426 = arith.divf %424, %425 : vector<2x128xf32>
    %427 = vector.extract_strided_slice %426 {offsets = [0, 0], sizes = [2, 32], strides = [1, 1]} : vector<2x128xf32> to vector<2x32xf32>
    %428 = vector.extract_strided_slice %426 {offsets = [0, 32], sizes = [2, 32], strides = [1, 1]} : vector<2x128xf32> to vector<2x32xf32>
    %429 = vector.extract_strided_slice %426 {offsets = [0, 96], sizes = [2, 32], strides = [1, 1]} : vector<2x128xf32> to vector<2x32xf32>
    %430 = vector.extract_strided_slice %421 {offsets = [0, 64], sizes = [2, 32], strides = [1, 1]} : vector<2x128xf32> to vector<2x32xf32>
    %431 = math.tanh %430 : vector<2x32xf32>
    %432 = arith.mulf %428, %394 : vector<2x32xf32>
    %433 = arith.mulf %427, %431 : vector<2x32xf32>
    %434 = arith.addf %432, %433 : vector<2x32xf32>
    %435 = math.tanh %434 : vector<2x32xf32>
    %436 = arith.mulf %429, %435 : vector<2x32xf32>
    %cst_78 = arith.constant 0.000000e+00 : f32
    %437 = vector.broadcast %cst_78 : f32 to vector<2x32xf32>
    %438 = arith.maximumf %436, %437 : vector<2x32xf32>
    %cst_79 = arith.constant dense<0.000000e+00> : vector<2x16xf32>
    %439 = tpu.matmul %438, %4, %cst_79 {dimension_numbers = #tpu.dot_dimension_numbers<[1], [0], [0], [1], [0, 0, 1, 1], [], []>} : vector<2x32xf32>, vector<32x16xf32>, vector<2x16xf32> -> vector<2x16xf32>
    %440 = arith.addf %439, %15 : vector<2x16xf32>
    %441 = tpu.concatenate %440, %418 in 1 : vector<2x16xf32>, vector<2x32xf32> -> vector<2x48xf32>
    %cst_80 = arith.constant dense<0.000000e+00> : vector<2x128xf32>
    %442 = tpu.matmul %441, %0, %cst_80 {dimension_numbers = #tpu.dot_dimension_numbers<[1], [0], [0], [1], [0, 0, 1, 1], [], []>} : vector<2x48xf32>, vector<48x128xf32>, vector<2x128xf32> -> vector<2x128xf32>
    %443 = arith.addf %442, %11 : vector<2x128xf32>
    %444 = arith.negf %443 : vector<2x128xf32>
    %445 = math.exp %444 : vector<2x128xf32>
    %cst_81 = arith.constant 1.000000e+00 : f32
    %446 = vector.broadcast %cst_81 : f32 to vector<2x128xf32>
    %447 = arith.addf %446, %445 : vector<2x128xf32>
    %448 = arith.divf %446, %447 : vector<2x128xf32>
    %449 = vector.extract_strided_slice %448 {offsets = [0, 0], sizes = [2, 32], strides = [1, 1]} : vector<2x128xf32> to vector<2x32xf32>
    %450 = vector.extract_strided_slice %448 {offsets = [0, 32], sizes = [2, 32], strides = [1, 1]} : vector<2x128xf32> to vector<2x32xf32>
    %451 = vector.extract_strided_slice %448 {offsets = [0, 96], sizes = [2, 32], strides = [1, 1]} : vector<2x128xf32> to vector<2x32xf32>
    %452 = vector.extract_strided_slice %443 {offsets = [0, 64], sizes = [2, 32], strides = [1, 1]} : vector<2x128xf32> to vector<2x32xf32>
    %453 = math.tanh %452 : vector<2x32xf32>
    %454 = arith.mulf %450, %416 : vector<2x32xf32>
    %455 = arith.mulf %449, %453 : vector<2x32xf32>
    %456 = arith.addf %454, %455 : vector<2x32xf32>
    %457 = math.tanh %456 : vector<2x32xf32>
    %458 = arith.mulf %451, %457 : vector<2x32xf32>
    %459 = tpu.concatenate %458, %436 in 1 : vector<2x32xf32>, vector<2x32xf32> -> vector<2x64xf32>
    %cst_82 = arith.constant dense<0.000000e+00> : vector<2x128xf32>
    %460 = tpu.matmul %459, %2, %cst_82 {dimension_numbers = #tpu.dot_dimension_numbers<[1], [0], [0], [1], [0, 0, 1, 1], [], []>} : vector<2x64xf32>, vector<64x128xf32>, vector<2x128xf32> -> vector<2x128xf32>
    %461 = arith.addf %460, %13 : vector<2x128xf32>
    %462 = arith.negf %461 : vector<2x128xf32>
    %463 = math.exp %462 : vector<2x128xf32>
    %cst_83 = arith.constant 1.000000e+00 : f32
    %464 = vector.broadcast %cst_83 : f32 to vector<2x128xf32>
    %465 = arith.addf %464, %463 : vector<2x128xf32>
    %466 = arith.divf %464, %465 : vector<2x128xf32>
    %467 = vector.extract_strided_slice %466 {offsets = [0, 0], sizes = [2, 32], strides = [1, 1]} : vector<2x128xf32> to vector<2x32xf32>
    %468 = vector.extract_strided_slice %466 {offsets = [0, 32], sizes = [2, 32], strides = [1, 1]} : vector<2x128xf32> to vector<2x32xf32>
    %469 = vector.extract_strided_slice %466 {offsets = [0, 96], sizes = [2, 32], strides = [1, 1]} : vector<2x128xf32> to vector<2x32xf32>
    %470 = vector.extract_strided_slice %461 {offsets = [0, 64], sizes = [2, 32], strides = [1, 1]} : vector<2x128xf32> to vector<2x32xf32>
    %471 = math.tanh %470 : vector<2x32xf32>
    %472 = arith.mulf %468, %434 : vector<2x32xf32>
    %473 = arith.mulf %467, %471 : vector<2x32xf32>
    %474 = arith.addf %472, %473 : vector<2x32xf32>
    %475 = math.tanh %474 : vector<2x32xf32>
    %476 = arith.mulf %469, %475 : vector<2x32xf32>
    %cst_84 = arith.constant 0.000000e+00 : f32
    %477 = vector.broadcast %cst_84 : f32 to vector<2x32xf32>
    %478 = arith.maximumf %476, %477 : vector<2x32xf32>
    %cst_85 = arith.constant dense<0.000000e+00> : vector<2x16xf32>
    %479 = tpu.matmul %478, %4, %cst_85 {dimension_numbers = #tpu.dot_dimension_numbers<[1], [0], [0], [1], [0, 0, 1, 1], [], []>} : vector<2x32xf32>, vector<32x16xf32>, vector<2x16xf32> -> vector<2x16xf32>
    %480 = arith.addf %479, %15 : vector<2x16xf32>
    %481 = tpu.concatenate %480, %458 in 1 : vector<2x16xf32>, vector<2x32xf32> -> vector<2x48xf32>
    %cst_86 = arith.constant dense<0.000000e+00> : vector<2x128xf32>
    %482 = tpu.matmul %481, %0, %cst_86 {dimension_numbers = #tpu.dot_dimension_numbers<[1], [0], [0], [1], [0, 0, 1, 1], [], []>} : vector<2x48xf32>, vector<48x128xf32>, vector<2x128xf32> -> vector<2x128xf32>
    %483 = arith.addf %482, %11 : vector<2x128xf32>
    %484 = arith.negf %483 : vector<2x128xf32>
    %485 = math.exp %484 : vector<2x128xf32>
    %cst_87 = arith.constant 1.000000e+00 : f32
    %486 = vector.broadcast %cst_87 : f32 to vector<2x128xf32>
    %487 = arith.addf %486, %485 : vector<2x128xf32>
    %488 = arith.divf %486, %487 : vector<2x128xf32>
    %489 = vector.extract_strided_slice %488 {offsets = [0, 0], sizes = [2, 32], strides = [1, 1]} : vector<2x128xf32> to vector<2x32xf32>
    %490 = vector.extract_strided_slice %488 {offsets = [0, 32], sizes = [2, 32], strides = [1, 1]} : vector<2x128xf32> to vector<2x32xf32>
    %491 = vector.extract_strided_slice %488 {offsets = [0, 96], sizes = [2, 32], strides = [1, 1]} : vector<2x128xf32> to vector<2x32xf32>
    %492 = vector.extract_strided_slice %483 {offsets = [0, 64], sizes = [2, 32], strides = [1, 1]} : vector<2x128xf32> to vector<2x32xf32>
    %493 = math.tanh %492 : vector<2x32xf32>
    %494 = arith.mulf %490, %456 : vector<2x32xf32>
    %495 = arith.mulf %489, %493 : vector<2x32xf32>
    %496 = arith.addf %494, %495 : vector<2x32xf32>
    %497 = math.tanh %496 : vector<2x32xf32>
    %498 = arith.mulf %491, %497 : vector<2x32xf32>
    %499 = tpu.concatenate %498, %476 in 1 : vector<2x32xf32>, vector<2x32xf32> -> vector<2x64xf32>
    %cst_88 = arith.constant dense<0.000000e+00> : vector<2x128xf32>
    %500 = tpu.matmul %499, %2, %cst_88 {dimension_numbers = #tpu.dot_dimension_numbers<[1], [0], [0], [1], [0, 0, 1, 1], [], []>} : vector<2x64xf32>, vector<64x128xf32>, vector<2x128xf32> -> vector<2x128xf32>
    %501 = arith.addf %500, %13 : vector<2x128xf32>
    %502 = arith.negf %501 : vector<2x128xf32>
    %503 = math.exp %502 : vector<2x128xf32>
    %cst_89 = arith.constant 1.000000e+00 : f32
    %504 = vector.broadcast %cst_89 : f32 to vector<2x128xf32>
    %505 = arith.addf %504, %503 : vector<2x128xf32>
    %506 = arith.divf %504, %505 : vector<2x128xf32>
    %507 = vector.extract_strided_slice %506 {offsets = [0, 0], sizes = [2, 32], strides = [1, 1]} : vector<2x128xf32> to vector<2x32xf32>
    %508 = vector.extract_strided_slice %506 {offsets = [0, 32], sizes = [2, 32], strides = [1, 1]} : vector<2x128xf32> to vector<2x32xf32>
    %509 = vector.extract_strided_slice %506 {offsets = [0, 96], sizes = [2, 32], strides = [1, 1]} : vector<2x128xf32> to vector<2x32xf32>
    %510 = vector.extract_strided_slice %501 {offsets = [0, 64], sizes = [2, 32], strides = [1, 1]} : vector<2x128xf32> to vector<2x32xf32>
    %511 = math.tanh %510 : vector<2x32xf32>
    %512 = arith.mulf %508, %474 : vector<2x32xf32>
    %513 = arith.mulf %507, %511 : vector<2x32xf32>
    %514 = arith.addf %512, %513 : vector<2x32xf32>
    %515 = math.tanh %514 : vector<2x32xf32>
    %516 = arith.mulf %509, %515 : vector<2x32xf32>
    %cst_90 = arith.constant 0.000000e+00 : f32
    %517 = vector.broadcast %cst_90 : f32 to vector<2x32xf32>
    %518 = arith.maximumf %516, %517 : vector<2x32xf32>
    %cst_91 = arith.constant dense<0.000000e+00> : vector<2x16xf32>
    %519 = tpu.matmul %518, %4, %cst_91 {dimension_numbers = #tpu.dot_dimension_numbers<[1], [0], [0], [1], [0, 0, 1, 1], [], []>} : vector<2x32xf32>, vector<32x16xf32>, vector<2x16xf32> -> vector<2x16xf32>
    %520 = arith.addf %519, %15 : vector<2x16xf32>
    %521 = vector.extract_strided_slice %396 {offsets = [0, 0], sizes = [1, 32], strides = [1, 1]} : vector<2x32xf32> to vector<1x32xf32>
    %522 = vector.extract_strided_slice %436 {offsets = [0, 0], sizes = [1, 32], strides = [1, 1]} : vector<2x32xf32> to vector<1x32xf32>
    %523 = vector.extract_strided_slice %476 {offsets = [0, 0], sizes = [1, 32], strides = [1, 1]} : vector<2x32xf32> to vector<1x32xf32>
    %524 = vector.extract_strided_slice %516 {offsets = [0, 0], sizes = [1, 32], strides = [1, 1]} : vector<2x32xf32> to vector<1x32xf32>
    %525 = vector.extract_strided_slice %396 {offsets = [1, 0], sizes = [1, 32], strides = [1, 1]} : vector<2x32xf32> to vector<1x32xf32>
    %526 = vector.extract_strided_slice %436 {offsets = [1, 0], sizes = [1, 32], strides = [1, 1]} : vector<2x32xf32> to vector<1x32xf32>
    %527 = vector.extract_strided_slice %476 {offsets = [1, 0], sizes = [1, 32], strides = [1, 1]} : vector<2x32xf32> to vector<1x32xf32>
    %528 = vector.extract_strided_slice %516 {offsets = [1, 0], sizes = [1, 32], strides = [1, 1]} : vector<2x32xf32> to vector<1x32xf32>
    %529 = tpu.concatenate %521, %522, %523, %524, %525, %526, %527, %528 in 0 : vector<1x32xf32>, vector<1x32xf32>, vector<1x32xf32>, vector<1x32xf32>, vector<1x32xf32>, vector<1x32xf32>, vector<1x32xf32>, vector<1x32xf32> -> vector<8x32xf32>
    %cst_92 = arith.constant 0.000000e+00 : f32
    %530 = vector.broadcast %cst_92 : f32 to vector<8x32xf32>
    %531 = arith.maximumf %529, %530 : vector<8x32xf32>
    %cst_93 = arith.constant dense<0.000000e+00> : vector<8x16xf32>
    %532 = tpu.matmul %531, %6, %cst_93 {dimension_numbers = #tpu.dot_dimension_numbers<[1], [0], [0], [1], [0, 0, 1, 1], [], []>} : vector<8x32xf32>, vector<32x16xf32>, vector<8x16xf32> -> vector<8x16xf32>
    %533 = vector.broadcast %7 : vector<1x16xf32> to vector<8x16xf32>
    %534 = arith.addf %532, %533 : vector<8x16xf32>
    %cst_94 = arith.constant 0.000000e+00 : f32
    %535 = vector.broadcast %cst_94 : f32 to vector<8x16xf32>
    %536 = arith.maximumf %534, %535 : vector<8x16xf32>
    %cst_95 = arith.constant dense<0.000000e+00> : vector<8x9xf32>
    %537 = tpu.matmul %536, %8, %cst_95 {dimension_numbers = #tpu.dot_dimension_numbers<[1], [0], [0], [1], [0, 0, 1, 1], [], []>} : vector<8x16xf32>, vector<16x9xf32>, vector<8x9xf32> -> vector<8x9xf32>
    %538 = vector.broadcast %9 : vector<1x9xf32> to vector<8x9xf32>
    %539 = arith.addf %537, %538 : vector<8x9xf32>
    %540 = vector.extract_strided_slice %400 {offsets = [0, 0], sizes = [1, 16], strides = [1, 1]} : vector<2x16xf32> to vector<1x16xf32>
    %541 = vector.extract_strided_slice %440 {offsets = [0, 0], sizes = [1, 16], strides = [1, 1]} : vector<2x16xf32> to vector<1x16xf32>
    %542 = vector.extract_strided_slice %480 {offsets = [0, 0], sizes = [1, 16], strides = [1, 1]} : vector<2x16xf32> to vector<1x16xf32>
    %543 = vector.extract_strided_slice %520 {offsets = [0, 0], sizes = [1, 16], strides = [1, 1]} : vector<2x16xf32> to vector<1x16xf32>
    %544 = vector.extract_strided_slice %400 {offsets = [1, 0], sizes = [1, 16], strides = [1, 1]} : vector<2x16xf32> to vector<1x16xf32>
    %545 = vector.extract_strided_slice %440 {offsets = [1, 0], sizes = [1, 16], strides = [1, 1]} : vector<2x16xf32> to vector<1x16xf32>
    %546 = vector.extract_strided_slice %480 {offsets = [1, 0], sizes = [1, 16], strides = [1, 1]} : vector<2x16xf32> to vector<1x16xf32>
    %547 = vector.extract_strided_slice %520 {offsets = [1, 0], sizes = [1, 16], strides = [1, 1]} : vector<2x16xf32> to vector<1x16xf32>
    %548 = tpu.concatenate %540, %541, %542, %543, %544, %545, %546, %547 in 0 : vector<1x16xf32>, vector<1x16xf32>, vector<1x16xf32>, vector<1x16xf32>, vector<1x16xf32>, vector<1x16xf32>, vector<1x16xf32>, vector<1x16xf32> -> vector<8x16xf32>
    %549 = vector.shape_cast %548 : vector<8x16xf32> to vector<2x4x16xf32>
    %c0_96 = arith.constant 0 : index
    %c0_97 = arith.constant 0 : index
    %c0_98 = arith.constant 0 : index
    %550 = vector.load %arg12[%c0_96, %c0_97, %c0_98] : memref<2x4x16xf32, #tpu.memory_space<vmem>>, vector<2x4x16xf32>
    tpu.vector_store %arg12[%c0_96, %c0_97, %c0_98], %549 {strides = array<i32>} : memref<2x4x16xf32, #tpu.memory_space<vmem>>, vector<2x4x16xf32>,
    %551 = vector.shape_cast %539 : vector<8x9xf32> to vector<2x4x9xf32>
    %c0_99 = arith.constant 0 : index
    %c8 = arith.constant 8 : index
    %c0_100 = arith.constant 0 : index
    %552 = vector.load %arg13[%c0_99, %c8, %c0_100] : memref<2x12x9xf32, #tpu.memory_space<vmem>>, vector<2x4x9xf32>
    tpu.vector_store %arg13[%c0_99, %c8, %c0_100], %551 {strides = array<i32>} : memref<2x12x9xf32, #tpu.memory_space<vmem>>, vector<2x4x9xf32>,
    return
  }
}

</mosaic_0001>

<bundles_post_ra>
// kernel: quantile_combined_forward.1
= control target key start
LH: loop header
LB: loop body
LE: loop exit
PB: predicated region body
PF: predicated region fallthrough
CT: control target
= control target key end

     0   :  { %19 = vsyncpa [#allocation3], 0  ;;  %s6029_s0 = inlined_call_operand.hbm [shape: f32[2,8,16], index: 0, kind: input, shape index: {}]   ;;  %s6030_s1 = inlined_call_operand.vmem [shape: f32[48,128], index: 1, kind: input, shape index: {}]   ;;  %s6031_s2 = inlined_call_operand.hbm [shape: f32[1,128], index: 2, kind: input, shape index: {}]   ;;  %s6032_s3 = inlined_call_operand.vmem [shape: f32[64,128], index: 3, kind: input, shape index: {}]   ;;  %s6033_s4 = inlined_call_operand.vmem [shape: f32[1,128], index: 4, kind: input, shape index: {}]   ;;  %s6034_s5 = inlined_call_operand.vmem [shape: f32[32,16], index: 5, kind: input, shape index: {}]   ;;  %s6035_s6 = inlined_call_operand.hbm [shape: f32[1,16], index: 6, kind: input, shape index: {}]   ;;  %s6036_s7 = inlined_call_operand.vmem [shape: f32[32,16], index: 7, kind: input, shape index: {}]   ;;  %s6037_s8 = inlined_call_operand.hbm [shape: f32[1,16], index: 8, kind: input, shape index: {}]   ;;  %s6038_s9 = inlined_call_operand.hbm [shape: f32[16,9], index: 9, kind: input, shape index: {}]   ;;  %s6039_s10 = inlined_call_operand.hbm [shape: f32[1,9], index: 10, kind: input, shape index: {}]   ;;  %s6040_s11 = inlined_call_operand.hbm [shape: f32[2,8,16], index: 11, kind: output, shape index: {0}]   ;;  %s6041_s12 = inlined_call_operand.hbm [shape: f32[2,4,16], index: 12, kind: output, shape index: {1}]   ;;  %s6042_s13 = inlined_call_operand.vmem [shape: f32[2,12,9], index: 13, kind: output, shape index: {2}]  }
   0x1   :  { %20 = vsyncpa [#allocation6], 0 }
   0x2   :  { %21 = vsyncpa [#allocation9], 0 }
   0x3   :  { %22 = vsyncpa [#allocation12], 0 }
   0x4   :  { %23 = vsyncpa [#allocation4], 0 }
   0x5   :  { %24 = vsyncpa [#allocation15], 0  ;;  %s4779_s25 = smov [#allocation5]   ;;  %s4780_s27 = smov [#allocation8]  }
   0x6   :  { %s45_s26 = sshll.u32 %s4779_s25, 4  ;;  %s73_s28 = sshll.u32 %s4780_s27, 4  ;;  %s46_s26 = int_to_ptr.vmem [resolvable:$true] %s45_s26  ;;  %s74_s28 = int_to_ptr.vmem [resolvable:$true] %s73_s28 }
   0x7   :  { %s4615_s29 = scalar_lea.vmem %s46_s26, 16  ;;  %s4619_s30 = scalar_lea.vmem %s46_s26, 32 }
   0x8   :  { %p4616_p0 = scmp.ne.s32.totalorder %s46_s26, %s4615_s29  ;;  %p4620_p1 = scmp.lt.s32.totalorder %s46_s26, %s46_s26 }
   0x9   :  { %p4621_p2 = scmp.lt.s32.totalorder %s4619_s30, %s4615_s29 }
   0xb   :  { %p4622_p3 = por %p4621_p2, %p4620_p1 }
   0xd   :  { %p4623_p4 = pnand %p4622_p3, %p4616_p0 }
   0xf   :  { %4626 = shalt.err (!%p4623_p4)
}
  0x10   :  { %48 = dma.hbm_to_vmem [thread:$0]  %s6031_s2, 16, %s46_s26, [#allocation6]  }
  0x11   :  { %s4635_s16 = scalar_lea.vmem %s74_s28, 16  ;;  %s4639_s17 = scalar_lea.vmem %s74_s28, 32 }
  0x12   :  { %p4636_p5 = scmp.ne.s32.totalorder %s74_s28, %s4635_s16  ;;  %p4640_p6 = scmp.lt.s32.totalorder %s74_s28, %s74_s28 }
  0x13   :  { %p4641_p7 = scmp.lt.s32.totalorder %s4639_s17, %s4635_s16 }
  0x15   :  { %p4642_p8 = por %p4641_p7, %p4640_p6 }
  0x17   :  { %p4643_p9 = pnand %p4642_p8, %p4636_p5 }
  0x19   :  { %4646 = shalt.err (!%p4643_p9)
}
  0x1a   :  { %76 = dma.hbm_to_vmem [thread:$0]  %s6037_s8, 16, %s74_s28, [#allocation9]  }
  0x1b   :  { %s4781_s20 = smov [#allocation2]  }
  0x1c   :  { %s30_s21 = sshll.u32 %s4781_s20, 4  ;;  %s31_s21 = int_to_ptr.vmem [resolvable:$true] %s30_s21 }
  0x1d   :  { %s4655_s22 = scalar_lea.vmem %s31_s21, 256  ;;  %p4660_p11 = scmp.lt.s32.totalorder %s31_s21, %s31_s21 }
  0x1e   :  { %p4656_p10 = scmp.ne.s32.totalorder %s31_s21, %s4655_s22  ;;  %p4661_p12 = scmp.lt.s32.totalorder %s4655_s22, %s4655_s22 }
  0x20   :  { %p4662_p13 = por %p4661_p12, %p4660_p11 }
  0x22   :  { %p4663_p0 = pnand %p4662_p13, %p4656_p10 }
  0x24   :  { %4666 = shalt.err (!%p4663_p0)
}
  0x25   :  { %s4782_s2 = smov 128   ;;  %s4783_s23 = smov 8  }
  0x26   :  { %36 = dma.hbm_to_vmem [thread:$0]  %s6029_s0, 256, %s31_s21, [#allocation3], %s4782_s2, %s4782_s2, %s4783_s23  }
  0x27   :  { %s4784_s8 = smov [#allocation7]   ;;  %s4785_s27 = smov [#allocation10]  }
  0x28   :  { %s61_s26 = sshll.u32 %s4784_s8, 4  ;;  %s82_s28 = sshll.u32 %s4785_s27, 4  ;;  %s62_s26 = int_to_ptr.vmem [resolvable:$true] %s61_s26  ;;  %s83_s28 = int_to_ptr.vmem [resolvable:$true] %s82_s28 }
  0x29   :  { %s4675_s29 = scalar_lea.vmem %s62_s26, 16  ;;  %s4679_s30 = scalar_lea.vmem %s62_s26, 32 }
  0x2a   :  { %p4676_p1 = scmp.ne.s32.totalorder %s62_s26, %s4675_s29  ;;  %p4680_p2 = scmp.lt.s32.totalorder %s62_s26, %s62_s26 }
  0x2b   :  { %p4681_p3 = scmp.lt.s32.totalorder %s4679_s30, %s4675_s29 }
  0x2d   :  { %p4682_p4 = por %p4681_p3, %p4680_p2 }
  0x2f   :  { %p4683_p5 = pnand %p4682_p4, %p4676_p1 }
  0x31   :  { %4686 = shalt.err (!%p4683_p5)
}
  0x32   :  { %64 = dma.hbm_to_vmem [thread:$0]  %s6035_s6, 16, %s62_s26, [#allocation6]  }
  0x33   :  { %s4695_s16 = scalar_lea.vmem %s83_s28, 256  ;;  %p4700_p7 = scmp.lt.s32.totalorder %s83_s28, %s83_s28 }
  0x34   :  { %p4696_p6 = scmp.ne.s32.totalorder %s83_s28, %s4695_s16  ;;  %p4701_p8 = scmp.lt.s32.totalorder %s4695_s16, %s4695_s16 }
  0x36   :  { %p4702_p9 = por %p4701_p8, %p4700_p7 }
  0x38   :  { %p4703_p10 = pnand %p4702_p9, %p4696_p6 }
  0x3a   :  { %4706 = shalt.err (!%p4703_p10)
}
  0x3b   :  { %88 = dma.hbm_to_vmem [thread:$0]  %s6038_s9, 256, %s83_s28, [#allocation9], %s4782_s2, %s4782_s2, %s4783_s23  }
  0x3c   :  { %s4786_s18 = smov [#allocation11]  }
  0x3d   :  { %s95_s19 = sshll.u32 %s4786_s18, 4  ;;  %s96_s19 = int_to_ptr.vmem [resolvable:$true] %s95_s19 }
  0x3e   :  { %s4715_s20 = scalar_lea.vmem %s96_s19, 16  ;;  %s4719_s6 = scalar_lea.vmem %s96_s19, 32 }
  0x3f   :  { %p4716_p11 = scmp.ne.s32.totalorder %s96_s19, %s4715_s20  ;;  %p4720_p12 = scmp.lt.s32.totalorder %s96_s19, %s96_s19 }
  0x40   :  { %p4721_p13 = scmp.lt.s32.totalorder %s4719_s6, %s4715_s20 }
  0x42   :  { %p4722_p0 = por %p4721_p13, %p4720_p12 }
  0x44   :  { %p4723_p1 = pnand %p4722_p0, %p4716_p11 }
  0x46   :  { %4726 = shalt.err (!%p4723_p1)
}
  0x47   :  { %98 = dma.hbm_to_vmem [thread:$0]  %s6039_s10, 16, %s96_s19, [#allocation12]  }
  0x48   :  { %4767 = dma.done.wait [#allocation3], 256  }
  0x49   :  { %4768 = vsyncadd [#allocation3], 4294967040 }
  0x4a   :  { %4769 = dma.done.wait [#allocation6], 32  }
  0x4b   :  { %4770 = vsyncadd [#allocation6], 4294967264 }
  0x4c   :  { %4771 = dma.done.wait [#allocation9], 272  }
  0x4d   :  { %4772 = vsyncadd [#allocation9], 4294967024 }
  0x4e   :  { %4773 = dma.done.wait [#allocation12], 16  }
  0x4f   :  { %4774 = vsyncadd [#allocation12], 4294967280  ;;  %v4787_v0 = vmov 0.0   ;;  %vm4788_vm0 = vmmov 0   ;;  %v4898_v1 = vld [vmem:[%s6030_s1 + $0x28] sm:$0xff]  ;;  %v4903_v2 = vld [vmem:[%s6030_s1 + $0x20] sm:$0xff] }
  0x50   :  { %3867 = vmatprep.subr.mxu0 %v4787_v0  ;;  %3879 = vmatprep.mubr.msk.f32.mxu0 %vm4788_vm0, %v4787_v0  ;;  %v4910_v3 = vld [vmem:[%s6030_s1 + $0x18] sm:$0xff]  ;;  %v165_v4 = vld [vmem:[#allocation2 + $0x8] sm:$0xff]  ;;  %v4913_v5 = vld [vmem:[#allocation2] sm:$0xff]  ;;  %vm169_vm1 = vcmask 1041409   ;;  %vm172_vm2 = vcmask 130048   ;;  %vm174_vm3 = vcmask 392192  }
  0x51   :  { %3882 = vmatprep.subr.mxu1 %v4787_v0  ;;  %3898 = vmatprep.mubr.msk.f32.mxu1 %vm4788_vm0, %v4787_v0  ;;  %v4915_v6 = vrot.slane %v165_v4, 7  ;;  %v4921_v7 = vld [vmem:[%s6030_s1 + $0x10] sm:$0xff]  ;;  %v4928_v8 = vld [vmem:[%s6030_s1 + $0x8] sm:$0xff]  ;;  %v4937_v10 = vld [vmem:[%s6030_s1] sm:$0xff]  ;;  %s4789_s16 = smov 64   ;;  %s4790_s0 = smov 32  }
  0x52   :  { %3868 = vmatpush3.msra.mxu0 %v4898_v1  ;;  %v4959_v12 = vld [vmem:[#allocation5] ss:$0 sm:$0xff]  ;;  %v4970_v26 = vld [vmem:[%s6032_s3 + $0x38] sm:$0xff]  ;;  %v4982_v28 = vld [vmem:[%s6032_s3 + $0x28] sm:$0xff]  ;;  %s4791_s30 = smov 48   ;;  %vm376_vm4 = vcmask 1042434  }
  0x53   :  { %3869 = vmatprep.subr.mxu0 %v4787_v0  ;;  %v170_v9 = vsel %vm169_vm1, %v4915_v6, %v4913_v5  ;;  %v4975_v27 = vld [vmem:[%s6032_s3 + $0x30] sm:$0xff]  ;;  %3883 = vmatpush3.msra.mxu1 %v4970_v26  ;;  %v4989_v29 = vld [vmem:[%s6032_s3 + $0x20] sm:$0xff]  ;;  %v4996_v30 = vld [vmem:[%s6032_s3 + $0x18] sm:$0xff]  ;;  %vm276_vm5 = vcmask 261120   ;;  %vm278_vm6 = vcmask 523264   ;;  %v377_v39 = vsel %vm376_vm4, %v4915_v6, %v4913_v5  ;;  %s4793_s18 = smov [#allocation14]  }
  0x54   :  { %3870 = vmatpush3.msra.mxu0 %v4903_v2  ;;  %v173_v11 = vsel %vm172_vm2, %v170_v9, 0.0  ;;  %3884 = vmatprep.subr.mxu1 %v4787_v0  ;;  %v5003_v32 = vld [vmem:[%s6032_s3 + $0x10] sm:$0xff]  ;;  %v5011_v33 = vld [vmem:[%s6032_s3 + $0x8] sm:$0xff]  ;;  %v5020_v34 = vld [vmem:[%s6032_s3] sm:$0xff]  ;;  %vm588_vm7 = vcmask 1043459   ;;  %vm800_vm8 = vcmask 1044484  }
  0x55   :  { %3871 = vmatprep.subr.mxu0 %v4787_v0  ;;  %3885 = vmatpush3.msra.mxu1 %v4975_v27  ;;  %v5067_v44 = vld [vmem:[%s6033_s4] ss:$0 sm:$0xff]  ;;  %vm1658_vm9 = vcmask 1040384   ;;  %vm1894_vm10 = vcmask 1041408   ;;  %vm1012_vm11 = vcmask 1045509   ;;  %vm1896_vm12 = vcmask 1042432  }
  0x56   :  { %3872 = vmatpush3.msra.mxu0 %v4910_v3  ;;  %3886 = vmatprep.subr.mxu1 %v4787_v0  ;;  %vm1224_vm13 = vcmask 1046534   ;;  %vm1898_vm14 = vcmask 1043456   ;;  %vm1436_vm15 = vcmask 1047559   ;;  %vm1900_vm1 = vcmask 1044480   ;;  %s3543_s19 = sshll.u32 %s4793_s18, 4  ;;  %s3544_s19 = int_to_ptr.vmem [resolvable:$true] %s3543_s19 }
  0x57   :  { %3873 = vmatprep.subr.mxu0 %v4787_v0  ;;  %3887 = vmatpush3.msra.mxu1 %v4982_v28  ;;  %vm1902_vm4 = vcmask 1045504  }
  0x58   :  { %3874 = vmatpush3.msra.mxu0 %v4921_v7  ;;  %3888 = vmatprep.subr.mxu1 %v4787_v0 }
  0x59   :  { %3875 = vmatprep.subr.mxu0 %v4787_v0  ;;  %3889 = vmatpush3.msra.mxu1 %v4989_v29 }
  0x5a   :  { %3876 = vmatpush3.msra.mxu0 %v4928_v8  ;;  %3890 = vmatprep.subr.mxu1 %v4787_v0 }
  0x5b   :  { %3877 = vmatprep.subr.mxu0 %v4787_v0  ;;  %3891 = vmatpush3.msra.mxu1 %v4996_v30 }
  0x5c   :  { %3878 = vmatpush3.msra.mxu0 %v4937_v10  ;;  %3892 = vmatprep.subr.mxu1 %v4787_v0 }
  0x5d   :  { %3880 = vmatmul.mubr.msk.f32.vlgmr.msra.gmra.mxu0 %vm174_vm3, %v173_v11  ;;  %3901 = vmatprep.subr.mxu0 %v4787_v0 }
  0x5e   :  { %3902 = vmatpush3.msra.mxu0 %v4898_v1  ;;  %3913 = vmatprep.mubr.msk.f32.mxu0 %vm4788_vm0, %v4787_v0 }
  0x5f   :  { %3903 = vmatprep.subr.mxu0 %v4787_v0  ;;  %3893 = vmatpush3.msra.mxu1 %v5003_v32 }
  0x60   :  { %3904 = vmatpush3.msra.mxu0 %v4903_v2  ;;  %3894 = vmatprep.subr.mxu1 %v4787_v0 }
  0x61   :  { %3905 = vmatprep.subr.mxu0 %v4787_v0  ;;  %3895 = vmatpush3.msra.mxu1 %v5011_v33 }
  0x62   :  { %3906 = vmatpush3.msra.mxu0 %v4910_v3  ;;  %3896 = vmatprep.subr.mxu1 %v4787_v0 }
  0x63   :  { %3907 = vmatprep.subr.mxu0 %v4787_v0  ;;  %3897 = vmatpush3.msra.mxu1 %v5020_v34 }
  0x64   :  { %3908 = vmatpush3.msra.mxu0 %v4921_v7  ;;  %3916 = vmatprep.subr.mxu1 %v4787_v0 }
  0x65   :  { %3909 = vmatprep.subr.mxu0 %v4787_v0 }
  0x66   :  { %3910 = vmatpush3.msra.mxu0 %v4928_v8 }
  0x67   :  { %3911 = vmatprep.subr.mxu0 %v4787_v0 }
  0x68   :  { %3912 = vmatpush3.msra.mxu0 %v4937_v10 }
  0x69   :  { %3935 = vmatprep.subr.mxu0 %v4787_v0 }
 0x11d   :  { %v244_v13 = vpop.f32.mrf.mxu0 }
 0x11e   :  { %v245_v14 = vadd.f32 %v4959_v12, %v244_v13 }
 0x11f   :  { %v3881_v15 = vpop.f32.mrf.mxu0 }
 0x120   :  { %4382 = vtanh.f32 %v245_v14  ;;  %v3570_v17 = vmul.f32 -1.442695, %v245_v14 }
 0x122   :  { %4384 = vpow2.f32 %v3570_v17 }
 0x12d   :  { %v4383_v16 = vpop.eup %4382 }
 0x12e   :  { %257 = vrot.lane.b32.xlu0 %v4383_v16, %s4789_s16 }
 0x12f   :  { %v4385_v18 = vpop.eup %4384 }
 0x130   :  { %v251_v19 = vadd.f32 1.0, %v4385_v18 }
 0x132   :  { %4386 = vrcp.f32 %v251_v19 }
 0x13f   :  { %v4387_v20 = vpop.eup %4386 }
 0x140   :  { %v255_v23 = vmul.f32 0.0, %v4387_v20 }
 0x1a0   :  { %v258_v21 = vpop.permute.xlu0 %257 }
 0x1a1   :  { %v260_v22 = vmul.f32 %v4387_v20, %v258_v21 }
 0x1a3   :  { %262 = vrot.lane.b32.xlu0 %v260_v22, %s4790_s0 }
 0x215   :  { %v263_v24 = vpop.permute.xlu0 %262 }
 0x216   :  { %v4964_v25 = vadd.f32 %v263_v24, %v255_v23  ;;  %v589_v24 = vsel %vm588_vm7, %v4915_v6, %v4913_v5  ;;  %vm1904_vm7 = vcmask 1046528  }
 0x218   :  { %4388 = vtanh.f32 %v4964_v25 }
 0x225   :  { %v4389_v31 = vpop.eup %4388 }
 0x226   :  { %268 = vrot.lane.b32.xlu1 %v4389_v31, %s4789_s16 }
 0x298   :  { %v269_v35 = vpop.permute.xlu1 %268 }
 0x299   :  { %v271_v36 = vmul.f32 %v4387_v20, %v269_v35 }
 0x29b   :  { %v379_v37 = vrot.slane %v271_v36, 7  ;;  %273 = vrot.lane.b32.xlu0 %v271_v36, %s4790_s0 }
 0x29d   :  { %380 = vrot.lane.b32.xlu1 %v379_v37, %s4791_s30 }
 0x30d   :  { %v274_v38 = vpop.permute.xlu0 %273 }
 0x30e   :  { %v277_v40 = vsel %vm276_vm5, %v274_v38, 0.0 }
 0x30f   :  { %3899 = vmatmul.mubr.msk.f32.vlgmr.msra.gmra.mxu1 %vm278_vm6, %v277_v40  ;;  %v381_v41 = vpop.permute.xlu1 %380 }
 0x310   :  { %v383_v42 = vsel %vm172_vm2, %v377_v39, %v381_v41  ;;  %3917 = vmatpush3.msra.mxu1 %v4970_v26  ;;  %3932 = vmatprep.mubr.msk.f32.mxu1 %vm4788_vm0, %v4787_v0 }
 0x311   :  { %v385_v43 = vrot.slane %v383_v42, 1  ;;  %3918 = vmatprep.subr.mxu1 %v4787_v0 }
 0x312   :  { %3919 = vmatpush3.msra.mxu1 %v4975_v27 }
 0x313   :  { %3914 = vmatmul.mubr.msk.f32.vlgmr.msra.gmra.mxu0 %vm174_vm3, %v385_v43  ;;  %3920 = vmatprep.subr.mxu1 %v4787_v0 }
 0x314   :  { %3936 = vmatpush3.msra.mxu0 %v4898_v1  ;;  %3921 = vmatpush3.msra.mxu1 %v4982_v28 }
 0x315   :  { %3937 = vmatprep.subr.mxu0 %v4787_v0  ;;  %3922 = vmatprep.subr.mxu1 %v4787_v0 }
 0x316   :  { %3938 = vmatpush3.msra.mxu0 %v4903_v2  ;;  %3923 = vmatpush3.msra.mxu1 %v4989_v29 }
 0x317   :  { %3939 = vmatprep.subr.mxu0 %v4787_v0  ;;  %3924 = vmatprep.subr.mxu1 %v4787_v0 }
 0x318   :  { %3940 = vmatpush3.msra.mxu0 %v4910_v3  ;;  %3925 = vmatpush3.msra.mxu1 %v4996_v30 }
 0x319   :  { %3941 = vmatprep.subr.mxu0 %v4787_v0  ;;  %3926 = vmatprep.subr.mxu1 %v4787_v0 }
 0x31a   :  { %3942 = vmatpush3.msra.mxu0 %v4921_v7  ;;  %3927 = vmatpush3.msra.mxu1 %v5003_v32 }
 0x31b   :  { %3943 = vmatprep.subr.mxu0 %v4787_v0  ;;  %3928 = vmatprep.subr.mxu1 %v4787_v0 }
 0x31c   :  { %3944 = vmatpush3.msra.mxu0 %v4928_v8  ;;  %3929 = vmatpush3.msra.mxu1 %v5011_v33 }
 0x31d   :  { %3945 = vmatprep.subr.mxu0 %v4787_v0  ;;  %3947 = vmatprep.mubr.msk.f32.mxu0 %vm4788_vm0, %v4787_v0 }
 0x31e   :  { %3946 = vmatpush3.msra.mxu0 %v4937_v10  ;;  %3930 = vmatprep.subr.mxu1 %v4787_v0 }
 0x31f   :  { %3931 = vmatpush3.msra.mxu1 %v5020_v34  ;;  %3969 = vmatprep.subr.mxu0 %v4787_v0 }
 0x320   :  { %3950 = vmatprep.subr.mxu1 %v4787_v0 }
 0x3cf   :  { %v348_v45 = vpop.f32.mrf.mxu1 }
 0x3d0   :  { %v349_v46 = vadd.f32 %v5067_v44, %v348_v45 }
 0x3d1   :  { %v3900_v47 = vpop.f32.mrf.mxu1 }
 0x3d2   :  { %4390 = vtanh.f32 %v349_v46  ;;  %v3572_v53 = vmul.f32 -1.442695, %v349_v46 }
 0x3d3   :  { %v454_v48 = vpop.f32.mrf.mxu0 }
 0x3d4   :  { %v455_v49 = vadd.f32 %v4959_v12, %v454_v48 }
 0x3d5   :  { %v3915_v50 = vpop.f32.mrf.mxu0 }
 0x3d6   :  { %4392 = vtanh.f32 %v455_v49  ;;  %v3574_v54 = vmul.f32 -1.442695, %v455_v49 }
 0x3d7   :  { %4394 = vpow2.f32 %v3572_v53 }
 0x3d8   :  { %4396 = vpow2.f32 %v3574_v54 }
 0x3df   :  { %v4391_v51 = vpop.eup %4390 }
 0x3e0   :  { %361 = vrot.lane.b32.xlu0 %v4391_v51, %s4789_s16 }
 0x3e3   :  { %v4393_v52 = vpop.eup %4392 }
 0x3e4   :  { %467 = vrot.lane.b32.xlu1 %v4393_v52, %s4789_s16  ;;  %v4395_v55 = vpop.eup %4394 }
 0x3e5   :  { %v355_v56 = vadd.f32 1.0, %v4395_v55  ;;  %v4397_v57 = vpop.eup %4396 }
 0x3e6   :  { %v461_v58 = vadd.f32 1.0, %v4397_v57 }
 0x3e7   :  { %4398 = vrcp.f32 %v355_v56 }
 0x3e8   :  { %4400 = vrcp.f32 %v461_v58 }
 0x3f4   :  { %v4399_v59 = vpop.eup %4398 }
 0x3f5   :  { %v4401_v62 = vpop.eup %4400  ;;  %v359_v9 = vmul.f32 0.0, %v4399_v59 }
 0x3f6   :  { %v465_v14 = vmul.f32 %v4401_v62, %v4964_v25 }
 0x452   :  { %v362_v60 = vpop.permute.xlu0 %361 }
 0x453   :  { %v364_v61 = vmul.f32 %v4399_v59, %v362_v60 }
 0x455   :  { %366 = vrot.lane.b32.xlu0 %v364_v61, %s4790_s0 }
 0x456   :  { %v468_v63 = vpop.permute.xlu1 %467 }
 0x457   :  { %v470_v4 = vmul.f32 %v4401_v62, %v468_v63 }
 0x459   :  { %472 = vrot.lane.b32.xlu1 %v470_v4, %s4790_s0 }
 0x4c7   :  { %v367_v11 = vpop.permute.xlu0 %366 }
 0x4c8   :  { %v5075_v13 = vadd.f32 %v367_v11, %v359_v9 }
 0x4ca   :  { %4402 = vtanh.f32 %v5075_v13 }
 0x4cb   :  { %v473_v15 = vpop.permute.xlu1 %472 }
 0x4cc   :  { %v5079_v16 = vadd.f32 %v473_v15, %v465_v14 }
 0x4ce   :  { %4404 = vtanh.f32 %v5079_v16 }
 0x4d7   :  { %v4403_v17 = vpop.eup %4402 }
 0x4d8   :  { %372 = vrot.lane.b32.xlu0 %v4403_v17, %s4789_s16 }
 0x4db   :  { %v4405_v18 = vpop.eup %4404 }
 0x4dc   :  { %478 = vrot.lane.b32.xlu1 %v4405_v18, %s4789_s16 }
 0x54a   :  { %v373_v22 = vpop.permute.xlu0 %372 }
 0x54b   :  { %v5086_v23 = vmul.f32 %v4399_v59, %v373_v22 }
 0x54e   :  { %v479_v19 = vpop.permute.xlu1 %478 }
 0x54f   :  { %v481_v20 = vmul.f32 %v4401_v62, %v479_v19  ;;  %v801_v19 = vsel %vm800_vm8, %v4915_v6, %v4913_v5  ;;  %vm2172_vm8 = vcmask 72704  }
 0x551   :  { %v591_v21 = vrot.slane %v481_v20, 6  ;;  %483 = vrot.lane.b32.xlu0 %v481_v20, %s4790_s0 }
 0x553   :  { %592 = vrot.lane.b32.xlu1 %v591_v21, %s4791_s30 }
 0x557   :  { %487 = vrot.lane.b32.xlu1 %v5086_v23, %s4789_s16 }
 0x5c3   :  { %v484_v36 = vpop.permute.xlu0 %483 }
 0x5c5   :  { %v593_v25 = vpop.permute.xlu1 %592 }
 0x5c6   :  { %v595_v31 = vsel %vm172_vm2, %v589_v24, %v593_v25 }
 0x5c7   :  { %v597_v35 = vrot.slane %v595_v31, 2 }
 0x5c9   :  { %3948 = vmatmul.mubr.msk.f32.vlgmr.msra.gmra.mxu0 %vm174_vm3, %v597_v35  ;;  %v488_v37 = vpop.permute.xlu1 %487 }
 0x5ca   :  { %v490_v38 = vsel %vm276_vm5, %v484_v36, %v488_v37  ;;  %3970 = vmatpush3.msra.mxu0 %v4898_v1  ;;  %3981 = vmatprep.mubr.msk.f32.mxu0 %vm4788_vm0, %v4787_v0 }
 0x5cb   :  { %3933 = vmatmul.mubr.msk.f32.vlgmr.msra.gmra.mxu1 %vm278_vm6, %v490_v38  ;;  %3971 = vmatprep.subr.mxu0 %v4787_v0 }
 0x5cc   :  { %3951 = vmatpush3.msra.mxu1 %v4970_v26  ;;  %3972 = vmatpush3.msra.mxu0 %v4903_v2 }
 0x5cd   :  { %3952 = vmatprep.subr.mxu1 %v4787_v0  ;;  %3973 = vmatprep.subr.mxu0 %v4787_v0 }
 0x5ce   :  { %3953 = vmatpush3.msra.mxu1 %v4975_v27  ;;  %3974 = vmatpush3.msra.mxu0 %v4910_v3 }
 0x5cf   :  { %3954 = vmatprep.subr.mxu1 %v4787_v0  ;;  %3975 = vmatprep.subr.mxu0 %v4787_v0 }
 0x5d0   :  { %3955 = vmatpush3.msra.mxu1 %v4982_v28  ;;  %3976 = vmatpush3.msra.mxu0 %v4921_v7 }
 0x5d1   :  { %3956 = vmatprep.subr.mxu1 %v4787_v0  ;;  %3977 = vmatprep.subr.mxu0 %v4787_v0 }
 0x5d2   :  { %3957 = vmatpush3.msra.mxu1 %v4989_v29  ;;  %3978 = vmatpush3.msra.mxu0 %v4928_v8 }
 0x5d3   :  { %3958 = vmatprep.subr.mxu1 %v4787_v0  ;;  %3979 = vmatprep.subr.mxu0 %v4787_v0 }
 0x5d4   :  { %3959 = vmatpush3.msra.mxu1 %v4996_v30  ;;  %3980 = vmatpush3.msra.mxu0 %v4937_v10 }
 0x5d5   :  { %3960 = vmatprep.subr.mxu1 %v4787_v0  ;;  %3966 = vmatprep.mubr.msk.f32.mxu1 %vm4788_vm0, %v4787_v0 }
 0x5d6   :  { %3961 = vmatpush3.msra.mxu1 %v5003_v32  ;;  %3984 = vmatprep.subr.mxu0 %v4787_v0 }
 0x5d7   :  { %3962 = vmatprep.subr.mxu1 %v4787_v0 }
 0x5d8   :  { %3963 = vmatpush3.msra.mxu1 %v5011_v33 }
 0x5d9   :  { %3964 = vmatprep.subr.mxu1 %v4787_v0 }
 0x5da   :  { %3965 = vmatpush3.msra.mxu1 %v5020_v34 }
 0x5db   :  { %4003 = vmatprep.subr.mxu1 %v4787_v0 }
 0x689   :  { %v666_v39 = vpop.f32.mrf.mxu0 }
 0x68a   :  { %v667_v40 = vadd.f32 %v4959_v12, %v666_v39 }
 0x68b   :  { %v560_v41 = vpop.f32.mrf.mxu1  ;;  %v3949_v42 = vpop.f32.mrf.mxu0 }
 0x68c   :  { %4406 = vtanh.f32 %v667_v40  ;;  %v561_v43 = vadd.f32 %v5067_v44, %v560_v41  ;;  %v3578_v48 = vmul.f32 -1.442695, %v667_v40 }
 0x68d   :  { %v3934_v45 = vpop.f32.mrf.mxu1 }
 0x68e   :  { %4408 = vtanh.f32 %v561_v43  ;;  %v3576_v49 = vmul.f32 -1.442695, %v561_v43 }
 0x68f   :  { %4410 = vpow2.f32 %v3578_v48 }
 0x690   :  { %4412 = vpow2.f32 %v3576_v49 }
 0x699   :  { %v4407_v46 = vpop.eup %4406 }
 0x69a   :  { %679 = vrot.lane.b32.xlu0 %v4407_v46, %s4789_s16 }
 0x69b   :  { %v4409_v47 = vpop.eup %4408 }
 0x69c   :  { %573 = vrot.lane.b32.xlu1 %v4409_v47, %s4789_s16  ;;  %v4411_v50 = vpop.eup %4410 }
 0x69d   :  { %v4413_v51 = vpop.eup %4412  ;;  %v673_v52 = vadd.f32 1.0, %v4411_v50 }
 0x69e   :  { %v567_v53 = vadd.f32 1.0, %v4413_v51 }
 0x69f   :  { %4414 = vrcp.f32 %v673_v52 }
 0x6a0   :  { %4416 = vrcp.f32 %v567_v53 }
 0x6ac   :  { %v4415_v54 = vpop.eup %4414 }
 0x6ad   :  { %v4417_v57 = vpop.eup %4416  ;;  %v677_v60 = vmul.f32 %v4415_v54, %v5079_v16 }
 0x6ae   :  { %v571_v63 = vmul.f32 %v4417_v57, %v5075_v13 }
 0x70c   :  { %v680_v55 = vpop.permute.xlu0 %679 }
 0x70d   :  { %v682_v56 = vmul.f32 %v4415_v54, %v680_v55 }
 0x70e   :  { %v574_v58 = vpop.permute.xlu1 %573 }
 0x70f   :  { %684 = vrot.lane.b32.xlu0 %v682_v56, %s4790_s0  ;;  %v576_v59 = vmul.f32 %v4417_v57, %v574_v58 }
 0x711   :  { %578 = vrot.lane.b32.xlu1 %v576_v59, %s4790_s0 }
 0x781   :  { %v685_v61 = vpop.permute.xlu0 %684 }
 0x782   :  { %v5135_v62 = vadd.f32 %v685_v61, %v677_v60 }
 0x783   :  { %v579_v4 = vpop.permute.xlu1 %578 }
 0x784   :  { %4418 = vtanh.f32 %v5135_v62  ;;  %v5139_v9 = vadd.f32 %v579_v4, %v571_v63 }
 0x786   :  { %4420 = vtanh.f32 %v5139_v9 }
 0x791   :  { %v4419_v11 = vpop.eup %4418 }
 0x792   :  { %690 = vrot.lane.b32.xlu0 %v4419_v11, %s4789_s16 }
 0x793   :  { %v4421_v14 = vpop.eup %4420 }
 0x794   :  { %584 = vrot.lane.b32.xlu1 %v4421_v14, %s4789_s16 }
 0x804   :  { %v691_v15 = vpop.permute.xlu0 %690 }
 0x805   :  { %v693_v16 = vmul.f32 %v4415_v54, %v691_v15 }
 0x806   :  { %v585_v18 = vpop.permute.xlu1 %584 }
 0x807   :  { %v803_v17 = vrot.slane %v693_v16, 5  ;;  %695 = vrot.lane.b32.xlu1 %v693_v16, %s4790_s0  ;;  %v5146_v13 = vmul.f32 %v4417_v57, %v585_v18 }
 0x809   :  { %804 = vrot.lane.b32.xlu0 %v803_v17, %s4791_s30  ;;  %v1864_v14 = vrot.slane %v5146_v13, 7  ;;  %v1879_v17 = vrot.slane %v5086_v23, 1 }
 0x80d   :  { %699 = vrot.lane.b32.xlu0 %v5146_v13, %s4789_s16 }
 0x879   :  { %v696_v24 = vpop.permute.xlu1 %695 }
 0x87b   :  { %v805_v20 = vpop.permute.xlu0 %804 }
 0x87c   :  { %v807_v21 = vsel %vm172_vm2, %v801_v19, %v805_v20  ;;  %v1893_v20 = vsel %vm1658_vm9, %v5086_v23, %v1864_v14 }
 0x87d   :  { %v809_v22 = vrot.slane %v807_v21, 3  ;;  %v1906_v21 = vsel %vm1658_vm9, %v1879_v17, %v5146_v13 }
 0x87f   :  { %3982 = vmatmul.mubr.msk.f32.vlgmr.msra.gmra.mxu0 %vm174_vm3, %v809_v22  ;;  %v700_v25 = vpop.permute.xlu0 %699 }
 0x880   :  { %v702_v31 = vsel %vm276_vm5, %v696_v24, %v700_v25  ;;  %3985 = vmatpush3.msra.mxu0 %v4970_v26  ;;  %4000 = vmatprep.mubr.msk.f32.mxu0 %vm4788_vm0, %v4787_v0  ;;  %v1013_v25 = vsel %vm1012_vm11, %v4915_v6, %v4913_v5 }
 0x881   :  { %3967 = vmatmul.mubr.msk.f32.vlgmr.msra.gmra.mxu1 %vm278_vm6, %v702_v31  ;;  %3986 = vmatprep.subr.mxu0 %v4787_v0 }
 0x882   :  { %3987 = vmatpush3.msra.mxu0 %v4975_v27  ;;  %4004 = vmatpush3.msra.mxu1 %v4898_v1 }
 0x883   :  { %3988 = vmatprep.subr.mxu0 %v4787_v0  ;;  %4005 = vmatprep.subr.mxu1 %v4787_v0 }
 0x884   :  { %3989 = vmatpush3.msra.mxu0 %v4982_v28  ;;  %4006 = vmatpush3.msra.mxu1 %v4903_v2 }
 0x885   :  { %3990 = vmatprep.subr.mxu0 %v4787_v0  ;;  %4007 = vmatprep.subr.mxu1 %v4787_v0 }
 0x886   :  { %3991 = vmatpush3.msra.mxu0 %v4989_v29  ;;  %4008 = vmatpush3.msra.mxu1 %v4910_v3 }
 0x887   :  { %3992 = vmatprep.subr.mxu0 %v4787_v0  ;;  %4009 = vmatprep.subr.mxu1 %v4787_v0 }
 0x888   :  { %3993 = vmatpush3.msra.mxu0 %v4996_v30  ;;  %4010 = vmatpush3.msra.mxu1 %v4921_v7 }
 0x889   :  { %3994 = vmatprep.subr.mxu0 %v4787_v0  ;;  %4011 = vmatprep.subr.mxu1 %v4787_v0 }
 0x88a   :  { %3995 = vmatpush3.msra.mxu0 %v5003_v32  ;;  %4012 = vmatpush3.msra.mxu1 %v4928_v8 }
 0x88b   :  { %3996 = vmatprep.subr.mxu0 %v4787_v0  ;;  %4013 = vmatprep.subr.mxu1 %v4787_v0 }
 0x88c   :  { %3997 = vmatpush3.msra.mxu0 %v5011_v33  ;;  %4014 = vmatpush3.msra.mxu1 %v4937_v10 }
 0x88d   :  { %4015 = vmatprep.mubr.msk.f32.mxu1 %vm4788_vm0, %v4787_v0  ;;  %3998 = vmatprep.subr.mxu0 %v4787_v0 }
 0x88e   :  { %3999 = vmatpush3.msra.mxu0 %v5020_v34  ;;  %4018 = vmatprep.subr.mxu1 %v4787_v0 }
 0x88f   :  { %4037 = vmatprep.subr.mxu0 %v4787_v0 }
 0x93f   :  { %v878_v35 = vpop.f32.mrf.mxu0 }
 0x940   :  { %v879_v36 = vadd.f32 %v4959_v12, %v878_v35 }
 0x941   :  { %v772_v37 = vpop.f32.mrf.mxu1  ;;  %v3983_v38 = vpop.f32.mrf.mxu0 }
 0x942   :  { %4422 = vtanh.f32 %v879_v36  ;;  %v773_v39 = vadd.f32 %v5067_v44, %v772_v37  ;;  %v3582_v43 = vmul.f32 -1.442695, %v879_v36 }
 0x943   :  { %v3968_v40 = vpop.f32.mrf.mxu1 }
 0x944   :  { %4424 = vtanh.f32 %v773_v39  ;;  %v3580_v45 = vmul.f32 -1.442695, %v773_v39 }
 0x945   :  { %4426 = vpow2.f32 %v3582_v43 }
 0x946   :  { %4428 = vpow2.f32 %v3580_v45 }
 0x94f   :  { %v4423_v41 = vpop.eup %4422 }
 0x950   :  { %891 = vrot.lane.b32.xlu1 %v4423_v41, %s4789_s16 }
 0x951   :  { %v4425_v42 = vpop.eup %4424 }
 0x952   :  { %785 = vrot.lane.b32.xlu0 %v4425_v42, %s4789_s16  ;;  %v4427_v46 = vpop.eup %4426 }
 0x953   :  { %v4429_v47 = vpop.eup %4428  ;;  %v885_v48 = vadd.f32 1.0, %v4427_v46 }
 0x954   :  { %v779_v49 = vadd.f32 1.0, %v4429_v47 }
 0x955   :  { %4430 = vrcp.f32 %v885_v48 }
 0x956   :  { %4432 = vrcp.f32 %v779_v49 }
 0x962   :  { %v4431_v50 = vpop.eup %4430 }
 0x963   :  { %v4433_v53 = vpop.eup %4432  ;;  %v889_v56 = vmul.f32 %v4431_v50, %v5135_v62 }
 0x964   :  { %v783_v59 = vmul.f32 %v4433_v53, %v5139_v9 }
 0x9c2   :  { %v892_v51 = vpop.permute.xlu1 %891 }
 0x9c3   :  { %v894_v52 = vmul.f32 %v4431_v50, %v892_v51 }
 0x9c4   :  { %v786_v54 = vpop.permute.xlu0 %785 }
 0x9c5   :  { %896 = vrot.lane.b32.xlu1 %v894_v52, %s4790_s0  ;;  %v788_v55 = vmul.f32 %v4433_v53, %v786_v54 }
 0x9c7   :  { %790 = vrot.lane.b32.xlu0 %v788_v55, %s4790_s0 }
 0xa37   :  { %v897_v57 = vpop.permute.xlu1 %896 }
 0xa38   :  { %v5195_v58 = vadd.f32 %v897_v57, %v889_v56 }
 0xa39   :  { %v791_v60 = vpop.permute.xlu0 %790 }
 0xa3a   :  { %4434 = vtanh.f32 %v5195_v58  ;;  %v5199_v61 = vadd.f32 %v791_v60, %v783_v59 }
 0xa3c   :  { %4436 = vtanh.f32 %v5199_v61 }
 0xa47   :  { %v4435_v63 = vpop.eup %4434 }
 0xa48   :  { %902 = vrot.lane.b32.xlu1 %v4435_v63, %s4789_s16 }
 0xa49   :  { %v4437_v4 = vpop.eup %4436 }
 0xa4a   :  { %796 = vrot.lane.b32.xlu0 %v4437_v4, %s4789_s16 }
 0xaba   :  { %v903_v11 = vpop.permute.xlu1 %902 }
 0xabb   :  { %v905_v62 = vmul.f32 %v4431_v50, %v903_v11 }
 0xabc   :  { %v797_v16 = vpop.permute.xlu0 %796 }
 0xabd   :  { %v1015_v15 = vrot.slane %v905_v62, 4  ;;  %907 = vrot.lane.b32.xlu0 %v905_v62, %s4790_s0  ;;  %v799_v9 = vmul.f32 %v4433_v53, %v797_v16 }
 0xabf   :  { %1016 = vrot.lane.b32.xlu1 %v1015_v15, %s4791_s30  ;;  %v1866_v18 = vrot.slane %v799_v9, 6  ;;  %v1881_v19 = vrot.slane %v799_v9, 7 }
 0xac1   :  { %v5213_v22 = vsel %vm1894_vm10, %v1893_v20, %v1866_v18  ;;  %v5216_v24 = vsel %vm1894_vm10, %v1906_v21, %v1881_v19 }
 0xac3   :  { %911 = vrot.lane.b32.xlu1 %v799_v9, %s4789_s16 }
 0xb2f   :  { %v908_v23 = vpop.permute.xlu0 %907 }
 0xb31   :  { %v1017_v31 = vpop.permute.xlu1 %1016 }
 0xb32   :  { %v1019_v35 = vsel %vm172_vm2, %v1013_v25, %v1017_v31  ;;  %v1225_v31 = vsel %vm1224_vm13, %v4915_v6, %v4913_v5 }
 0xb33   :  { %v1021_v36 = vrot.slane %v1019_v35, 4 }
 0xb35   :  { %4016 = vmatmul.mubr.msk.f32.vlgmr.msra.gmra.mxu1 %vm174_vm3, %v1021_v36  ;;  %v912_v13 = vpop.permute.xlu1 %911 }
 0xb36   :  { %v914_v37 = vsel %vm276_vm5, %v908_v23, %v912_v13  ;;  %4019 = vmatpush3.msra.mxu1 %v4970_v26  ;;  %4034 = vmatprep.mubr.msk.f32.mxu1 %vm4788_vm0, %v4787_v0 }
 0xb37   :  { %4001 = vmatmul.mubr.msk.f32.vlgmr.msra.gmra.mxu0 %vm278_vm6, %v914_v37  ;;  %4020 = vmatprep.subr.mxu1 %v4787_v0 }
 0xb38   :  { %4021 = vmatpush3.msra.mxu1 %v4975_v27  ;;  %4038 = vmatpush3.msra.mxu0 %v4898_v1 }
 0xb39   :  { %4022 = vmatprep.subr.mxu1 %v4787_v0  ;;  %4039 = vmatprep.subr.mxu0 %v4787_v0 }
 0xb3a   :  { %4023 = vmatpush3.msra.mxu1 %v4982_v28  ;;  %4040 = vmatpush3.msra.mxu0 %v4903_v2 }
 0xb3b   :  { %4024 = vmatprep.subr.mxu1 %v4787_v0  ;;  %4041 = vmatprep.subr.mxu0 %v4787_v0 }
 0xb3c   :  { %4025 = vmatpush3.msra.mxu1 %v4989_v29  ;;  %4042 = vmatpush3.msra.mxu0 %v4910_v3 }
 0xb3d   :  { %4026 = vmatprep.subr.mxu1 %v4787_v0  ;;  %4043 = vmatprep.subr.mxu0 %v4787_v0 }
 0xb3e   :  { %4027 = vmatpush3.msra.mxu1 %v4996_v30  ;;  %4044 = vmatpush3.msra.mxu0 %v4921_v7 }
 0xb3f   :  { %4028 = vmatprep.subr.mxu1 %v4787_v0  ;;  %4045 = vmatprep.subr.mxu0 %v4787_v0 }
 0xb40   :  { %4029 = vmatpush3.msra.mxu1 %v5003_v32  ;;  %4046 = vmatpush3.msra.mxu0 %v4928_v8 }
 0xb41   :  { %4030 = vmatprep.subr.mxu1 %v4787_v0  ;;  %4047 = vmatprep.subr.mxu0 %v4787_v0 }
 0xb42   :  { %4031 = vmatpush3.msra.mxu1 %v5011_v33  ;;  %4048 = vmatpush3.msra.mxu0 %v4937_v10 }
 0xb43   :  { %4049 = vmatprep.mubr.msk.f32.mxu0 %vm4788_vm0, %v4787_v0  ;;  %4032 = vmatprep.subr.mxu1 %v4787_v0 }
 0xb44   :  { %4033 = vmatpush3.msra.mxu1 %v5020_v34  ;;  %4052 = vmatprep.subr.mxu0 %v4787_v0 }
 0xb45   :  { %4071 = vmatprep.subr.mxu1 %v4787_v0 }
 0xbf5   :  { %v1090_v38 = vpop.f32.mrf.mxu1 }
 0xbf6   :  { %v1091_v39 = vadd.f32 %v4959_v12, %v1090_v38 }
 0xbf7   :  { %v984_v40 = vpop.f32.mrf.mxu0  ;;  %v4017_v41 = vpop.f32.mrf.mxu1 }
 0xbf8   :  { %4438 = vtanh.f32 %v1091_v39  ;;  %v985_v42 = vadd.f32 %v5067_v44, %v984_v40  ;;  %v3586_v47 = vmul.f32 -1.442695, %v1091_v39 }
 0xbf9   :  { %v4002_v43 = vpop.f32.mrf.mxu0 }
 0xbfa   :  { %4440 = vtanh.f32 %v985_v42  ;;  %v3584_v48 = vmul.f32 -1.442695, %v985_v42 }
 0xbfb   :  { %4442 = vpow2.f32 %v3586_v47 }
 0xbfc   :  { %4444 = vpow2.f32 %v3584_v48 }
 0xc05   :  { %v4439_v45 = vpop.eup %4438 }
 0xc06   :  { %1103 = vrot.lane.b32.xlu0 %v4439_v45, %s4789_s16 }
 0xc07   :  { %v4441_v46 = vpop.eup %4440 }
 0xc08   :  { %997 = vrot.lane.b32.xlu1 %v4441_v46, %s4789_s16  ;;  %v4443_v49 = vpop.eup %4442 }
 0xc09   :  { %v4445_v50 = vpop.eup %4444  ;;  %v1097_v51 = vadd.f32 1.0, %v4443_v49 }
 0xc0a   :  { %v991_v52 = vadd.f32 1.0, %v4445_v50 }
 0xc0b   :  { %4446 = vrcp.f32 %v1097_v51 }
 0xc0c   :  { %4448 = vrcp.f32 %v991_v52 }
 0xc18   :  { %v4447_v53 = vpop.eup %4446 }
 0xc19   :  { %v4449_v56 = vpop.eup %4448  ;;  %v1101_v60 = vmul.f32 %v4447_v53, %v5195_v58 }
 0xc1a   :  { %v995_v11 = vmul.f32 %v4449_v56, %v5199_v61 }
 0xc78   :  { %v1104_v54 = vpop.permute.xlu0 %1103 }
 0xc79   :  { %v1106_v55 = vmul.f32 %v4447_v53, %v1104_v54 }
 0xc7a   :  { %v998_v57 = vpop.permute.xlu1 %997 }
 0xc7b   :  { %1108 = vrot.lane.b32.xlu0 %v1106_v55, %s4790_s0  ;;  %v1000_v59 = vmul.f32 %v4449_v56, %v998_v57 }
 0xc7d   :  { %1002 = vrot.lane.b32.xlu1 %v1000_v59, %s4790_s0 }
 0xced   :  { %v1109_v63 = vpop.permute.xlu0 %1108 }
 0xcee   :  { %v5264_v4 = vadd.f32 %v1109_v63, %v1101_v60  ;;  %v5349_v60 = vld [vmem:[#allocation2] sm:$0xff] }
 0xcef   :  { %v1003_v62 = vpop.permute.xlu1 %1002  ;;  %v1437_v63 = vsel %vm1436_vm15, %v4915_v6, %v5349_v60 }
 0xcf0   :  { %4450 = vtanh.f32 %v5264_v4  ;;  %v5268_v14 = vadd.f32 %v1003_v62, %v995_v11 }
 0xcf2   :  { %4452 = vtanh.f32 %v5268_v14 }
 0xcfd   :  { %v4451_v15 = vpop.eup %4450 }
 0xcfe   :  { %1114 = vrot.lane.b32.xlu0 %v4451_v15, %s4789_s16 }
 0xcff   :  { %v4453_v16 = vpop.eup %4452 }
 0xd00   :  { %1008 = vrot.lane.b32.xlu1 %v4453_v16, %s4789_s16 }
 0xd70   :  { %v1115_v9 = vpop.permute.xlu0 %1114 }
 0xd71   :  { %v1117_v58 = vmul.f32 %v4447_v53, %v1115_v9  ;;  %v5359_v9 = vld [vmem:[%s6032_s3 + $0x38] sm:$0xff] }
 0xd72   :  { %v1009_v18 = vpop.permute.xlu1 %1008 }
 0xd73   :  { %v1227_v17 = vrot.slane %v1117_v58, 3  ;;  %1119 = vrot.lane.b32.xlu1 %v1117_v58, %s4790_s0  ;;  %v1011_v61 = vmul.f32 %v4449_v56, %v1009_v18  ;;  %v5369_v58 = vld [vmem:[%s6032_s3 + $0x30] sm:$0xff]  ;;  %v5383_v18 = vld [vmem:[%s6032_s3 + $0x28] sm:$0xff] }
 0xd75   :  { %1228 = vrot.lane.b32.xlu0 %v1227_v17, %s4791_s30  ;;  %v1868_v19 = vrot.slane %v1011_v61, 5  ;;  %v1883_v20 = vrot.slane %v1011_v61, 6  ;;  %v5375_v17 = vld [vmem:[%s6030_s1 + $0x28] sm:$0xff] }
 0xd77   :  { %v5277_v21 = vsel %vm1896_vm12, %v5213_v22, %v1868_v19  ;;  %v5281_v25 = vsel %vm1896_vm12, %v5216_v24, %v1883_v20  ;;  %v5397_v19 = vld [vmem:[%s6032_s3 + $0x20] sm:$0xff]  ;;  %v5403_v20 = vld [vmem:[%s6030_s1 + $0x18] sm:$0xff] }
 0xd79   :  { %1123 = vrot.lane.b32.xlu0 %v1011_v61, %s4789_s16  ;;  %v5389_v61 = vld [vmem:[%s6030_s1 + $0x20] sm:$0xff] }
 0xde5   :  { %v1120_v13 = vpop.permute.xlu1 %1119 }
 0xde7   :  { %v1229_v35 = vpop.permute.xlu0 %1228 }
 0xde8   :  { %v1231_v36 = vsel %vm172_vm2, %v1225_v31, %v1229_v35  ;;  %v5425_v31 = vld [vmem:[%s6032_s3 + $0x10] sm:$0xff]  ;;  %v5431_v35 = vld [vmem:[%s6030_s1 + $0x8] sm:$0xff] }
 0xde9   :  { %v1233_v23 = vrot.slane %v1231_v36, 5  ;;  %v5439_v36 = vld [vmem:[%s6032_s3 + $0x8] sm:$0xff] }
 0xdeb   :  { %4050 = vmatmul.mubr.msk.f32.vlgmr.msra.gmra.mxu0 %vm174_vm3, %v1233_v23  ;;  %v1124_v37 = vpop.permute.xlu0 %1123  ;;  %v5445_v23 = vld [vmem:[%s6030_s1] sm:$0xff] }
 0xdec   :  { %v1126_v22 = vsel %vm276_vm5, %v1120_v13, %v1124_v37  ;;  %4053 = vmatpush3.msra.mxu0 %v4970_v26  ;;  %4068 = vmatprep.mubr.msk.f32.mxu0 %vm4788_vm0, %v4787_v0  ;;  %v5454_v13 = vld [vmem:[%s6032_s3] sm:$0xff] }
 0xded   :  { %4035 = vmatmul.mubr.msk.f32.vlgmr.msra.gmra.mxu1 %vm278_vm6, %v1126_v22  ;;  %4054 = vmatprep.subr.mxu0 %v4787_v0  ;;  %v5458_v22 = vld [vmem:[#allocation5] ss:$0 sm:$0xff] }
 0xdee   :  { %4055 = vmatpush3.msra.mxu0 %v4975_v27  ;;  %4072 = vmatpush3.msra.mxu1 %v4898_v1 }
 0xdef   :  { %4056 = vmatprep.subr.mxu0 %v4787_v0  ;;  %4073 = vmatprep.subr.mxu1 %v4787_v0 }
 0xdf0   :  { %4057 = vmatpush3.msra.mxu0 %v4982_v28  ;;  %4074 = vmatpush3.msra.mxu1 %v4903_v2 }
 0xdf1   :  { %4058 = vmatprep.subr.mxu0 %v4787_v0  ;;  %4075 = vmatprep.subr.mxu1 %v4787_v0 }
 0xdf2   :  { %4059 = vmatpush3.msra.mxu0 %v4989_v29  ;;  %4076 = vmatpush3.msra.mxu1 %v4910_v3 }
 0xdf3   :  { %4060 = vmatprep.subr.mxu0 %v4787_v0  ;;  %4077 = vmatprep.subr.mxu1 %v4787_v0 }
 0xdf4   :  { %4061 = vmatpush3.msra.mxu0 %v4996_v30  ;;  %4078 = vmatpush3.msra.mxu1 %v4921_v7 }
 0xdf5   :  { %4062 = vmatprep.subr.mxu0 %v4787_v0  ;;  %4079 = vmatprep.subr.mxu1 %v4787_v0 }
 0xdf6   :  { %4063 = vmatpush3.msra.mxu0 %v5003_v32  ;;  %4080 = vmatpush3.msra.mxu1 %v4928_v8 }
 0xdf7   :  { %4064 = vmatprep.subr.mxu0 %v4787_v0  ;;  %4081 = vmatprep.subr.mxu1 %v4787_v0 }
 0xdf8   :  { %4065 = vmatpush3.msra.mxu0 %v5011_v33  ;;  %4082 = vmatpush3.msra.mxu1 %v4937_v10 }
 0xdf9   :  { %4083 = vmatprep.mubr.msk.f32.mxu1 %vm4788_vm0, %v4787_v0  ;;  %4066 = vmatprep.subr.mxu0 %v4787_v0 }
 0xdfa   :  { %4067 = vmatpush3.msra.mxu0 %v5020_v34  ;;  %4086 = vmatprep.subr.mxu1 %v4787_v0 }
 0xdfb   :  { %4105 = vmatprep.subr.mxu0 %v4787_v0 }
 0xeab   :  { %v1302_v1 = vpop.f32.mrf.mxu0 }
 0xeac   :  { %v1303_v2 = vadd.f32 %v4959_v12, %v1302_v1 }
 0xead   :  { %v1196_v3 = vpop.f32.mrf.mxu1  ;;  %v4051_v5 = vpop.f32.mrf.mxu0 }
 0xeae   :  { %4454 = vtanh.f32 %v1303_v2  ;;  %v1197_v7 = vadd.f32 %v5067_v44, %v1196_v3  ;;  %v3590_v27 = vmul.f32 -1.442695, %v1303_v2 }
 0xeaf   :  { %v4036_v8 = vpop.f32.mrf.mxu1 }
 0xeb0   :  { %4456 = vtanh.f32 %v1197_v7  ;;  %v3588_v28 = vmul.f32 -1.442695, %v1197_v7 }
 0xeb1   :  { %4458 = vpow2.f32 %v3590_v27 }
 0xeb2   :  { %4460 = vpow2.f32 %v3588_v28 }
 0xebb   :  { %v4455_v10 = vpop.eup %4454 }
 0xebc   :  { %1315 = vrot.lane.b32.xlu1 %v4455_v10, %s4789_s16 }
 0xebd   :  { %v4457_v26 = vpop.eup %4456 }
 0xebe   :  { %1209 = vrot.lane.b32.xlu0 %v4457_v26, %s4789_s16  ;;  %v4459_v29 = vpop.eup %4458 }
 0xebf   :  { %v4461_v30 = vpop.eup %4460  ;;  %v1309_v12 = vadd.f32 1.0, %v4459_v29 }
 0xec0   :  { %v1203_v32 = vadd.f32 1.0, %v4461_v30 }
 0xec1   :  { %4462 = vrcp.f32 %v1309_v12 }
 0xec2   :  { %4464 = vrcp.f32 %v1203_v32 }
 0xece   :  { %v4463_v33 = vpop.eup %4462 }
 0xecf   :  { %v4465_v38 = vpop.eup %4464  ;;  %v1313_v41 = vmul.f32 %v4463_v33, %v5264_v4 }
 0xed0   :  { %v1207_v45 = vmul.f32 %v4465_v38, %v5268_v14 }
 0xf2e   :  { %v1316_v34 = vpop.permute.xlu1 %1315 }
 0xf2f   :  { %v1318_v24 = vmul.f32 %v4463_v33, %v1316_v34 }
 0xf30   :  { %v1210_v39 = vpop.permute.xlu0 %1209 }
 0xf31   :  { %1320 = vrot.lane.b32.xlu1 %v1318_v24, %s4790_s0  ;;  %v1212_v40 = vmul.f32 %v4465_v38, %v1210_v39 }
 0xf33   :  { %1214 = vrot.lane.b32.xlu0 %v1212_v40, %s4790_s0 }
 0xfa3   :  { %v1321_v42 = vpop.permute.xlu1 %1320 }
 0xfa4   :  { %v5329_v43 = vadd.f32 %v1321_v42, %v1313_v41 }
 0xfa5   :  { %v1215_v46 = vpop.permute.xlu0 %1214 }
 0xfa6   :  { %4466 = vtanh.f32 %v5329_v43  ;;  %v5333_v47 = vadd.f32 %v1215_v46, %v1207_v45 }
 0xfa8   :  { %4468 = vtanh.f32 %v5333_v47 }
 0xfb3   :  { %v4467_v48 = vpop.eup %4466 }
 0xfb4   :  { %1326 = vrot.lane.b32.xlu1 %v4467_v48, %s4789_s16 }
 0xfb5   :  { %v4469_v49 = vpop.eup %4468 }
 0xfb6   :  { %1220 = vrot.lane.b32.xlu0 %v4469_v49, %s4789_s16 }
0x1026   :  { %v1327_v50 = vpop.permute.xlu1 %1326 }
0x1027   :  { %v1329_v51 = vmul.f32 %v4463_v33, %v1327_v50 }
0x1028   :  { %v1221_v53 = vpop.permute.xlu0 %1220 }
0x1029   :  { %v1439_v52 = vrot.slane %v1329_v51, 2  ;;  %1331 = vrot.lane.b32.xlu0 %v1329_v51, %s4790_s0  ;;  %v1223_v54 = vmul.f32 %v4465_v38, %v1221_v53 }
0x102b   :  { %1440 = vrot.lane.b32.xlu1 %v1439_v52, %s4791_s30  ;;  %v1870_v55 = vrot.slane %v1223_v54, 4  ;;  %v1885_v56 = vrot.slane %v1223_v54, 5 }
0x102d   :  { %v5342_v57 = vsel %vm1898_vm14, %v5277_v21, %v1870_v55  ;;  %v5346_v59 = vsel %vm1898_vm14, %v5281_v25, %v1885_v56  ;;  %v5411_v21 = vld [vmem:[%s6032_s3 + $0x18] sm:$0xff]  ;;  %v5417_v25 = vld [vmem:[%s6030_s1 + $0x10] sm:$0xff] }
0x102f   :  { %1335 = vrot.lane.b32.xlu1 %v1223_v54, %s4789_s16 }
0x109b   :  { %v1332_v14 = vpop.permute.xlu0 %1331 }
0x109d   :  { %v1441_v4 = vpop.permute.xlu1 %1440 }
0x109e   :  { %v1443_v11 = vsel %vm172_vm2, %v1437_v63, %v1441_v4 }
0x109f   :  { %v1445_v62 = vrot.slane %v1443_v11, 6 }
0x10a1   :  { %4084 = vmatmul.mubr.msk.f32.vlgmr.msra.gmra.mxu1 %vm174_vm3, %v1445_v62  ;;  %v1336_v15 = vpop.permute.xlu1 %1335 }
0x10a2   :  { %v1338_v16 = vsel %vm276_vm5, %v1332_v14, %v1336_v15  ;;  %4087 = vmatpush3.msra.mxu1 %v5359_v9  ;;  %4102 = vmatprep.mubr.msk.f32.mxu1 %vm4788_vm0, %v4787_v0 }
0x10a3   :  { %4069 = vmatmul.mubr.msk.f32.vlgmr.msra.gmra.mxu0 %vm278_vm6, %v1338_v16  ;;  %4088 = vmatprep.subr.mxu1 %v4787_v0 }
0x10a4   :  { %4089 = vmatpush3.msra.mxu1 %v5369_v58  ;;  %4106 = vmatpush3.msra.mxu0 %v5375_v17 }
0x10a5   :  { %4090 = vmatprep.subr.mxu1 %v4787_v0  ;;  %4107 = vmatprep.subr.mxu0 %v4787_v0 }
0x10a6   :  { %4091 = vmatpush3.msra.mxu1 %v5383_v18  ;;  %4108 = vmatpush3.msra.mxu0 %v5389_v61 }
0x10a7   :  { %4092 = vmatprep.subr.mxu1 %v4787_v0  ;;  %4109 = vmatprep.subr.mxu0 %v4787_v0 }
0x10a8   :  { %4093 = vmatpush3.msra.mxu1 %v5397_v19  ;;  %4110 = vmatpush3.msra.mxu0 %v5403_v20 }
0x10a9   :  { %4094 = vmatprep.subr.mxu1 %v4787_v0  ;;  %4111 = vmatprep.subr.mxu0 %v4787_v0 }
0x10aa   :  { %4095 = vmatpush3.msra.mxu1 %v5411_v21  ;;  %4112 = vmatpush3.msra.mxu0 %v5417_v25 }
0x10ab   :  { %4096 = vmatprep.subr.mxu1 %v4787_v0  ;;  %4113 = vmatprep.subr.mxu0 %v4787_v0 }
0x10ac   :  { %4097 = vmatpush3.msra.mxu1 %v5425_v31  ;;  %4114 = vmatpush3.msra.mxu0 %v5431_v35 }
0x10ad   :  { %4098 = vmatprep.subr.mxu1 %v4787_v0  ;;  %4115 = vmatprep.subr.mxu0 %v4787_v0 }
0x10ae   :  { %4099 = vmatpush3.msra.mxu1 %v5439_v36  ;;  %4116 = vmatpush3.msra.mxu0 %v5445_v23 }
0x10af   :  { %4100 = vmatprep.subr.mxu1 %v4787_v0  ;;  %4117 = vmatprep.mubr.msk.f32.mxu0 %vm4788_vm0, %v4787_v0 }
0x10b0   :  { %4101 = vmatpush3.msra.mxu1 %v5454_v13  ;;  %4120 = vmatprep.subr.mxu0 %v4787_v0 }
0x1161   :  { %v1514_v37 = vpop.f32.mrf.mxu1 }
0x1162   :  { %v1515_v1 = vadd.f32 %v5458_v22, %v1514_v37 }
0x1163   :  { %v1408_v2 = vpop.f32.mrf.mxu0  ;;  %v4085_v3 = vpop.f32.mrf.mxu1 }
0x1164   :  { %4470 = vtanh.f32 %v1515_v1  ;;  %v1409_v5 = vadd.f32 %v5067_v44, %v1408_v2  ;;  %v3594_v26 = vmul.f32 -1.442695, %v1515_v1  ;;  %v5516_v1 = vld [vmem:[%s6033_s4] ss:$0 sm:$0xff] }
0x1165   :  { %v4070_v7 = vpop.f32.mrf.mxu0 }
0x1166   :  { %4472 = vtanh.f32 %v1409_v5  ;;  %v3592_v27 = vmul.f32 -1.442695, %v1409_v5 }
0x1167   :  { %4474 = vpow2.f32 %v3594_v26 }
0x1168   :  { %4476 = vpow2.f32 %v3592_v27 }
0x1171   :  { %v4471_v8 = vpop.eup %4470 }
0x1172   :  { %1527 = vrot.lane.b32.xlu0 %v4471_v8, %s4789_s16 }
0x1173   :  { %v4473_v10 = vpop.eup %4472 }
0x1174   :  { %1421 = vrot.lane.b32.xlu1 %v4473_v10, %s4789_s16  ;;  %v4475_v28 = vpop.eup %4474 }
0x1175   :  { %v4477_v29 = vpop.eup %4476  ;;  %v1521_v30 = vadd.f32 1.0, %v4475_v28 }
0x1176   :  { %v1415_v12 = vadd.f32 1.0, %v4477_v29 }
0x1177   :  { %4478 = vrcp.f32 %v1521_v30 }
0x1178   :  { %4480 = vrcp.f32 %v1415_v12 }
0x1184   :  { %v4479_v32 = vpop.eup %4478 }
0x1185   :  { %v4481_v34 = vpop.eup %4480  ;;  %v1525_v39 = vmul.f32 %v4479_v32, %v5329_v43 }
0x1186   :  { %v1419_v42 = vmul.f32 %v4481_v34, %v5333_v47 }
0x11e4   :  { %v1528_v44 = vpop.permute.xlu0 %1527 }
0x11e5   :  { %v1530_v33 = vmul.f32 %v4479_v32, %v1528_v44 }
0x11e6   :  { %v1422_v24 = vpop.permute.xlu1 %1421 }
0x11e7   :  { %1532 = vrot.lane.b32.xlu0 %v1530_v33, %s4790_s0  ;;  %v1424_v38 = vmul.f32 %v4481_v34, %v1422_v24 }
0x11e9   :  { %1426 = vrot.lane.b32.xlu1 %v1424_v38, %s4790_s0 }
0x1259   :  { %v1533_v40 = vpop.permute.xlu0 %1532 }
0x125a   :  { %v5467_v41 = vadd.f32 %v1533_v40, %v1525_v39 }
0x125b   :  { %v1427_v45 = vpop.permute.xlu1 %1426 }
0x125c   :  { %4482 = vtanh.f32 %v5467_v41  ;;  %v5471_v46 = vadd.f32 %v1427_v45, %v1419_v42 }
0x125e   :  { %4484 = vtanh.f32 %v5471_v46 }
0x1269   :  { %v4483_v48 = vpop.eup %4482 }
0x126a   :  { %1538 = vrot.lane.b32.xlu0 %v4483_v48, %s4789_s16 }
0x126b   :  { %v4485_v49 = vpop.eup %4484 }
0x126c   :  { %1432 = vrot.lane.b32.xlu1 %v4485_v49, %s4789_s16 }
0x12dc   :  { %v1539_v50 = vpop.permute.xlu0 %1538 }
0x12dd   :  { %v1541_v43 = vmul.f32 %v4479_v32, %v1539_v50 }
0x12de   :  { %v1433_v52 = vpop.permute.xlu1 %1432 }
0x12df   :  { %v1650_v51 = vrot.slane %v1541_v43, 1  ;;  %1543 = vrot.lane.b32.xlu1 %v1541_v43, %s4790_s0  ;;  %v1435_v47 = vmul.f32 %v4481_v34, %v1433_v52 }
0x12e1   :  { %1651 = vrot.lane.b32.xlu0 %v1650_v51, %s4791_s30  ;;  %v1872_v53 = vrot.slane %v1435_v47, 3  ;;  %v1887_v54 = vrot.slane %v1435_v47, 4 }
0x12e3   :  { %v5480_v55 = vsel %vm1900_vm1, %v5346_v59, %v1887_v54  ;;  %v5484_v56 = vsel %vm1900_vm1, %v5342_v57, %v1872_v53 }
0x12e5   :  { %1547 = vrot.lane.b32.xlu0 %v1435_v47, %s4789_s16 }
0x1351   :  { %v1544_v15 = vpop.permute.xlu1 %1543 }
0x1353   :  { %v1652_v63 = vpop.permute.xlu0 %1651 }
0x1354   :  { %v1654_v4 = vsel %vm172_vm2, %v5349_v60, %v1652_v63  ;;  %v1655_v11 = vsel %vm172_vm2, %v4915_v6, %v1652_v63 }
0x1355   :  { %v1659_v62 = vrot.slane %v1654_v4, 7  ;;  %v1660_v14 = vrot.slane %v1655_v11, 7 }
0x1357   :  { %v1548_v16 = vpop.permute.xlu0 %1547  ;;  %v1661_v59 = vsel %vm1658_vm9, %v1659_v62, %v1660_v14 }
0x1358   :  { %v1550_v37 = vsel %vm276_vm5, %v1544_v15, %v1548_v16  ;;  %4118 = vmatmul.mubr.msk.f32.vlgmr.msra.gmra.mxu0 %vm174_vm3, %v1661_v59 }
0x1359   :  { %4103 = vmatmul.mubr.msk.f32.vlgmr.msra.gmra.mxu1 %vm278_vm6, %v1550_v37  ;;  %4121 = vmatpush3.msra.mxu0 %v5359_v9 }
0x135a   :  { %4122 = vmatprep.subr.mxu0 %v4787_v0  ;;  %4136 = vmatprep.mubr.msk.f32.mxu0 %vm4788_vm0, %v4787_v0 }
0x135b   :  { %4123 = vmatpush3.msra.mxu0 %v5369_v58 }
0x135c   :  { %4124 = vmatprep.subr.mxu0 %v4787_v0 }
0x135d   :  { %4125 = vmatpush3.msra.mxu0 %v5383_v18 }
0x135e   :  { %4126 = vmatprep.subr.mxu0 %v4787_v0 }
0x135f   :  { %4127 = vmatpush3.msra.mxu0 %v5397_v19 }
0x1360   :  { %4128 = vmatprep.subr.mxu0 %v4787_v0 }
0x1361   :  { %4129 = vmatpush3.msra.mxu0 %v5411_v21 }
0x1362   :  { %4130 = vmatprep.subr.mxu0 %v4787_v0 }
0x1363   :  { %4131 = vmatpush3.msra.mxu0 %v5425_v31 }
0x1364   :  { %4132 = vmatprep.subr.mxu0 %v4787_v0 }
0x1365   :  { %4133 = vmatpush3.msra.mxu0 %v5439_v36 }
0x1366   :  { %4134 = vmatprep.subr.mxu0 %v4787_v0 }
0x1367   :  { %4135 = vmatpush3.msra.mxu0 %v5454_v13 }
0x1418   :  { %v1730_v6 = vpop.f32.mrf.mxu0 }
0x1419   :  { %v1731_v57 = vadd.f32 %v5458_v22, %v1730_v6  ;;  %v1620_v60 = vpop.f32.mrf.mxu1 }
0x141a   :  { %v1621_v2 = vadd.f32 %v5516_v1, %v1620_v60  ;;  %v4119_v3 = vpop.f32.mrf.mxu0 }
0x141b   :  { %4486 = vtanh.f32 %v1731_v57  ;;  %v4104_v5 = vpop.f32.mrf.mxu1  ;;  %v3598_v10 = vmul.f32 -1.442695, %v1731_v57 }
0x141c   :  { %4488 = vtanh.f32 %v1621_v2  ;;  %v3596_v26 = vmul.f32 -1.442695, %v1621_v2  ;;  %v5547_v5 = vld [vmem:[%s6034_s5 + $0x18] sm:$0xff] }
0x141d   :  { %4490 = vpow2.f32 %v3598_v10  ;;  %4139 = vmatprep.subr.mxu1 %v5547_v5  ;;  %v5560_v10 = vld [vmem:[%s6034_s5 + $0x8] sm:$0xff] }
0x141e   :  { %4492 = vpow2.f32 %v3596_v26  ;;  %4140 = vmatpush3.msra.mxu1 %v5547_v5  ;;  %v5567_v26 = vld [vmem:[%s6034_s5] sm:$0xff] }
0x1428   :  { %v4487_v7 = vpop.eup %4486 }
0x1429   :  { %v4489_v8 = vpop.eup %4488  ;;  %1743 = vrot.lane.b32.xlu0 %v4487_v7, %s4789_s16  ;;  %v5552_v7 = vld [vmem:[%s6034_s5 + $0x10] sm:$0xff] }
0x142a   :  { %1633 = vrot.lane.b32.xlu1 %v4489_v8, %s4789_s16  ;;  %v4491_v27 = vpop.eup %4490  ;;  %4141 = vmatprep.subr.mxu1 %v5552_v7 }
0x142b   :  { %v4493_v28 = vpop.eup %4492  ;;  %v1737_v29 = vadd.f32 1.0, %v4491_v27  ;;  %4142 = vmatpush3.msra.mxu1 %v5552_v7  ;;  %v5576_v27 = vld [vmem:[%s6036_s7 + $0x18] sm:$0xff] }
0x142c   :  { %v1627_v30 = vadd.f32 1.0, %v4493_v28  ;;  %4143 = vmatprep.subr.mxu1 %v5560_v10 }
0x142d   :  { %4494 = vrcp.f32 %v1737_v29  ;;  %4144 = vmatpush3.msra.mxu1 %v5560_v10 }
0x142e   :  { %4496 = vrcp.f32 %v1627_v30  ;;  %4145 = vmatprep.subr.mxu1 %v5567_v26 }
0x142f   :  { %4146 = vmatpush3.msra.mxu1 %v5567_v26 }
0x1430   :  { %4150 = vmatprep.subr.mxu1 %v5576_v27 }
0x143a   :  { %v4495_v12 = vpop.eup %4494 }
0x143b   :  { %v4497_v44 = vpop.eup %4496  ;;  %v1741_v38 = vmul.f32 %v4495_v12, %v5467_v41 }
0x143c   :  { %v1631_v40 = vmul.f32 %v4497_v44, %v5471_v46 }
0x149b   :  { %v1744_v32 = vpop.permute.xlu0 %1743 }
0x149c   :  { %v1746_v33 = vmul.f32 %v4495_v12, %v1744_v32  ;;  %v1634_v34 = vpop.permute.xlu1 %1633 }
0x149d   :  { %v1636_v24 = vmul.f32 %v4497_v44, %v1634_v34 }
0x149e   :  { %1748 = vrot.lane.b32.xlu0 %v1746_v33, %s4790_s0 }
0x149f   :  { %1638 = vrot.lane.b32.xlu1 %v1636_v24, %s4790_s0 }
0x1510   :  { %v1749_v39 = vpop.permute.xlu0 %1748 }
0x1511   :  { %v5525_v42 = vadd.f32 %v1749_v39, %v1741_v38  ;;  %v1639_v45 = vpop.permute.xlu1 %1638 }
0x1512   :  { %v1641_v48 = vadd.f32 %v1639_v45, %v1631_v40  ;;  %v5592_v40 = vld [vmem:[%s6036_s7 + $0x10] sm:$0xff]  ;;  %v5600_v45 = vld [vmem:[%s6036_s7 + $0x8] sm:$0xff] }
0x1513   :  { %4498 = vtanh.f32 %v5525_v42 }
0x1514   :  { %4500 = vtanh.f32 %v1641_v48 }
0x1520   :  { %v4499_v49 = vpop.eup %4498 }
0x1521   :  { %v4501_v50 = vpop.eup %4500  ;;  %1754 = vrot.lane.b32.xlu0 %v4499_v49, %s4789_s16  ;;  %v5629_v49 = vld [vmem:[#allocation10 + $0x8] sm:$0xff] }
0x1522   :  { %1644 = vrot.lane.b32.xlu1 %v4501_v50, %s4789_s16  ;;  %4161 = vmatprep.subr.mxu0 %v5629_v49  ;;  %v5633_v50 = vld [vmem:[#allocation10] sm:$0xff] }
0x1593   :  { %v1755_v43 = vpop.permute.xlu0 %1754 }
0x1594   :  { %v1757_v51 = vmul.f32 %v4495_v12, %v1755_v43  ;;  %v1645_v52 = vpop.permute.xlu1 %1644  ;;  %v5638_v43 = vld [vmem:[#allocation7] ss:$0 sm:$0xff] }
0x1595   :  { %v1647_v41 = vmul.f32 %v4497_v44, %v1645_v52 }
0x1596   :  { %1759 = vrot.lane.b32.xlu1 %v1757_v51, %s4790_s0  ;;  %v2180_v24 = vrot.slane %v1757_v51, 1 }
0x1597   :  { %v1874_v46 = vrot.slane %v1647_v41, 2  ;;  %v1889_v47 = vrot.slane %v1647_v41, 3  ;;  %1763 = vrot.lane.b32.xlu0 %v1647_v41, %s4789_s16 }
0x1599   :  { %v1911_v53 = vsel %vm1902_vm4, %v5480_v55, %v1889_v47  ;;  %v1903_v54 = vsel %vm1902_vm4, %v5484_v56, %v1874_v46 }
0x1608   :  { %v1760_v63 = vpop.permute.xlu1 %1759 }
0x1609   :  { %v1764_v4 = vpop.permute.xlu0 %1763 }
0x160a   :  { %v1766_v11 = vsel %vm276_vm5, %v1760_v63, %v1764_v4 }
0x160b   :  { %4137 = vmatmul.mubr.msk.f32.vlgmr.msra.gmra.mxu0 %vm278_vm6, %v1766_v11 }
0x160c   :  { %4162 = vmatpush3.msra.mxu0 %v5629_v49 }
0x160d   :  { %4163 = vmatprep.subr.mxu0 %v5633_v50 }
0x160e   :  { %4164 = vmatpush3.msra.mxu0 %v5633_v50 }
0x160f   :  { %4183 = vmatprep.subr.mxu0 %v4787_v0 }
0x16cb   :  { %v1836_v62 = vpop.f32.mrf.mxu0 }
0x16cc   :  { %v1837_v14 = vadd.f32 %v5516_v1, %v1836_v62  ;;  %v5646_v62 = vld [vmem:[#allocation8] ss:$0 sm:$0xff] }
0x16cd   :  { %v4138_v15 = vpop.f32.mrf.mxu0 }
0x16ce   :  { %4502 = vtanh.f32 %v1837_v14  ;;  %v3600_v59 = vmul.f32 -1.442695, %v1837_v14 }
0x16d0   :  { %4504 = vpow2.f32 %v3600_v59 }
0x16db   :  { %v4503_v16 = vpop.eup %4502 }
0x16dc   :  { %1849 = vrot.lane.b32.xlu1 %v4503_v16, %s4789_s16 }
0x16dd   :  { %v4505_v55 = vpop.eup %4504 }
0x16de   :  { %v1843_v37 = vadd.f32 1.0, %v4505_v55 }
0x16e0   :  { %4506 = vrcp.f32 %v1843_v37 }
0x16ed   :  { %v4507_v56 = vpop.eup %4506 }
0x16ee   :  { %v1847_v60 = vmul.f32 %v4507_v56, %v1641_v48  ;;  %v5607_v48 = vld [vmem:[%s6036_s7] sm:$0xff] }
0x174e   :  { %v1850_v6 = vpop.permute.xlu1 %1849 }
0x174f   :  { %v1852_v57 = vmul.f32 %v4507_v56, %v1850_v6 }
0x1751   :  { %1854 = vrot.lane.b32.xlu0 %v1852_v57, %s4790_s0 }
0x17c3   :  { %v1855_v2 = vpop.permute.xlu0 %1854 }
0x17c4   :  { %v5541_v3 = vadd.f32 %v1855_v2, %v1847_v60  ;;  %v5683_v2 = vld [vmem:[#allocation11] ss:$0 sm:$0xff] }
0x17c6   :  { %4508 = vtanh.f32 %v5541_v3 }
0x17d3   :  { %v4509_v8 = vpop.eup %4508 }
0x17d4   :  { %1860 = vrot.lane.b32.xlu1 %v4509_v8, %s4789_s16 }
0x1846   :  { %v1861_v28 = vpop.permute.xlu1 %1860 }
0x1847   :  { %v5579_v29 = vmul.f32 %v4507_v56, %v1861_v28 }
0x1849   :  { %v1877_v30 = vrot.slane %v5579_v29, 1  ;;  %v1891_v12 = vrot.slane %v5579_v29, 2 }
0x184b   :  { %v1912_v32 = vsel %vm1904_vm7, %v1911_v53, %v1891_v12  ;;  %v1905_v44 = vsel %vm1904_vm7, %v1903_v54, %v1877_v30 }
0x184c   :  { %v1914_v33 = vmax.f32 %v1912_v32, 0.0  ;;  %v1913_v34 = vmax.f32 %v1905_v44, 0.0 }
0x184e   :  { %1919 = vrot.lane.b32.xlu1 %v1914_v33, %s4790_s0  ;;  %1917 = vrot.lane.b32.xlu0 %v1913_v34, %s4790_s0 }
0x1852   :  { %2181 = vrot.lane.b32.xlu0 %v2180_v24, %s4791_s30 }
0x18c0   :  { %v1920_v38 = vpop.permute.xlu1 %1919  ;;  %v1918_v39 = vpop.permute.xlu0 %1917 }
0x18c1   :  { %4147 = vmatprep.mubr.msk.f32.mxu1 %vm276_vm5, %v1918_v39 }
0x18c2   :  { %4148 = vmatmul.mubr.msk.f32.vlgmr.msra.gmra.mxu1 %vm276_vm5, %v1920_v38 }
0x18c3   :  { %4151 = vmatpush3.msra.mxu1 %v5576_v27  ;;  %4158 = vmatprep.mubr.msk.f32.mxu1 %vm276_vm5, %v1918_v39 }
0x18c4   :  { %4152 = vmatprep.subr.mxu1 %v5592_v40  ;;  %v2182_v53 = vpop.permute.xlu0 %2181 }
0x18c5   :  { %4153 = vmatpush3.msra.mxu1 %v5592_v40 }
0x18c6   :  { %4154 = vmatprep.subr.mxu1 %v5600_v45 }
0x18c7   :  { %4155 = vmatpush3.msra.mxu1 %v5600_v45 }
0x18c8   :  { %4156 = vmatprep.subr.mxu1 %v5607_v48 }
0x18c9   :  { %4157 = vmatpush3.msra.mxu1 %v5607_v48 }
0x18ca   :  { %4159 = vmatmul.mubr.msk.f32.vlgmr.msra.gmra.mxu1 %vm276_vm5, %v1920_v38  ;;  %4168 = vmatprep.subr.mxu1 %v4787_v0 }
0x18cb   :  { %4169 = vmatpush3.msra.mxu1 %v5375_v17  ;;  %4180 = vmatprep.mubr.msk.f32.mxu1 %vm4788_vm0, %v4787_v0 }
0x18cc   :  { %4170 = vmatprep.subr.mxu1 %v4787_v0 }
0x18cd   :  { %4171 = vmatpush3.msra.mxu1 %v5389_v61 }
0x18ce   :  { %4172 = vmatprep.subr.mxu1 %v4787_v0 }
0x18cf   :  { %4173 = vmatpush3.msra.mxu1 %v5403_v20 }
0x18d0   :  { %4174 = vmatprep.subr.mxu1 %v4787_v0 }
0x18d1   :  { %4175 = vmatpush3.msra.mxu1 %v5417_v25 }
0x18d2   :  { %4176 = vmatprep.subr.mxu1 %v4787_v0 }
0x18d3   :  { %4177 = vmatpush3.msra.mxu1 %v5431_v35 }
0x18d4   :  { %4178 = vmatprep.subr.mxu1 %v4787_v0 }
0x18d5   :  { %4179 = vmatpush3.msra.mxu1 %v5445_v23 }
0x18d6   :  { %4202 = vmatprep.subr.mxu1 %v4787_v0 }
0x1982   :  { %v4149_v51 = vpop.f32.mrf.mxu1 }
0x1983   :  { %v1997_v52 = vadd.f32 %v4149_v51, %v5638_v43 }
0x1984   :  { %v1991_v41 = vpop.f32.mrf.mxu1 }
0x1985   :  { %v2177_v46 = vrot.slane %v1997_v52, 7  ;;  %2171 = vst.msk [vmem:[#allocation13 + $0x8] sm:$0xff] %vm172_vm2, %v1997_v52  ;;  %v1992_v47 = vadd.f32 %v5638_v43, %v1991_v41 }
0x1987   :  { %v2185_v54 = vsel %vm172_vm2, %v2177_v46, %v2182_v53  ;;  %v2184_v63 = vsel %vm172_vm2, %v1992_v47, %v2182_v53  ;;  %2170 = vst.msk [vmem:[#allocation13] sm:$0xff] %vm172_vm2, %v1992_v47 }
0x1988   :  { %v2189_v4 = vrot.slane %v2185_v54, 7  ;;  %v2188_v11 = vrot.slane %v2184_v63, 7 }
0x198a   :  { %v4160_v14 = vpop.f32.mrf.mxu1  ;;  %v2190_v15 = vsel %vm1658_vm9, %v2188_v11, %v2189_v4 }
0x198b   :  { %4181 = vmatmul.mubr.msk.f32.vlgmr.msra.gmra.mxu1 %vm174_vm3, %v2190_v15  ;;  %v2078_v16 = vadd.f32 %v4160_v14, %v5646_v62 }
0x198c   :  { %v2072_v59 = vpop.f32.mrf.mxu1  ;;  %4203 = vmatpush3.msra.mxu1 %v5547_v5  ;;  %4210 = vmatprep.mubr.msk.f32.mxu1 %vm4788_vm0, %v4787_v0 }
0x198d   :  { %v2073_v55 = vadd.f32 %v5646_v62, %v2072_v59  ;;  %4204 = vmatprep.subr.mxu1 %v4787_v0  ;;  %v2082_v56 = vmax.f32 %v2078_v16, 0.0 }
0x198e   :  { %4205 = vmatpush3.msra.mxu1 %v5552_v7 }
0x198f   :  { %v2081_v37 = vmax.f32 %v2073_v55, 0.0  ;;  %4206 = vmatprep.subr.mxu1 %v4787_v0 }
0x1990   :  { %4207 = vmatpush3.msra.mxu1 %v5560_v10 }
0x1991   :  { %4165 = vmatprep.mubr.msk.f32.mxu0 %vm172_vm2, %v2081_v37  ;;  %4208 = vmatprep.subr.mxu1 %v4787_v0 }
0x1992   :  { %4166 = vmatmul.mubr.msk.f32.vlgmr.msra.gmra.mxu0 %vm172_vm2, %v2082_v56  ;;  %4209 = vmatpush3.msra.mxu1 %v5567_v26 }
0x1993   :  { %4184 = vmatpush3.msra.mxu0 %v5359_v9  ;;  %4199 = vmatprep.mubr.msk.f32.mxu0 %vm4788_vm0, %v4787_v0 }
0x1994   :  { %4185 = vmatprep.subr.mxu0 %v4787_v0  ;;  %4228 = vmatprep.subr.mxu1 %v4787_v0 }
0x1995   :  { %4186 = vmatpush3.msra.mxu0 %v5369_v58 }
0x1996   :  { %4187 = vmatprep.subr.mxu0 %v4787_v0 }
0x1997   :  { %4188 = vmatpush3.msra.mxu0 %v5383_v18 }
0x1998   :  { %4189 = vmatprep.subr.mxu0 %v4787_v0 }
0x1999   :  { %4190 = vmatpush3.msra.mxu0 %v5397_v19 }
0x199a   :  { %4191 = vmatprep.subr.mxu0 %v4787_v0 }
0x199b   :  { %4192 = vmatpush3.msra.mxu0 %v5411_v21 }
0x199c   :  { %4193 = vmatprep.subr.mxu0 %v4787_v0 }
0x199d   :  { %4194 = vmatpush3.msra.mxu0 %v5425_v31 }
0x199e   :  { %4195 = vmatprep.subr.mxu0 %v4787_v0 }
0x199f   :  { %4196 = vmatpush3.msra.mxu0 %v5439_v36 }
0x19a0   :  { %4197 = vmatprep.subr.mxu0 %v4787_v0 }
0x19a1   :  { %4198 = vmatpush3.msra.mxu0 %v5454_v13 }
0x19a2   :  { %4213 = vmatprep.subr.mxu0 %v4787_v0 }
0x1a4b   :  { %v2259_v6 = vpop.f32.mrf.mxu1 }
0x1a4c   :  { %v2260_v57 = vadd.f32 %v5458_v22, %v2259_v6 }
0x1a4d   :  { %v4182_v60 = vpop.f32.mrf.mxu1 }
0x1a4e   :  { %4510 = vtanh.f32 %v2260_v57  ;;  %v3610_v44 = vmul.f32 -1.442695, %v2260_v57 }
0x1a50   :  { %4512 = vpow2.f32 %v3610_v44 }
0x1a52   :  { %v4167_v8 = vpop.f32.mrf.mxu0 }
0x1a53   :  { %v2167_v28 = vadd.f32 %v4167_v8, %v5683_v2 }
0x1a54   :  { %v2161_v30 = vpop.f32.mrf.mxu0 }
0x1a55   :  { %2174 = vst.msk [vmem:[%s6042_s13 + $0x10] sm:$0xff] %vm2172_vm8, %v2167_v28  ;;  %v2162_v12 = vadd.f32 %v5683_v2, %v2161_v30 }
0x1a57   :  { %2173 = vst.msk [vmem:[%s6042_s13] sm:$0xff] %vm2172_vm8, %v2162_v12 }
0x1a5b   :  { %v4511_v32 = vpop.eup %4510 }
0x1a5c   :  { %2272 = vrot.lane.b32.xlu1 %v4511_v32, %s4789_s16 }
0x1a5d   :  { %v4513_v33 = vpop.eup %4512 }
0x1a5e   :  { %v2266_v34 = vadd.f32 1.0, %v4513_v33 }
0x1a60   :  { %4514 = vrcp.f32 %v2266_v34 }
0x1a6d   :  { %v4515_v24 = vpop.eup %4514 }
0x1a6e   :  { %v2270_v51 = vmul.f32 %v4515_v24, %v5525_v42 }
0x1ace   :  { %v2273_v38 = vpop.permute.xlu1 %2272 }
0x1acf   :  { %v2275_v39 = vmul.f32 %v4515_v24, %v2273_v38 }
0x1ad1   :  { %2277 = vrot.lane.b32.xlu0 %v2275_v39, %s4790_s0 }
0x1b43   :  { %v2278_v52 = vpop.permute.xlu0 %2277 }
0x1b44   :  { %v5696_v41 = vadd.f32 %v2278_v52, %v2270_v51 }
0x1b46   :  { %4516 = vtanh.f32 %v5696_v41 }
0x1b53   :  { %v4517_v46 = vpop.eup %4516 }
0x1b54   :  { %2283 = vrot.lane.b32.xlu1 %v4517_v46, %s4789_s16 }
0x1b58   :  { %2291 = vrot.lane.b32.xlu1 %v5579_v29, %s4789_s16 }
0x1bc6   :  { %v2284_v47 = vpop.permute.xlu1 %2283 }
0x1bc7   :  { %v2286_v53 = vmul.f32 %v4515_v24, %v2284_v47 }
0x1bc9   :  { %2288 = vrot.lane.b32.xlu0 %v2286_v53, %s4790_s0 }
0x1bca   :  { %v2292_v54 = vpop.permute.xlu1 %2291 }
0x1c3b   :  { %v2289_v63 = vpop.permute.xlu0 %2288 }
0x1c3c   :  { %v2294_v4 = vsel %vm276_vm5, %v2289_v63, %v2292_v54 }
0x1c3d   :  { %4200 = vmatmul.mubr.msk.f32.vlgmr.msra.gmra.mxu0 %vm278_vm6, %v2294_v4 }
0x1c3e   :  { %4214 = vmatpush3.msra.mxu0 %v5375_v17  ;;  %4225 = vmatprep.mubr.msk.f32.mxu0 %vm4788_vm0, %v4787_v0 }
0x1c3f   :  { %4215 = vmatprep.subr.mxu0 %v4787_v0 }
0x1c40   :  { %4216 = vmatpush3.msra.mxu0 %v5389_v61 }
0x1c41   :  { %4217 = vmatprep.subr.mxu0 %v4787_v0 }
0x1c42   :  { %4218 = vmatpush3.msra.mxu0 %v5403_v20 }
0x1c43   :  { %4219 = vmatprep.subr.mxu0 %v4787_v0 }
0x1c44   :  { %4220 = vmatpush3.msra.mxu0 %v5417_v25 }
0x1c45   :  { %4221 = vmatprep.subr.mxu0 %v4787_v0 }
0x1c46   :  { %4222 = vmatpush3.msra.mxu0 %v5431_v35 }
0x1c47   :  { %4223 = vmatprep.subr.mxu0 %v4787_v0 }
0x1c48   :  { %4224 = vmatpush3.msra.mxu0 %v5445_v23 }
0x1c49   :  { %4247 = vmatprep.subr.mxu0 %v4787_v0 }
0x1cfd   :  { %v2364_v42 = vpop.f32.mrf.mxu0 }
0x1cfe   :  { %v2365_v29 = vadd.f32 %v5516_v1, %v2364_v42 }
0x1cff   :  { %v4201_v11 = vpop.f32.mrf.mxu0 }
0x1d00   :  { %4518 = vtanh.f32 %v2365_v29  ;;  %v3612_v15 = vmul.f32 -1.442695, %v2365_v29 }
0x1d02   :  { %4520 = vpow2.f32 %v3612_v15 }
0x1d0d   :  { %v4519_v14 = vpop.eup %4518 }
0x1d0e   :  { %2377 = vrot.lane.b32.xlu0 %v4519_v14, %s4789_s16 }
0x1d0f   :  { %v4521_v16 = vpop.eup %4520 }
0x1d10   :  { %v2371_v59 = vadd.f32 1.0, %v4521_v16 }
0x1d12   :  { %4522 = vrcp.f32 %v2371_v59 }
0x1d1f   :  { %v4523_v55 = vpop.eup %4522 }
0x1d20   :  { %v2375_v6 = vmul.f32 %v4523_v55, %v5541_v3 }
0x1d80   :  { %v2378_v37 = vpop.permute.xlu0 %2377 }
0x1d81   :  { %v2380_v56 = vmul.f32 %v4523_v55, %v2378_v37 }
0x1d83   :  { %2382 = vrot.lane.b32.xlu1 %v2380_v56, %s4790_s0 }
0x1df5   :  { %v2383_v57 = vpop.permute.xlu1 %2382 }
0x1df6   :  { %v5723_v60 = vadd.f32 %v2383_v57, %v2375_v6 }
0x1df8   :  { %4524 = vtanh.f32 %v5723_v60 }
0x1e05   :  { %v4525_v8 = vpop.eup %4524 }
0x1e06   :  { %2388 = vrot.lane.b32.xlu0 %v4525_v8, %s4789_s16 }
0x1e0a   :  { %2468 = vrot.lane.b32.xlu0 %v2286_v53, %s4791_s30 }
0x1e78   :  { %v2389_v28 = vpop.permute.xlu0 %2388 }
0x1e79   :  { %v5728_v30 = vmul.f32 %v4523_v55, %v2389_v28 }
0x1e7b   :  { %v2392_v12 = vmax.f32 %v5728_v30, 0.0 }
0x1e7c   :  { %v2469_v33 = vpop.permute.xlu0 %2468 }
0x1e7d   :  { %2394 = vrot.lane.b32.xlu1 %v2392_v12, %s4790_s0 }
0x1eef   :  { %v2395_v32 = vpop.permute.xlu1 %2394 }
0x1ef0   :  { %4211 = vmatmul.mubr.msk.f32.vlgmr.msra.gmra.mxu1 %vm276_vm5, %v2395_v32 }
0x1ef1   :  { %4229 = vmatpush3.msra.mxu1 %v5359_v9  ;;  %4244 = vmatprep.mubr.msk.f32.mxu1 %vm4788_vm0, %v4787_v0 }
0x1ef2   :  { %4230 = vmatprep.subr.mxu1 %v4787_v0 }
0x1ef3   :  { %4231 = vmatpush3.msra.mxu1 %v5369_v58 }
0x1ef4   :  { %4232 = vmatprep.subr.mxu1 %v4787_v0 }
0x1ef5   :  { %4233 = vmatpush3.msra.mxu1 %v5383_v18 }
0x1ef6   :  { %4234 = vmatprep.subr.mxu1 %v4787_v0 }
0x1ef7   :  { %4235 = vmatpush3.msra.mxu1 %v5397_v19 }
0x1ef8   :  { %4236 = vmatprep.subr.mxu1 %v4787_v0 }
0x1ef9   :  { %4237 = vmatpush3.msra.mxu1 %v5411_v21 }
0x1efa   :  { %4238 = vmatprep.subr.mxu1 %v4787_v0 }
0x1efb   :  { %4239 = vmatpush3.msra.mxu1 %v5425_v31 }
0x1efc   :  { %4240 = vmatprep.subr.mxu1 %v4787_v0 }
0x1efd   :  { %4241 = vmatpush3.msra.mxu1 %v5439_v36 }
0x1efe   :  { %4242 = vmatprep.subr.mxu1 %v4787_v0 }
0x1eff   :  { %4243 = vmatpush3.msra.mxu1 %v5454_v13 }
0x1f00   :  { %4258 = vmatprep.subr.mxu1 %v4787_v0 }
0x1fb0   :  { %v2464_v3 = vpop.f32.mrf.mxu1 }
0x1fb1   :  { %v5752_v44 = vadd.f32 %v5638_v43, %v2464_v3 }
0x1fb2   :  { %v4212_v34 = vpop.f32.mrf.mxu1 }
0x1fb3   :  { %v2471_v24 = vsel %vm172_vm2, %v5752_v44, %v2469_v33 }
0x1fb4   :  { %4226 = vmatmul.mubr.msk.f32.vlgmr.msra.gmra.mxu0 %vm174_vm3, %v2471_v24 }
0x1fb5   :  { %4248 = vmatpush3.msra.mxu0 %v5547_v5  ;;  %4255 = vmatprep.mubr.msk.f32.mxu0 %vm4788_vm0, %v4787_v0 }
0x1fb6   :  { %4249 = vmatprep.subr.mxu0 %v4787_v0 }
0x1fb7   :  { %4250 = vmatpush3.msra.mxu0 %v5552_v7 }
0x1fb8   :  { %4251 = vmatprep.subr.mxu0 %v4787_v0 }
0x1fb9   :  { %4252 = vmatpush3.msra.mxu0 %v5560_v10 }
0x1fba   :  { %4253 = vmatprep.subr.mxu0 %v4787_v0 }
0x1fbb   :  { %4254 = vmatpush3.msra.mxu0 %v5567_v26 }
0x1fbc   :  { %4273 = vmatprep.subr.mxu0 %v4787_v0 }
0x2074   :  { %v2541_v38 = vpop.f32.mrf.mxu0 }
0x2075   :  { %v2542_v39 = vadd.f32 %v5458_v22, %v2541_v38 }
0x2076   :  { %v4227_v51 = vpop.f32.mrf.mxu0 }
0x2077   :  { %4526 = vtanh.f32 %v2542_v39  ;;  %v3615_v46 = vmul.f32 -1.442695, %v2542_v39 }
0x2079   :  { %4528 = vpow2.f32 %v3615_v46 }
0x2084   :  { %v4527_v52 = vpop.eup %4526 }
0x2085   :  { %2554 = vrot.lane.b32.xlu1 %v4527_v52, %s4789_s16 }
0x2086   :  { %v4529_v47 = vpop.eup %4528 }
0x2087   :  { %v2548_v53 = vadd.f32 1.0, %v4529_v47 }
0x2089   :  { %4530 = vrcp.f32 %v2548_v53 }
0x2096   :  { %v4531_v54 = vpop.eup %4530 }
0x2097   :  { %v2552_v42 = vmul.f32 %v4531_v54, %v5696_v41 }
0x20f7   :  { %v2555_v63 = vpop.permute.xlu1 %2554 }
0x20f8   :  { %v2557_v4 = vmul.f32 %v4531_v54, %v2555_v63 }
0x20fa   :  { %2559 = vrot.lane.b32.xlu0 %v2557_v4, %s4790_s0 }
0x216c   :  { %v2560_v29 = vpop.permute.xlu0 %2559 }
0x216d   :  { %v5771_v11 = vadd.f32 %v2560_v29, %v2552_v42 }
0x216f   :  { %4532 = vtanh.f32 %v5771_v11 }
0x217c   :  { %v4533_v14 = vpop.eup %4532 }
0x217d   :  { %2565 = vrot.lane.b32.xlu1 %v4533_v14, %s4789_s16 }
0x2181   :  { %2574 = vrot.lane.b32.xlu1 %v5728_v30, %s4789_s16 }
0x21ef   :  { %v2566_v15 = vpop.permute.xlu1 %2565 }
0x21f0   :  { %v2568_v16 = vmul.f32 %v4531_v54, %v2566_v15 }
0x21f2   :  { %2570 = vrot.lane.b32.xlu0 %v2568_v16, %s4790_s0 }
0x21f3   :  { %v2575_v59 = vpop.permute.xlu1 %2574 }
0x2264   :  { %v2571_v55 = vpop.permute.xlu0 %2570 }
0x2265   :  { %v2577_v37 = vsel %vm276_vm5, %v2571_v55, %v2575_v59  ;;  %v4593_v59 = vld [vmem:[%s6030_s1 + $0x18] sm:$0xff]  ;;  %v4594_v55 = vld [vmem:[%s6030_s1 + $0x10] sm:$0xff] }
0x2266   :  { %4245 = vmatmul.mubr.msk.f32.vlgmr.msra.gmra.mxu1 %vm278_vm6, %v2577_v37  ;;  %v4595_v37 = vld [vmem:[%s6030_s1 + $0x8] sm:$0xff] }
0x2267   :  { %4259 = vmatpush3.msra.mxu1 %v5375_v17  ;;  %4270 = vmatprep.mubr.msk.f32.mxu1 %vm4788_vm0, %v4787_v0 }
0x2268   :  { %4260 = vmatprep.subr.mxu1 %v4787_v0 }
0x2269   :  { %4261 = vmatpush3.msra.mxu1 %v5389_v61 }
0x226a   :  { %4262 = vmatprep.subr.mxu1 %v4787_v0 }
0x226b   :  { %4263 = vmatpush3.msra.mxu1 %v5403_v20 }
0x226c   :  { %4264 = vmatprep.subr.mxu1 %v4787_v0 }
0x226d   :  { %4265 = vmatpush3.msra.mxu1 %v5417_v25 }
0x226e   :  { %4266 = vmatprep.subr.mxu1 %v4787_v0 }
0x226f   :  { %4267 = vmatpush3.msra.mxu1 %v5431_v35 }
0x2270   :  { %4268 = vmatprep.subr.mxu1 %v4787_v0 }
0x2271   :  { %4269 = vmatpush3.msra.mxu1 %v5445_v23 }
0x2272   :  { %4292 = vmatprep.subr.mxu1 %v4787_v0 }
0x2326   :  { %v2647_v17 = vpop.f32.mrf.mxu1 }
0x2327   :  { %v2648_v61 = vadd.f32 %v5516_v1, %v2647_v17  ;;  %v4596_v17 = vld [vmem:[%s6030_s1] sm:$0xff] }
0x2328   :  { %v4246_v41 = vpop.f32.mrf.mxu1 }
0x2329   :  { %4534 = vtanh.f32 %v2648_v61  ;;  %v3617_v56 = vmul.f32 -1.442695, %v2648_v61 }
0x232b   :  { %4536 = vpow2.f32 %v3617_v56 }
0x2336   :  { %v4535_v20 = vpop.eup %4534 }
0x2337   :  { %2660 = vrot.lane.b32.xlu0 %v4535_v20, %s4789_s16 }
0x2338   :  { %v4537_v25 = vpop.eup %4536 }
0x2339   :  { %v2654_v6 = vadd.f32 1.0, %v4537_v25 }
0x233b   :  { %4538 = vrcp.f32 %v2654_v6 }
0x2348   :  { %v4539_v35 = vpop.eup %4538 }
0x2349   :  { %v2658_v23 = vmul.f32 %v4539_v35, %v5723_v60 }
0x23a9   :  { %v2661_v57 = vpop.permute.xlu0 %2660 }
0x23aa   :  { %v2663_v8 = vmul.f32 %v4539_v35, %v2661_v57 }
0x23ac   :  { %2665 = vrot.lane.b32.xlu1 %v2663_v8, %s4790_s0 }
0x241e   :  { %v2666_v28 = vpop.permute.xlu1 %2665 }
0x241f   :  { %v5798_v12 = vadd.f32 %v2666_v28, %v2658_v23 }
0x2421   :  { %4540 = vtanh.f32 %v5798_v12 }
0x242e   :  { %v4541_v32 = vpop.eup %4540 }
0x242f   :  { %2671 = vrot.lane.b32.xlu0 %v4541_v32, %s4789_s16 }
0x2433   :  { %2751 = vrot.lane.b32.xlu0 %v2568_v16, %s4791_s30  ;;  %v4592_v16 = vld [vmem:[%s6030_s1 + $0x20] sm:$0xff] }
0x24a1   :  { %v2672_v3 = vpop.permute.xlu0 %2671 }
0x24a2   :  { %v5803_v33 = vmul.f32 %v4539_v35, %v2672_v3 }
0x24a4   :  { %v2675_v34 = vmax.f32 %v5803_v33, 0.0 }
0x24a6   :  { %2677 = vrot.lane.b32.xlu1 %v2675_v34, %s4790_s0 }
0x2518   :  { %v2678_v24 = vpop.permute.xlu1 %2677 }
0x2519   :  { %4256 = vmatmul.mubr.msk.f32.vlgmr.msra.gmra.mxu0 %vm276_vm5, %v2678_v24 }
0x251a   :  { %4274 = vmatpush3.msra.mxu0 %v5359_v9  ;;  %4289 = vmatprep.mubr.msk.f32.mxu0 %vm4788_vm0, %v4787_v0 }
0x251b   :  { %4275 = vmatprep.subr.mxu0 %v4787_v0 }
0x251c   :  { %4276 = vmatpush3.msra.mxu0 %v5369_v58 }
0x251d   :  { %4277 = vmatprep.subr.mxu0 %v4787_v0 }
0x251e   :  { %4278 = vmatpush3.msra.mxu0 %v5383_v18  ;;  %v2752_v18 = vpop.permute.xlu0 %2751 }
0x251f   :  { %4279 = vmatprep.subr.mxu0 %v4787_v0 }
0x2520   :  { %4280 = vmatpush3.msra.mxu0 %v5397_v19 }
0x2521   :  { %4281 = vmatprep.subr.mxu0 %v4787_v0 }
0x2522   :  { %4282 = vmatpush3.msra.mxu0 %v5411_v21 }
0x2523   :  { %4283 = vmatprep.subr.mxu0 %v4787_v0 }
0x2524   :  { %4284 = vmatpush3.msra.mxu0 %v5425_v31 }
0x2525   :  { %4285 = vmatprep.subr.mxu0 %v4787_v0 }
0x2526   :  { %4286 = vmatpush3.msra.mxu0 %v5439_v36 }
0x2527   :  { %4287 = vmatprep.subr.mxu0 %v4787_v0 }
0x2528   :  { %4288 = vmatpush3.msra.mxu0 %v5454_v13 }
0x2529   :  { %4303 = vmatprep.subr.mxu0 %v4787_v0 }
0x25d9   :  { %v2747_v9 = vpop.f32.mrf.mxu0 }
0x25da   :  { %v5827_v58 = vadd.f32 %v5638_v43, %v2747_v9 }
0x25db   :  { %v4257_v19 = vpop.f32.mrf.mxu0 }
0x25dc   :  { %v2754_v21 = vsel %vm172_vm2, %v5827_v58, %v2752_v18  ;;  %v4598_v19 = vld [vmem:[%s6032_s3 + $0x30] sm:$0xff] }
0x25dd   :  { %4271 = vmatmul.mubr.msk.f32.vlgmr.msra.gmra.mxu1 %vm174_vm3, %v2754_v21  ;;  %v4599_v21 = vld [vmem:[%s6032_s3 + $0x28] sm:$0xff] }
0x25de   :  { %4293 = vmatpush3.msra.mxu1 %v5547_v5  ;;  %4300 = vmatprep.mubr.msk.f32.mxu1 %vm4788_vm0, %v4787_v0 }
0x25df   :  { %4294 = vmatprep.subr.mxu1 %v4787_v0 }
0x25e0   :  { %4295 = vmatpush3.msra.mxu1 %v5552_v7 }
0x25e1   :  { %4296 = vmatprep.subr.mxu1 %v4787_v0 }
0x25e2   :  { %4297 = vmatpush3.msra.mxu1 %v5560_v10 }
0x25e3   :  { %4298 = vmatprep.subr.mxu1 %v4787_v0 }
0x25e4   :  { %4299 = vmatpush3.msra.mxu1 %v5567_v26 }
0x25e5   :  { %4318 = vmatprep.subr.mxu1 %v4787_v0 }
0x269d   :  { %v2824_v31 = vpop.f32.mrf.mxu1 }
0x269e   :  { %v2825_v36 = vadd.f32 %v5458_v22, %v2824_v31  ;;  %v4600_v31 = vld [vmem:[%s6032_s3 + $0x20] sm:$0xff] }
0x269f   :  { %v4272_v13 = vpop.f32.mrf.mxu1 }
0x26a0   :  { %4542 = vtanh.f32 %v2825_v36  ;;  %v3620_v38 = vmul.f32 -1.442695, %v2825_v36  ;;  %v4601_v36 = vld [vmem:[%s6032_s3 + $0x18] sm:$0xff]  ;;  %v4602_v13 = vld [vmem:[%s6032_s3 + $0x10] sm:$0xff] }
0x26a2   :  { %4544 = vpow2.f32 %v3620_v38  ;;  %v4604_v38 = vld [vmem:[%s6032_s3] sm:$0xff] }
0x26ad   :  { %v4543_v60 = vpop.eup %4542 }
0x26ae   :  { %2837 = vrot.lane.b32.xlu1 %v4543_v60, %s4789_s16  ;;  %v4603_v60 = vld [vmem:[%s6032_s3 + $0x8] sm:$0xff] }
0x26af   :  { %v4545_v39 = vpop.eup %4544 }
0x26b0   :  { %v2831_v51 = vadd.f32 1.0, %v4545_v39  ;;  %v3490_v39 = vrot.slane %v5827_v58, 7 }
0x26b2   :  { %4546 = vrcp.f32 %v2831_v51 }
0x26bf   :  { %v4547_v52 = vpop.eup %4546 }
0x26c0   :  { %v2835_v53 = vmul.f32 %v4547_v52, %v5771_v11  ;;  %v4591_v11 = vld [vmem:[%s6030_s1 + $0x28] sm:$0xff] }
0x2720   :  { %v2838_v46 = vpop.permute.xlu1 %2837 }
0x2721   :  { %v2840_v47 = vmul.f32 %v4547_v52, %v2838_v46 }
0x2723   :  { %2842 = vrot.lane.b32.xlu0 %v2840_v47, %s4790_s0 }
0x2795   :  { %v2843_v54 = vpop.permute.xlu0 %2842 }
0x2796   :  { %v5846_v63 = vadd.f32 %v2843_v54, %v2835_v53 }
0x2798   :  { %4548 = vtanh.f32 %v5846_v63 }
0x27a5   :  { %v4549_v22 = vpop.eup %4548 }
0x27a6   :  { %2848 = vrot.lane.b32.xlu1 %v4549_v22, %s4789_s16  ;;  %v3507_v22 = vsel %vm1658_vm9, %v5752_v44, %v3490_v39  ;;  %v3326_v39 = vrot.slane %v5803_v33, 4 }
0x27aa   :  { %2857 = vrot.lane.b32.xlu1 %v5803_v33, %s4789_s16 }
0x2818   :  { %v2849_v4 = vpop.permute.xlu1 %2848 }
0x2819   :  { %v2851_v42 = vmul.f32 %v4547_v52, %v2849_v4 }
0x281b   :  { %2853 = vrot.lane.b32.xlu0 %v2851_v42, %s4790_s0 }
0x281c   :  { %v2858_v29 = vpop.permute.xlu1 %2857 }
0x288d   :  { %v2854_v14 = vpop.permute.xlu0 %2853 }
0x288e   :  { %v2860_v15 = vsel %vm276_vm5, %v2854_v14, %v2858_v29 }
0x288f   :  { %4290 = vmatmul.mubr.msk.f32.vlgmr.msra.gmra.mxu0 %vm278_vm6, %v2860_v15 }
0x2890   :  { %4304 = vmatpush3.msra.mxu0 %v4591_v11  ;;  %4315 = vmatprep.mubr.msk.f32.mxu0 %vm4788_vm0, %v4787_v0 }
0x2891   :  { %4305 = vmatprep.subr.mxu0 %v4787_v0 }
0x2892   :  { %4306 = vmatpush3.msra.mxu0 %v4592_v16 }
0x2893   :  { %4307 = vmatprep.subr.mxu0 %v4787_v0 }
0x2894   :  { %4308 = vmatpush3.msra.mxu0 %v4593_v59 }
0x2895   :  { %4309 = vmatprep.subr.mxu0 %v4787_v0 }
0x2896   :  { %4310 = vmatpush3.msra.mxu0 %v4594_v55 }
0x2897   :  { %4311 = vmatprep.subr.mxu0 %v4787_v0 }
0x2898   :  { %4312 = vmatpush3.msra.mxu0 %v4595_v37 }
0x2899   :  { %4313 = vmatprep.subr.mxu0 %v4787_v0 }
0x289a   :  { %4314 = vmatpush3.msra.mxu0 %v4596_v17 }
0x289b   :  { %4337 = vmatprep.subr.mxu0 %v4787_v0 }
0x294f   :  { %v2930_v61 = vpop.f32.mrf.mxu0 }
0x2950   :  { %v2931_v41 = vadd.f32 %v5516_v1, %v2930_v61 }
0x2951   :  { %v4291_v20 = vpop.f32.mrf.mxu0 }
0x2952   :  { %4550 = vtanh.f32 %v2931_v41  ;;  %v3622_v25 = vmul.f32 -1.442695, %v2931_v41 }
0x2954   :  { %4552 = vpow2.f32 %v3622_v25 }
0x295f   :  { %v4551_v56 = vpop.eup %4550 }
0x2960   :  { %2943 = vrot.lane.b32.xlu0 %v4551_v56, %s4789_s16 }
0x2961   :  { %v4553_v6 = vpop.eup %4552 }
0x2962   :  { %v2937_v35 = vadd.f32 1.0, %v4553_v6 }
0x2964   :  { %4554 = vrcp.f32 %v2937_v35 }
0x2971   :  { %v4555_v57 = vpop.eup %4554 }
0x2972   :  { %v2941_v28 = vmul.f32 %v4555_v57, %v5798_v12  ;;  %v4597_v12 = vld [vmem:[%s6032_s3 + $0x38] sm:$0xff] }
0x29d2   :  { %v2944_v8 = vpop.permute.xlu0 %2943 }
0x29d3   :  { %v2946_v23 = vmul.f32 %v4555_v57, %v2944_v8 }
0x29d5   :  { %2948 = vrot.lane.b32.xlu1 %v2946_v23, %s4790_s0 }
0x2a47   :  { %v2949_v32 = vpop.permute.xlu1 %2948 }
0x2a48   :  { %v5885_v3 = vadd.f32 %v2949_v32, %v2941_v28 }
0x2a4a   :  { %4556 = vtanh.f32 %v5885_v3 }
0x2a57   :  { %v4557_v1 = vpop.eup %4556 }
0x2a58   :  { %2954 = vrot.lane.b32.xlu0 %v4557_v1, %s4789_s16 }
0x2a5c   :  { %3034 = vrot.lane.b32.xlu0 %v2851_v42, %s4791_s30  ;;  %v4605_v42 = vld [vmem:[#allocation5] ss:$0 sm:$0xff] }
0x2aca   :  { %v2955_v34 = vpop.permute.xlu0 %2954 }
0x2acb   :  { %v5890_v24 = vmul.f32 %v4555_v57, %v2955_v34 }
0x2acd   :  { %v2958_v9 = vmax.f32 %v5890_v24, 0.0 }
0x2ace   :  { %v3035_v46 = vpop.permute.xlu0 %3034 }
0x2acf   :  { %2960 = vrot.lane.b32.xlu1 %v2958_v9, %s4790_s0 }
0x2b41   :  { %v2961_v18 = vpop.permute.xlu1 %2960 }
0x2b42   :  { %4301 = vmatmul.mubr.msk.f32.vlgmr.msra.gmra.mxu1 %vm276_vm5, %v2961_v18 }
0x2b43   :  { %4319 = vmatpush3.msra.mxu1 %v4597_v12  ;;  %4334 = vmatprep.mubr.msk.f32.mxu1 %vm4788_vm0, %v4787_v0  ;;  %v3317_v12 = vrot.slane %v5803_v33, 7 }
0x2b44   :  { %4320 = vmatprep.subr.mxu1 %v4787_v0 }
0x2b45   :  { %4321 = vmatpush3.msra.mxu1 %v4598_v19  ;;  %v3319_v19 = vrot.slane %v5890_v24, 6 }
0x2b46   :  { %4322 = vmatprep.subr.mxu1 %v4787_v0 }
0x2b47   :  { %4323 = vmatpush3.msra.mxu1 %v4599_v21 }
0x2b48   :  { %4324 = vmatprep.subr.mxu1 %v4787_v0 }
0x2b49   :  { %4325 = vmatpush3.msra.mxu1 %v4600_v31 }
0x2b4a   :  { %4326 = vmatprep.subr.mxu1 %v4787_v0 }
0x2b4b   :  { %4327 = vmatpush3.msra.mxu1 %v4601_v36  ;;  %v3332_v36 = vsel %vm1658_vm9, %v5728_v30, %v3317_v12 }
0x2b4c   :  { %4328 = vmatprep.subr.mxu1 %v4787_v0 }
0x2b4d   :  { %4329 = vmatpush3.msra.mxu1 %v4602_v13 }
0x2b4e   :  { %4330 = vmatprep.subr.mxu1 %v4787_v0 }
0x2b4f   :  { %4331 = vmatpush3.msra.mxu1 %v4603_v60 }
0x2b50   :  { %4332 = vmatprep.subr.mxu1 %v4787_v0 }
0x2b51   :  { %4333 = vmatpush3.msra.mxu1 %v4604_v38  ;;  %v3324_v38 = vrot.slane %v5728_v30, 5 }
0x2b52   :  { %4348 = vmatprep.subr.mxu1 %v4787_v0 }
0x2c02   :  { %v3030_v51 = vpop.f32.mrf.mxu1 }
0x2c03   :  { %v5931_v52 = vadd.f32 %v5638_v43, %v3030_v51 }
0x2c04   :  { %v4302_v47 = vpop.f32.mrf.mxu1 }
0x2c05   :  { %v3037_v53 = vsel %vm172_vm2, %v5931_v52, %v3035_v46  ;;  %v3493_v54 = vrot.slane %v5931_v52, 6  ;;  %v3328_v46 = vrot.slane %v5890_v24, 3 }
0x2c06   :  { %4316 = vmatmul.mubr.msk.f32.vlgmr.msra.gmra.mxu0 %vm174_vm3, %v3037_v53 }
0x2c07   :  { %4338 = vmatpush3.msra.mxu0 %v5547_v5  ;;  %4345 = vmatprep.mubr.msk.f32.mxu0 %vm4788_vm0, %v4787_v0  ;;  %v5943_v4 = vsel %vm1894_vm10, %v3507_v22, %v3493_v54 }
0x2c08   :  { %4339 = vmatprep.subr.mxu0 %v4787_v0 }
0x2c09   :  { %4340 = vmatpush3.msra.mxu0 %v5552_v7 }
0x2c0a   :  { %4341 = vmatprep.subr.mxu0 %v4787_v0 }
0x2c0b   :  { %4342 = vmatpush3.msra.mxu0 %v5560_v10 }
0x2c0c   :  { %4343 = vmatprep.subr.mxu0 %v4787_v0 }
0x2c0d   :  { %4344 = vmatpush3.msra.mxu0 %v5567_v26 }
0x2c0e   :  { %4359 = vmatprep.subr.mxu0 %v4787_v0 }
0x2cc6   :  { %v3107_v5 = vpop.f32.mrf.mxu0 }
0x2cc7   :  { %v3108_v29 = vadd.f32 %v4605_v42, %v3107_v5 }
0x2cc8   :  { %v4317_v14 = vpop.f32.mrf.mxu0 }
0x2cc9   :  { %4558 = vtanh.f32 %v3108_v29  ;;  %v3625_v11 = vmul.f32 -1.442695, %v3108_v29 }
0x2ccb   :  { %4560 = vpow2.f32 %v3625_v11  ;;  %v3499_v11 = vrot.slane %v5752_v44, 5 }
0x2cd6   :  { %v4559_v15 = vpop.eup %4558 }
0x2cd7   :  { %3120 = vrot.lane.b32.xlu1 %v4559_v15, %s4789_s16 }
0x2cd8   :  { %v4561_v7 = vpop.eup %4560 }
0x2cd9   :  { %v3114_v16 = vadd.f32 1.0, %v4561_v7  ;;  %v3501_v7 = vrot.slane %v5827_v58, 4 }
0x2cdb   :  { %4562 = vrcp.f32 %v3114_v16  ;;  %v3503_v16 = vrot.slane %v5931_v52, 3 }
0x2ce8   :  { %v4563_v10 = vpop.eup %4562 }
0x2ce9   :  { %v3118_v26 = vmul.f32 %v4563_v10, %v5846_v63 }
0x2d49   :  { %v3121_v59 = vpop.permute.xlu1 %3120 }
0x2d4a   :  { %v3123_v55 = vmul.f32 %v4563_v10, %v3121_v59 }
0x2d4c   :  { %3125 = vrot.lane.b32.xlu0 %v3123_v55, %s4790_s0 }
0x2dbe   :  { %v3126_v37 = vpop.permute.xlu0 %3125 }
0x2dbf   :  { %v3128_v17 = vadd.f32 %v3126_v37, %v3118_v26 }
0x2dc1   :  { %4564 = vtanh.f32 %v3128_v17 }
0x2dce   :  { %v4565_v61 = vpop.eup %4564 }
0x2dcf   :  { %3131 = vrot.lane.b32.xlu1 %v4565_v61, %s4789_s16 }
0x2dd3   :  { %3140 = vrot.lane.b32.xlu1 %v5890_v24, %s4789_s16 }
0x2e41   :  { %v3132_v41 = vpop.permute.xlu1 %3131 }
0x2e42   :  { %v3134_v20 = vmul.f32 %v4563_v10, %v3132_v41 }
0x2e44   :  { %3136 = vrot.lane.b32.xlu0 %v3134_v20, %s4790_s0 }
0x2e45   :  { %v3141_v56 = vpop.permute.xlu1 %3140 }
0x2eb6   :  { %v3137_v25 = vpop.permute.xlu0 %3136 }
0x2eb7   :  { %v3143_v6 = vsel %vm276_vm5, %v3137_v25, %v3141_v56 }
0x2eb8   :  { %4335 = vmatmul.mubr.msk.f32.vlgmr.msra.gmra.mxu1 %vm278_vm6, %v3143_v6 }
0x2eb9   :  { %4349 = vmatpush3.msra.mxu1 %v5576_v27  ;;  %4356 = vmatprep.mubr.msk.f32.mxu1 %vm4788_vm0, %v4787_v0  ;;  %v4606_v27 = vld [vmem:[%s6033_s4] ss:$0 sm:$0xff]  ;;  %s4792_s4 = smov [#allocation13]  }
0x2eba   :  { %4350 = vmatprep.subr.mxu1 %v4787_v0 }
0x2ebb   :  { %4351 = vmatpush3.msra.mxu1 %v5592_v40 }
0x2ebc   :  { %4352 = vmatprep.subr.mxu1 %v4787_v0 }
0x2ebd   :  { %4353 = vmatpush3.msra.mxu1 %v5600_v45 }
0x2ebe   :  { %4354 = vmatprep.subr.mxu1 %v4787_v0 }
0x2ebf   :  { %4355 = vmatpush3.msra.mxu1 %v5607_v48 }
0x2f78   :  { %v3213_v63 = vpop.f32.mrf.mxu1 }
0x2f79   :  { %v3214_v35 = vadd.f32 %v4606_v27, %v3213_v63 }
0x2f7a   :  { %v4336_v57 = vpop.f32.mrf.mxu1 }
0x2f7b   :  { %4566 = vtanh.f32 %v3214_v35  ;;  %v3627_v40 = vmul.f32 -1.442695, %v3214_v35 }
0x2f7d   :  { %4568 = vpow2.f32 %v3627_v40 }
0x2f88   :  { %v4567_v8 = vpop.eup %4566 }
0x2f89   :  { %3226 = vrot.lane.b32.xlu0 %v4567_v8, %s4789_s16 }
0x2f8a   :  { %v4569_v23 = vpop.eup %4568 }
0x2f8b   :  { %v3220_v28 = vadd.f32 1.0, %v4569_v23 }
0x2f8d   :  { %4570 = vrcp.f32 %v3220_v28 }
0x2f9a   :  { %v4571_v45 = vpop.eup %4570 }
0x2f9b   :  { %v3224_v48 = vmul.f32 %v4571_v45, %v5885_v3  ;;  %v3333_v3 = vsel %vm1894_vm10, %v3332_v36, %v3319_v19 }
0x2ffb   :  { %v3227_v32 = vpop.permute.xlu0 %3226 }
0x2ffc   :  { %v3229_v1 = vmul.f32 %v4571_v45, %v3227_v32 }
0x2ffe   :  { %3231 = vrot.lane.b32.xlu1 %v3229_v1, %s4790_s0 }
0x3070   :  { %v3232_v34 = vpop.permute.xlu1 %3231 }
0x3071   :  { %v3234_v9 = vadd.f32 %v3232_v34, %v3224_v48 }
0x3073   :  { %4572 = vtanh.f32 %v3234_v9 }
0x3080   :  { %v4573_v18 = vpop.eup %4572 }
0x3081   :  { %3237 = vrot.lane.b32.xlu0 %v4573_v18, %s4789_s16 }
0x30f3   :  { %v3238_v21 = vpop.permute.xlu0 %3237 }
0x30f4   :  { %v3240_v31 = vmul.f32 %v4571_v45, %v3238_v21 }
0x30f6   :  { %v3241_v13 = vmax.f32 %v3240_v31, 0.0  ;;  %v3322_v60 = vrot.slane %v3240_v31, 5  ;;  %v3330_v53 = vrot.slane %v3240_v31, 2 }
0x30f8   :  { %v3334_v51 = vsel %vm1896_vm12, %v3333_v3, %v3322_v60  ;;  %3243 = vrot.lane.b32.xlu0 %v3241_v13, %s4790_s0 }
0x30f9   :  { %v3335_v47 = vsel %vm1898_vm14, %v3334_v51, %v3324_v38 }
0x30fa   :  { %v3336_v54 = vsel %vm1900_vm1, %v3335_v47, %v3326_v39 }
0x30fb   :  { %v3337_v22 = vsel %vm1902_vm4, %v3336_v54, %v3328_v46 }
0x30fc   :  { %v3338_v5 = vsel %vm1904_vm7, %v3337_v22, %v3330_v53 }
0x30fd   :  { %v3339_v30 = vmax.f32 %v3338_v5, 0.0 }
0x30ff   :  { %3341 = vrot.lane.b32.xlu1 %v3339_v30, %s4790_s0  ;;  %s3531_s0 = sshll.u32 %s4792_s4, 4  ;;  %s3532_s0 = int_to_ptr.vmem [resolvable:$true] %s3531_s0 }
0x3100   :  { %s4727_s20 = scalar_lea.vmem %s3532_s0, 256  ;;  %p4732_p3 = scmp.lt.s32.totalorder %s3532_s0, %s3532_s0 }
0x3101   :  { %p4728_p2 = scmp.ne.s32.totalorder %s3532_s0, %s4727_s20  ;;  %p4733_p4 = scmp.lt.s32.totalorder %s4727_s20, %s4727_s20 }
0x3103   :  { %p4734_p5 = por %p4733_p4, %p4732_p3 }
0x3105   :  { %p4735_p6 = pnand %p4734_p5, %p4728_p2 }
0x316a   :  { %v3244_v42 = vpop.permute.xlu0 %3243 }
0x316b   :  { %4346 = vmatmul.mubr.msk.f32.vlgmr.msra.gmra.mxu0 %vm276_vm5, %v3244_v42 }
0x316c   :  { %4360 = vmatpush3.msra.mxu0 %v5629_v49  ;;  %4363 = vmatprep.mubr.msk.f32.mxu0 %vm4788_vm0, %v4787_v0  ;;  %vm3517_vm0 = vcmask 125952  }
0x316d   :  { %4361 = vmatprep.subr.mxu0 %v4787_v0 }
0x316e   :  { %4362 = vmatpush3.msra.mxu0 %v5633_v50 }
0x3171   :  { %v3342_v33 = vpop.permute.xlu1 %3341 }
0x3172   :  { %4357 = vmatmul.mubr.msk.f32.vlgmr.msra.gmra.mxu1 %vm276_vm5, %v3342_v33 }
0x322b   :  { %v3313_v24 = vpop.f32.mrf.mxu0 }
0x322c   :  { %v3314_v29 = vadd.f32 %v5638_v43, %v3313_v24 }
0x322d   :  { %v4347_v14 = vpop.f32.mrf.mxu0 }
0x322e   :  { %v3496_v15 = vrot.slane %v3314_v29, 5  ;;  %v3505_v50 = vrot.slane %v3314_v29, 2 }
0x3230   :  { %v3509_v49 = vsel %vm1896_vm12, %v5943_v4, %v3496_v15 }
0x3231   :  { %v3510_v0 = vsel %vm1898_vm14, %v3509_v49, %v3499_v11 }
0x3232   :  { %v3511_v10 = vsel %vm1900_vm1, %v3510_v0, %v3501_v7  ;;  %v3411_v59 = vpop.f32.mrf.mxu1 }
0x3233   :  { %v3512_v43 = vsel %vm1902_vm4, %v3511_v10, %v3503_v16  ;;  %v3412_v55 = vadd.f32 %v5646_v62, %v3411_v59 }
0x3234   :  { %v3513_v44 = vsel %vm1904_vm7, %v3512_v43, %v3505_v50  ;;  %v4358_v26 = vpop.f32.mrf.mxu1 }
0x3235   :  { %v3515_v58 = vcombine.high %v3513_v44, %v3513_v44  ;;  %v3415_v37 = vmax.f32 %v3412_v55, 0.0  ;;  %3518 = vst.msk [vmem:[#allocation14] sm:$0xf] %vm3517_vm0, %v3513_v44 }
0x3237   :  { %4364 = vmatmul.mubr.msk.f32.vlgmr.msra.gmra.mxu0 %vm172_vm2, %v3415_v37  ;;  %3519 = vst.msk [vmem:[#allocation14 + $0x4] sm:$0xf] %vm3517_vm0, %v3515_v58 }
0x3238   :  { %4738 = shalt.err (!%p4735_p6)
}
0x3239   :  { %3537 = dma.vmem_to_hbm [thread:$0]  %s3532_s0, 256, %s6040_s11, [#allocation4], %s4782_s2, %s4782_s2, %s4783_s23  }
0x323a   :  { %s4747_s1 = scalar_lea.vmem %s3544_s19, 128  ;;  %p4752_p8 = scmp.lt.s32.totalorder %s3544_s19, %s3544_s19 }
0x323b   :  { %p4748_p7 = scmp.ne.s32.totalorder %s3544_s19, %s4747_s1  ;;  %p4753_p9 = scmp.lt.s32.totalorder %s4747_s1, %s4747_s1 }
0x323d   :  { %p4754_p10 = por %p4753_p9, %p4752_p8 }
0x323f   :  { %p4755_p11 = pnand %p4754_p10, %p4748_p7 }
0x3241   :  { %4758 = shalt.err (!%p4755_p11)
}
0x3242   :  { %s4794_s21 = smov 4   ;;  %vm3523_vm2 = vcmask 68608  }
0x3243   :  { %3549 = dma.vmem_to_hbm [thread:$0]  %s3544_s19, 128, %s6041_s12, [#allocation15], %s4789_s16, %s4789_s16, %s4794_s21  }
0x32f7   :  { %v3485_v62 = vpop.f32.mrf.mxu0 }
0x32f8   :  { %v3486_v52 = vadd.f32 %v5683_v2, %v3485_v62 }
0x32f9   :  { %v4365_v4 = vpop.f32.mrf.mxu0 }
0x32fa   :  { %v3521_v17 = vcombine.high %v3486_v52, %v3486_v52  ;;  %3524 = vst.msk [vmem:[%s6042_s13 + $0x8] sm:$0xf] %vm3523_vm2, %v3486_v52 }
0x32fc   :  { %3525 = vst.msk [vmem:[%s6042_s13 + $0x18] sm:$0xf] %vm3523_vm2, %v3521_v17 }
0x32fd   :  { %4775 = dma.done.wait [#allocation4], 256  }
0x32fe   :  { %4776 = vsyncadd [#allocation4], 4294967040 }
0x32ff   :  { %4777 = dma.done.wait [#allocation15], 128  }
0x3300   :  { %4778 = vsyncadd [#allocation15], 4294967168 }
0x3301   :  { %3560 = vsyncpa [#allocation3], 1 }
0x3302   :  { %3561 = vsyncpa [#allocation6], 1 }
0x3303   :  { %3562 = vsyncpa [#allocation9], 1 }
0x3304   :  { %3563 = vsyncpa [#allocation12], 1 }
0x3305   :  { %3564 = vsyncpa [#allocation4], 1 }
0x3306   :  { %3565 = vsyncpa [#allocation15], 1 }

</bundles_post_ra>
